<compile_context>
chip_gen: v6e
topology: v6e:2x2x1
jax: 0.10.0
libtpu: 0.0.40
codegen_flags: <defaults>
</compile_context>

<pallas_src>
import jax
import jax.numpy as jnp
from jax.experimental import pallas as pl
from jax.experimental.pallas import tpu as pltpu

# ----------------------------- hyperparameters ------------------------------
RNN_TYPE = "LSTM"
NTOKEN = 256
NINP = 32
NHID = 32
NLAYERS = 2
N_EXPERTS = 4
SEQ_LEN = 8
BATCH = 2
B_PAD = 8          # pad batch to a full sublane group (8 rows)


# ------------------------------ fused kernel ---------------------------------
def _softmax_lastdim(x):
    """Numerically stable softmax; divide goes to the EUP via approx recip."""
    m = jnp.max(x, axis=-1, keepdims=True)
    e = jnp.exp(x - m)
    return e * pl.reciprocal(jnp.sum(e, axis=-1, keepdims=True), approx=True)


def fused_forward_kernel(x_ref, h0_ref, c0_ref,
                         w0_ref, b0_ref, w1_ref, b1_ref,
                         wlp_ref, blp_ref, wdec_ref, bdec_ref,
                         logp_ref, hn_ref, cn_ref,
                         y_scr):
    T, B, _ = x_ref.shape
    H = NHID
    E = N_EXPERTS
    EH = E * H

    ws = [w0_ref[...], w1_ref[...]]          # (in_dim+H, 4H) each
    bs = [b0_ref[...], b1_ref[...]]          # (1, 4H) each
    hs = [h0_ref[l] for l in range(NLAYERS)]  # (B, H)
    cs = [c0_ref[l] for l in range(NLAYERS)]  # (B, H)

    # ---- LSTM stack: fully unrolled time loop, state carried in registers ---
    for t in range(T):
        inp = x_ref[t]                                        # (B, in_dim)
        for l in range(NLAYERS):
            # one fused gate matmul: [x_t | h] @ [Wih^T ; Whh^T]
            xh = jnp.concatenate([inp, hs[l]], axis=1)        # (B, in_dim+H)
            gates = jnp.dot(xh, ws[l],
                            preferred_element_type=jnp.float32) + bs[l]  # (B, 4H)
            # PyTorch gate order i, f, g, o (static 32-lane slices of one vreg)
            i_g = jax.nn.sigmoid(gates[:, 0 * H:1 * H])
            f_g = jax.nn.sigmoid(gates[:, 1 * H:2 * H])
            g_g = jnp.tanh(gates[:, 2 * H:3 * H])
            o_g = jax.nn.sigmoid(gates[:, 3 * H:4 * H])
            c_new = f_g * cs[l] + i_g * g_g
            h_new = o_g * jnp.tanh(c_new)
            hs[l] = h_new
            cs[l] = c_new
            inp = h_new
        # stash top-layer output; the whole slab feeds the MoS head below
        y_scr[t * B:(t + 1) * B, :] = inp

    for l in range(NLAYERS):
        hn_ref[l] = hs[l]
        cn_ref[l] = cs[l]

    # ---- MoS head on all T*B rows at once -----------------------------------
    xflat = y_scr[...]                                        # (N, H)
    N = xflat.shape[0]

    # fused latent + prior projection: one matmul, prior columns in the padding
    lp = jnp.dot(xflat, wlp_ref[...],
                 preferred_element_type=jnp.float32) + blp_ref[...]   # (N, E*H+E)
    latent = jnp.tanh(lp[:, :EH])                             # (N, E*H)
    prior = _softmax_lastdim(lp[:, EH:EH + E])                # (N, E)

    # one batched decoder matmul + one softmax pass over all experts
    lat_stack = jnp.concatenate(
        [latent[:, e * H:(e + 1) * H] for e in range(E)], axis=0)       # (E*N, H)
    logits = jnp.dot(lat_stack, wdec_ref[...],
                     preferred_element_type=jnp.float32) + bdec_ref[...]  # (E*N, V)
    probs = _softmax_lastdim(logits)                          # (E*N, V)

    # expert mixture: cheap weighted sum of sublane-aligned row blocks
    mix = probs[0:N, :] * prior[:, 0:1]
    for e in range(1, E):
        mix = mix + probs[e * N:(e + 1) * N, :] * prior[:, e:e + 1]
    logp_ref[...] = jnp.log(mix + 1e-8)                       # (N, V) lane-dense


# ------------------------------ wrappers --------------------------------------
def prepare_params(params):
    """One-time re-layout of PyTorch-style weights into kernel layout."""
    prep = {"encoder": params["encoder"], "lstm_w": [], "lstm_b": []}
    for l in range(NLAYERS):
        w_ih, w_hh, b_ih, b_hh = params["lstm"][l]
        prep["lstm_w"].append(jnp.concatenate(
            [jnp.transpose(w_ih), jnp.transpose(w_hh)], axis=0))   # (in_dim+H, 4H)
        prep["lstm_b"].append((b_ih + b_hh).reshape(1, -1))        # (1, 4H)
    prep["w_latprior"] = jnp.concatenate(
        [jnp.transpose(params["w_latent"]), jnp.transpose(params["w_prior"])],
        axis=1)                                                    # (H, E*H+E)
    prep["b_latprior"] = jnp.concatenate(
        [params["b_latent"],
         jnp.zeros((N_EXPERTS,), jnp.float32)]).reshape(1, -1)     # (1, E*H+E)
    prep["w_dec"] = jnp.transpose(params["w_decoder"])             # (H, V)
    prep["b_dec"] = params["b_decoder"].reshape(1, -1)             # (1, V)
    return prep


def mos_rnn_forward(prep, tokens, hidden):
    """tokens: (T, B) int32; hidden = (h0, c0) each (nlayers, B, nhid)."""
    T, B = tokens.shape
    assert B <= B_PAD
    pad = B_PAD - B

    # Embedding lookup (gather) + eval-mode dropout: plain-JAX glue.
    emb = prep["encoder"][tokens]                          # (T, B, NINP)
    h0, c0 = hidden

    emb_p = jnp.pad(emb, ((0, 0), (0, pad), (0, 0)))       # (T, B_PAD, NINP)
    h0_p = jnp.pad(h0, ((0, 0), (0, pad), (0, 0)))         # (NLAYERS, B_PAD, H)
    c0_p = jnp.pad(c0, ((0, 0), (0, pad), (0, 0)))

    vmem = pl.BlockSpec(memory_space=pltpu.MemorySpace.VMEM)
    logp, hn, cn = pl.pallas_call(
        fused_forward_kernel,
        out_shape=(jax.ShapeDtypeStruct((T * B_PAD, NTOKEN), jnp.float32),
                   jax.ShapeDtypeStruct((NLAYERS, B_PAD, NHID), jnp.float32),
                   jax.ShapeDtypeStruct((NLAYERS, B_PAD, NHID), jnp.float32)),
        in_specs=[vmem] * 11,
        out_specs=(vmem, vmem, vmem),
        scratch_shapes=[pltpu.VMEM((T * B_PAD, NHID), jnp.float32)],
    )(emb_p, h0_p, c0_p,
      prep["lstm_w"][0], prep["lstm_b"][0],
      prep["lstm_w"][1], prep["lstm_b"][1],
      prep["w_latprior"], prep["b_latprior"],
      prep["w_dec"], prep["b_dec"])

    log_prob = logp.reshape(T, B_PAD, NTOKEN)[:, :B, :]
    return log_prob, (hn[:, :B, :], cn[:, :B, :])


# ------------------------------ reference (pure JAX) --------------------------
def reference_forward(params, tokens, hidden):
    emb = params["encoder"][tokens]
    h0s, c0s = hidden
    x = emb
    hns, cns = [], []
    for l in range(NLAYERS):
        w_ih, w_hh, b_ih, b_hh = params["lstm"][l]

        def step(carry, x_t, w_ih=w_ih, w_hh=w_hh, b_ih=b_ih, b_hh=b_hh):
            h, c = carry
            gates = x_t @ w_ih.T + h @ w_hh.T + b_ih + b_hh
            Hh = h.shape[-1]
            i = jax.nn.sigmoid(gates[:, :Hh])
            f = jax.nn.sigmoid(gates[:, Hh:2 * Hh])
            g = jnp.tanh(gates[:, 2 * Hh:3 * Hh])
            o = jax.nn.sigmoid(gates[:, 3 * Hh:])
            c = f * c + i * g
            h = o * jnp.tanh(c)
            return (h, c), h

        (hn, cn), ys = jax.lax.scan(step, (h0s[l], c0s[l]), x)
        x = ys
        hns.append(hn)
        cns.append(cn)

    output = x
    T, B, H = output.shape
    flat = output.reshape(-1, H)
    latent = jnp.tanh(flat @ params["w_latent"].T + params["b_latent"])
    logit = latent.reshape(-1, H) @ params["w_decoder"].T + params["b_decoder"]
    prior = jax.nn.softmax(flat @ params["w_prior"].T, -1)
    V = params["w_decoder"].shape[0]
    prob = jax.nn.softmax(logit, -1).reshape(-1, N_EXPERTS, V)
    prob = (prob * prior[:, :, None]).sum(1)
    prob = jnp.log(prob + 1e-8)
    return prob.reshape(T, B, V), (jnp.stack(hns), jnp.stack(cns))


# ------------------------------ parameter init --------------------------------
def init_params(key):
    ks = jax.random.split(key, 8 + 4 * NLAYERS)
    initrange = 0.1
    stdv = 1.0 / jnp.sqrt(NHID)

    params = {
        "encoder": jax.random.uniform(ks[0], (NTOKEN, NINP), jnp.float32,
                                      -initrange, initrange),
        "w_decoder": jax.random.uniform(ks[1], (NTOKEN, NHID), jnp.float32,
                                        -initrange, initrange),
        "b_decoder": jnp.zeros((NTOKEN,), jnp.float32),
        "w_prior": jax.random.uniform(ks[2], (N_EXPERTS, NHID), jnp.float32,
                                      -stdv, stdv),
        "w_latent": jax.random.uniform(ks[3], (N_EXPERTS * NHID, NHID),
                                       jnp.float32, -stdv, stdv),
        "b_latent": jax.random.uniform(ks[4], (N_EXPERTS * NHID,), jnp.float32,
                                       -stdv, stdv),
    }

    lstm = []
    for l in range(NLAYERS):
        in_dim = NINP if l == 0 else NHID
        kw = jax.random.split(ks[8 + l], 4)
        lstm.append((
            jax.random.uniform(kw[0], (4 * NHID, in_dim), jnp.float32, -stdv, stdv),
            jax.random.uniform(kw[1], (4 * NHID, NHID), jnp.float32, -stdv, stdv),
            jax.random.uniform(kw[2], (4 * NHID,), jnp.float32, -stdv, stdv),
            jax.random.uniform(kw[3], (4 * NHID,), jnp.float32, -stdv, stdv),
        ))
    params["lstm"] = lstm
    return params


# ---------------------------------- main ---------------------------------------
if __name__ == "__main__":
    key = jax.random.PRNGKey(0)
    k_param, k_tok = jax.random.split(key)

    params = init_params(k_param)
    prep = prepare_params(params)          # one-time weight re-layout
    tokens = jax.random.randint(k_tok, (SEQ_LEN, BATCH), 0, NTOKEN, jnp.int32)
    hidden = (jnp.zeros((NLAYERS, BATCH, NHID), jnp.float32),
              jnp.zeros((NLAYERS, BATCH, NHID), jnp.float32))

    fwd = jax.jit(mos_rnn_forward)
    log_prob, (hn, cn) = fwd(prep, tokens, hidden)
    jax.block_until_ready((log_prob, hn, cn))

    # Sanity check against a pure-JAX reference.
    ref_log_prob, (ref_hn, ref_cn) = reference_forward(params, tokens, hidden)
    assert log_prob.shape == (SEQ_LEN, BATCH, NTOKEN)
    assert hn.shape == (NLAYERS, BATCH, NHID) and cn.shape == (NLAYERS, BATCH, NHID)
    assert jnp.allclose(log_prob, ref_log_prob, rtol=2e-2, atol=2e-2)
    assert jnp.allclose(hn, ref_hn, rtol=2e-2, atol=2e-2)
    assert jnp.allclose(cn, ref_cn, rtol=2e-2, atol=2e-2)

    print("KERNEL_OK")
</pallas_src>

<mosaic_0001>
module attributes {stable_mosaic.version = 11 : i64} {
  func.func @fused_forward_kernel(%arg0: memref<8x8x32xf32, #tpu.memory_space<vmem>>, %arg1: memref<2x8x32xf32, #tpu.memory_space<vmem>>, %arg2: memref<2x8x32xf32, #tpu.memory_space<vmem>>, %arg3: memref<64x128xf32, #tpu.memory_space<vmem>>, %arg4: memref<1x128xf32, #tpu.memory_space<vmem>>, %arg5: memref<64x128xf32, #tpu.memory_space<vmem>>, %arg6: memref<1x128xf32, #tpu.memory_space<vmem>>, %arg7: memref<32x132xf32, #tpu.memory_space<vmem>>, %arg8: memref<1x132xf32, #tpu.memory_space<vmem>>, %arg9: memref<32x256xf32, #tpu.memory_space<vmem>>, %arg10: memref<1x256xf32, #tpu.memory_space<vmem>>, %arg11: memref<64x256xf32, #tpu.memory_space<vmem>>, %arg12: memref<2x8x32xf32, #tpu.memory_space<vmem>>, %arg13: memref<2x8x32xf32, #tpu.memory_space<vmem>>, %arg14: memref<64x32xf32, #tpu.memory_space<vmem>>) attributes {dimension_semantics = [], scalar_prefetch = 0 : i64, scratch_operands = 1 : i64, tpu.core_type = #tpu.core_type<tc>} {
    %c0 = arith.constant 0 : index
    %c0_0 = arith.constant 0 : index
    %0 = vector.load %arg3[%c0, %c0_0] : memref<64x128xf32, #tpu.memory_space<vmem>>, vector<64x128xf32>
    %c0_1 = arith.constant 0 : index
    %c0_2 = arith.constant 0 : index
    %1 = vector.load %arg5[%c0_1, %c0_2] : memref<64x128xf32, #tpu.memory_space<vmem>>, vector<64x128xf32>
    %c0_3 = arith.constant 0 : index
    %c0_4 = arith.constant 0 : index
    %2 = vector.load %arg4[%c0_3, %c0_4] : memref<1x128xf32, #tpu.memory_space<vmem>>, vector<1x128xf32>
    %c0_5 = arith.constant 0 : index
    %c0_6 = arith.constant 0 : index
    %3 = vector.load %arg6[%c0_5, %c0_6] : memref<1x128xf32, #tpu.memory_space<vmem>>, vector<1x128xf32>
    %c0_7 = arith.constant 0 : index
    %c0_8 = arith.constant 0 : index
    %c0_9 = arith.constant 0 : index
    %4 = vector.load %arg1[%c0_7, %c0_8, %c0_9] : memref<2x8x32xf32, #tpu.memory_space<vmem>>, vector<1x8x32xf32>
    %5 = vector.shape_cast %4 : vector<1x8x32xf32> to vector<8x32xf32>
    %c1 = arith.constant 1 : index
    %c0_10 = arith.constant 0 : index
    %c0_11 = arith.constant 0 : index
    %6 = vector.load %arg1[%c1, %c0_10, %c0_11] : memref<2x8x32xf32, #tpu.memory_space<vmem>>, vector<1x8x32xf32>
    %7 = vector.shape_cast %6 : vector<1x8x32xf32> to vector<8x32xf32>
    %c0_12 = arith.constant 0 : index
    %c0_13 = arith.constant 0 : index
    %c0_14 = arith.constant 0 : index
    %8 = vector.load %arg2[%c0_12, %c0_13, %c0_14] : memref<2x8x32xf32, #tpu.memory_space<vmem>>, vector<1x8x32xf32>
    %9 = vector.shape_cast %8 : vector<1x8x32xf32> to vector<8x32xf32>
    %c1_15 = arith.constant 1 : index
    %c0_16 = arith.constant 0 : index
    %c0_17 = arith.constant 0 : index
    %10 = vector.load %arg2[%c1_15, %c0_16, %c0_17] : memref<2x8x32xf32, #tpu.memory_space<vmem>>, vector<1x8x32xf32>
    %11 = vector.shape_cast %10 : vector<1x8x32xf32> to vector<8x32xf32>
    %c0_18 = arith.constant 0 : index
    %c0_19 = arith.constant 0 : index
    %c0_20 = arith.constant 0 : index
    %12 = vector.load %arg0[%c0_18, %c0_19, %c0_20] : memref<8x8x32xf32, #tpu.memory_space<vmem>>, vector<1x8x32xf32>
    %13 = vector.shape_cast %12 : vector<1x8x32xf32> to vector<8x32xf32>
    %14 = tpu.concatenate %13, %5 in 1 : vector<8x32xf32>, vector<8x32xf32> -> vector<8x64xf32>
    %cst = arith.constant dense<0.000000e+00> : vector<8x128xf32>
    %15 = tpu.matmul %14, %0, %cst {dimension_numbers = #tpu.dot_dimension_numbers<[1], [0], [0], [1], [0, 0, 1, 1], [], []>} : vector<8x64xf32>, vector<64x128xf32>, vector<8x128xf32> -> vector<8x128xf32>
    %16 = vector.broadcast %2 : vector<1x128xf32> to vector<8x128xf32>
    %17 = arith.addf %15, %16 : vector<8x128xf32>
    %18 = vector.extract_strided_slice %17 {offsets = [0, 0], sizes = [8, 32], strides = [1, 1]} : vector<8x128xf32> to vector<8x32xf32>
    %19 = arith.negf %18 : vector<8x32xf32>
    %20 = math.exp %19 : vector<8x32xf32>
    %cst_21 = arith.constant 1.000000e+00 : f32
    %21 = vector.broadcast %cst_21 : f32 to vector<8x32xf32>
    %22 = arith.addf %21, %20 : vector<8x32xf32>
    %23 = arith.divf %21, %22 : vector<8x32xf32>
    %24 = vector.extract_strided_slice %17 {offsets = [0, 32], sizes = [8, 32], strides = [1, 1]} : vector<8x128xf32> to vector<8x32xf32>
    %25 = arith.negf %24 : vector<8x32xf32>
    %26 = math.exp %25 : vector<8x32xf32>
    %cst_22 = arith.constant 1.000000e+00 : f32
    %27 = vector.broadcast %cst_22 : f32 to vector<8x32xf32>
    %28 = arith.addf %27, %26 : vector<8x32xf32>
    %29 = arith.divf %27, %28 : vector<8x32xf32>
    %30 = vector.extract_strided_slice %17 {offsets = [0, 64], sizes = [8, 32], strides = [1, 1]} : vector<8x128xf32> to vector<8x32xf32>
    %31 = math.tanh %30 : vector<8x32xf32>
    %32 = vector.extract_strided_slice %17 {offsets = [0, 96], sizes = [8, 32], strides = [1, 1]} : vector<8x128xf32> to vector<8x32xf32>
    %33 = arith.negf %32 : vector<8x32xf32>
    %34 = math.exp %33 : vector<8x32xf32>
    %cst_23 = arith.constant 1.000000e+00 : f32
    %35 = vector.broadcast %cst_23 : f32 to vector<8x32xf32>
    %36 = arith.addf %35, %34 : vector<8x32xf32>
    %37 = arith.divf %35, %36 : vector<8x32xf32>
    %38 = arith.mulf %29, %9 : vector<8x32xf32>
    %39 = arith.mulf %23, %31 : vector<8x32xf32>
    %40 = arith.addf %38, %39 : vector<8x32xf32>
    %41 = math.tanh %40 : vector<8x32xf32>
    %42 = arith.mulf %37, %41 : vector<8x32xf32>
    %43 = tpu.concatenate %42, %7 in 1 : vector<8x32xf32>, vector<8x32xf32> -> vector<8x64xf32>
    %cst_24 = arith.constant dense<0.000000e+00> : vector<8x128xf32>
    %44 = tpu.matmul %43, %1, %cst_24 {dimension_numbers = #tpu.dot_dimension_numbers<[1], [0], [0], [1], [0, 0, 1, 1], [], []>} : vector<8x64xf32>, vector<64x128xf32>, vector<8x128xf32> -> vector<8x128xf32>
    %45 = vector.broadcast %3 : vector<1x128xf32> to vector<8x128xf32>
    %46 = arith.addf %44, %45 : vector<8x128xf32>
    %47 = vector.extract_strided_slice %46 {offsets = [0, 0], sizes = [8, 32], strides = [1, 1]} : vector<8x128xf32> to vector<8x32xf32>
    %48 = arith.negf %47 : vector<8x32xf32>
    %49 = math.exp %48 : vector<8x32xf32>
    %cst_25 = arith.constant 1.000000e+00 : f32
    %50 = vector.broadcast %cst_25 : f32 to vector<8x32xf32>
    %51 = arith.addf %50, %49 : vector<8x32xf32>
    %52 = arith.divf %50, %51 : vector<8x32xf32>
    %53 = vector.extract_strided_slice %46 {offsets = [0, 32], sizes = [8, 32], strides = [1, 1]} : vector<8x128xf32> to vector<8x32xf32>
    %54 = arith.negf %53 : vector<8x32xf32>
    %55 = math.exp %54 : vector<8x32xf32>
    %cst_26 = arith.constant 1.000000e+00 : f32
    %56 = vector.broadcast %cst_26 : f32 to vector<8x32xf32>
    %57 = arith.addf %56, %55 : vector<8x32xf32>
    %58 = arith.divf %56, %57 : vector<8x32xf32>
    %59 = vector.extract_strided_slice %46 {offsets = [0, 64], sizes = [8, 32], strides = [1, 1]} : vector<8x128xf32> to vector<8x32xf32>
    %60 = math.tanh %59 : vector<8x32xf32>
    %61 = vector.extract_strided_slice %46 {offsets = [0, 96], sizes = [8, 32], strides = [1, 1]} : vector<8x128xf32> to vector<8x32xf32>
    %62 = arith.negf %61 : vector<8x32xf32>
    %63 = math.exp %62 : vector<8x32xf32>
    %cst_27 = arith.constant 1.000000e+00 : f32
    %64 = vector.broadcast %cst_27 : f32 to vector<8x32xf32>
    %65 = arith.addf %64, %63 : vector<8x32xf32>
    %66 = arith.divf %64, %65 : vector<8x32xf32>
    %67 = arith.mulf %58, %11 : vector<8x32xf32>
    %68 = arith.mulf %52, %60 : vector<8x32xf32>
    %69 = arith.addf %67, %68 : vector<8x32xf32>
    %70 = math.tanh %69 : vector<8x32xf32>
    %71 = arith.mulf %66, %70 : vector<8x32xf32>
    %c0_28 = arith.constant 0 : index
    %c0_29 = arith.constant 0 : index
    %72 = vector.load %arg14[%c0_28, %c0_29] : memref<64x32xf32, #tpu.memory_space<vmem>>, vector<8x32xf32>
    tpu.vector_store %arg14[%c0_28, %c0_29], %71 {strides = array<i32>} : memref<64x32xf32, #tpu.memory_space<vmem>>, vector<8x32xf32>,
    %c1_30 = arith.constant 1 : index
    %c0_31 = arith.constant 0 : index
    %c0_32 = arith.constant 0 : index
    %73 = vector.load %arg0[%c1_30, %c0_31, %c0_32] : memref<8x8x32xf32, #tpu.memory_space<vmem>>, vector<1x8x32xf32>
    %74 = vector.shape_cast %73 : vector<1x8x32xf32> to vector<8x32xf32>
    %75 = tpu.concatenate %74, %42 in 1 : vector<8x32xf32>, vector<8x32xf32> -> vector<8x64xf32>
    %cst_33 = arith.constant dense<0.000000e+00> : vector<8x128xf32>
    %76 = tpu.matmul %75, %0, %cst_33 {dimension_numbers = #tpu.dot_dimension_numbers<[1], [0], [0], [1], [0, 0, 1, 1], [], []>} : vector<8x64xf32>, vector<64x128xf32>, vector<8x128xf32> -> vector<8x128xf32>
    %77 = vector.broadcast %2 : vector<1x128xf32> to vector<8x128xf32>
    %78 = arith.addf %76, %77 : vector<8x128xf32>
    %79 = vector.extract_strided_slice %78 {offsets = [0, 0], sizes = [8, 32], strides = [1, 1]} : vector<8x128xf32> to vector<8x32xf32>
    %80 = arith.negf %79 : vector<8x32xf32>
    %81 = math.exp %80 : vector<8x32xf32>
    %cst_34 = arith.constant 1.000000e+00 : f32
    %82 = vector.broadcast %cst_34 : f32 to vector<8x32xf32>
    %83 = arith.addf %82, %81 : vector<8x32xf32>
    %84 = arith.divf %82, %83 : vector<8x32xf32>
    %85 = vector.extract_strided_slice %78 {offsets = [0, 32], sizes = [8, 32], strides = [1, 1]} : vector<8x128xf32> to vector<8x32xf32>
    %86 = arith.negf %85 : vector<8x32xf32>
    %87 = math.exp %86 : vector<8x32xf32>
    %cst_35 = arith.constant 1.000000e+00 : f32
    %88 = vector.broadcast %cst_35 : f32 to vector<8x32xf32>
    %89 = arith.addf %88, %87 : vector<8x32xf32>
    %90 = arith.divf %88, %89 : vector<8x32xf32>
    %91 = vector.extract_strided_slice %78 {offsets = [0, 64], sizes = [8, 32], strides = [1, 1]} : vector<8x128xf32> to vector<8x32xf32>
    %92 = math.tanh %91 : vector<8x32xf32>
    %93 = vector.extract_strided_slice %78 {offsets = [0, 96], sizes = [8, 32], strides = [1, 1]} : vector<8x128xf32> to vector<8x32xf32>
    %94 = arith.negf %93 : vector<8x32xf32>
    %95 = math.exp %94 : vector<8x32xf32>
    %cst_36 = arith.constant 1.000000e+00 : f32
    %96 = vector.broadcast %cst_36 : f32 to vector<8x32xf32>
    %97 = arith.addf %96, %95 : vector<8x32xf32>
    %98 = arith.divf %96, %97 : vector<8x32xf32>
    %99 = arith.mulf %90, %40 : vector<8x32xf32>
    %100 = arith.mulf %84, %92 : vector<8x32xf32>
    %101 = arith.addf %99, %100 : vector<8x32xf32>
    %102 = math.tanh %101 : vector<8x32xf32>
    %103 = arith.mulf %98, %102 : vector<8x32xf32>
    %104 = tpu.concatenate %103, %71 in 1 : vector<8x32xf32>, vector<8x32xf32> -> vector<8x64xf32>
    %cst_37 = arith.constant dense<0.000000e+00> : vector<8x128xf32>
    %105 = tpu.matmul %104, %1, %cst_37 {dimension_numbers = #tpu.dot_dimension_numbers<[1], [0], [0], [1], [0, 0, 1, 1], [], []>} : vector<8x64xf32>, vector<64x128xf32>, vector<8x128xf32> -> vector<8x128xf32>
    %106 = vector.broadcast %3 : vector<1x128xf32> to vector<8x128xf32>
    %107 = arith.addf %105, %106 : vector<8x128xf32>
    %108 = vector.extract_strided_slice %107 {offsets = [0, 0], sizes = [8, 32], strides = [1, 1]} : vector<8x128xf32> to vector<8x32xf32>
    %109 = arith.negf %108 : vector<8x32xf32>
    %110 = math.exp %109 : vector<8x32xf32>
    %cst_38 = arith.constant 1.000000e+00 : f32
    %111 = vector.broadcast %cst_38 : f32 to vector<8x32xf32>
    %112 = arith.addf %111, %110 : vector<8x32xf32>
    %113 = arith.divf %111, %112 : vector<8x32xf32>
    %114 = vector.extract_strided_slice %107 {offsets = [0, 32], sizes = [8, 32], strides = [1, 1]} : vector<8x128xf32> to vector<8x32xf32>
    %115 = arith.negf %114 : vector<8x32xf32>
    %116 = math.exp %115 : vector<8x32xf32>
    %cst_39 = arith.constant 1.000000e+00 : f32
    %117 = vector.broadcast %cst_39 : f32 to vector<8x32xf32>
    %118 = arith.addf %117, %116 : vector<8x32xf32>
    %119 = arith.divf %117, %118 : vector<8x32xf32>
    %120 = vector.extract_strided_slice %107 {offsets = [0, 64], sizes = [8, 32], strides = [1, 1]} : vector<8x128xf32> to vector<8x32xf32>
    %121 = math.tanh %120 : vector<8x32xf32>
    %122 = vector.extract_strided_slice %107 {offsets = [0, 96], sizes = [8, 32], strides = [1, 1]} : vector<8x128xf32> to vector<8x32xf32>
    %123 = arith.negf %122 : vector<8x32xf32>
    %124 = math.exp %123 : vector<8x32xf32>
    %cst_40 = arith.constant 1.000000e+00 : f32
    %125 = vector.broadcast %cst_40 : f32 to vector<8x32xf32>
    %126 = arith.addf %125, %124 : vector<8x32xf32>
    %127 = arith.divf %125, %126 : vector<8x32xf32>
    %128 = arith.mulf %119, %69 : vector<8x32xf32>
    %129 = arith.mulf %113, %121 : vector<8x32xf32>
    %130 = arith.addf %128, %129 : vector<8x32xf32>
    %131 = math.tanh %130 : vector<8x32xf32>
    %132 = arith.mulf %127, %131 : vector<8x32xf32>
    %c8 = arith.constant 8 : index
    %c0_41 = arith.constant 0 : index
    %133 = vector.load %arg14[%c8, %c0_41] : memref<64x32xf32, #tpu.memory_space<vmem>>, vector<8x32xf32>
    tpu.vector_store %arg14[%c8, %c0_41], %132 {strides = array<i32>} : memref<64x32xf32, #tpu.memory_space<vmem>>, vector<8x32xf32>,
    %c2 = arith.constant 2 : index
    %c0_42 = arith.constant 0 : index
    %c0_43 = arith.constant 0 : index
    %134 = vector.load %arg0[%c2, %c0_42, %c0_43] : memref<8x8x32xf32, #tpu.memory_space<vmem>>, vector<1x8x32xf32>
    %135 = vector.shape_cast %134 : vector<1x8x32xf32> to vector<8x32xf32>
    %136 = tpu.concatenate %135, %103 in 1 : vector<8x32xf32>, vector<8x32xf32> -> vector<8x64xf32>
    %cst_44 = arith.constant dense<0.000000e+00> : vector<8x128xf32>
    %137 = tpu.matmul %136, %0, %cst_44 {dimension_numbers = #tpu.dot_dimension_numbers<[1], [0], [0], [1], [0, 0, 1, 1], [], []>} : vector<8x64xf32>, vector<64x128xf32>, vector<8x128xf32> -> vector<8x128xf32>
    %138 = vector.broadcast %2 : vector<1x128xf32> to vector<8x128xf32>
    %139 = arith.addf %137, %138 : vector<8x128xf32>
    %140 = vector.extract_strided_slice %139 {offsets = [0, 0], sizes = [8, 32], strides = [1, 1]} : vector<8x128xf32> to vector<8x32xf32>
    %141 = arith.negf %140 : vector<8x32xf32>
    %142 = math.exp %141 : vector<8x32xf32>
    %cst_45 = arith.constant 1.000000e+00 : f32
    %143 = vector.broadcast %cst_45 : f32 to vector<8x32xf32>
    %144 = arith.addf %143, %142 : vector<8x32xf32>
    %145 = arith.divf %143, %144 : vector<8x32xf32>
    %146 = vector.extract_strided_slice %139 {offsets = [0, 32], sizes = [8, 32], strides = [1, 1]} : vector<8x128xf32> to vector<8x32xf32>
    %147 = arith.negf %146 : vector<8x32xf32>
    %148 = math.exp %147 : vector<8x32xf32>
    %cst_46 = arith.constant 1.000000e+00 : f32
    %149 = vector.broadcast %cst_46 : f32 to vector<8x32xf32>
    %150 = arith.addf %149, %148 : vector<8x32xf32>
    %151 = arith.divf %149, %150 : vector<8x32xf32>
    %152 = vector.extract_strided_slice %139 {offsets = [0, 64], sizes = [8, 32], strides = [1, 1]} : vector<8x128xf32> to vector<8x32xf32>
    %153 = math.tanh %152 : vector<8x32xf32>
    %154 = vector.extract_strided_slice %139 {offsets = [0, 96], sizes = [8, 32], strides = [1, 1]} : vector<8x128xf32> to vector<8x32xf32>
    %155 = arith.negf %154 : vector<8x32xf32>
    %156 = math.exp %155 : vector<8x32xf32>
    %cst_47 = arith.constant 1.000000e+00 : f32
    %157 = vector.broadcast %cst_47 : f32 to vector<8x32xf32>
    %158 = arith.addf %157, %156 : vector<8x32xf32>
    %159 = arith.divf %157, %158 : vector<8x32xf32>
    %160 = arith.mulf %151, %101 : vector<8x32xf32>
    %161 = arith.mulf %145, %153 : vector<8x32xf32>
    %162 = arith.addf %160, %161 : vector<8x32xf32>
    %163 = math.tanh %162 : vector<8x32xf32>
    %164 = arith.mulf %159, %163 : vector<8x32xf32>
    %165 = tpu.concatenate %164, %132 in 1 : vector<8x32xf32>, vector<8x32xf32> -> vector<8x64xf32>
    %cst_48 = arith.constant dense<0.000000e+00> : vector<8x128xf32>
    %166 = tpu.matmul %165, %1, %cst_48 {dimension_numbers = #tpu.dot_dimension_numbers<[1], [0], [0], [1], [0, 0, 1, 1], [], []>} : vector<8x64xf32>, vector<64x128xf32>, vector<8x128xf32> -> vector<8x128xf32>
    %167 = vector.broadcast %3 : vector<1x128xf32> to vector<8x128xf32>
    %168 = arith.addf %166, %167 : vector<8x128xf32>
    %169 = vector.extract_strided_slice %168 {offsets = [0, 0], sizes = [8, 32], strides = [1, 1]} : vector<8x128xf32> to vector<8x32xf32>
    %170 = arith.negf %169 : vector<8x32xf32>
    %171 = math.exp %170 : vector<8x32xf32>
    %cst_49 = arith.constant 1.000000e+00 : f32
    %172 = vector.broadcast %cst_49 : f32 to vector<8x32xf32>
    %173 = arith.addf %172, %171 : vector<8x32xf32>
    %174 = arith.divf %172, %173 : vector<8x32xf32>
    %175 = vector.extract_strided_slice %168 {offsets = [0, 32], sizes = [8, 32], strides = [1, 1]} : vector<8x128xf32> to vector<8x32xf32>
    %176 = arith.negf %175 : vector<8x32xf32>
    %177 = math.exp %176 : vector<8x32xf32>
    %cst_50 = arith.constant 1.000000e+00 : f32
    %178 = vector.broadcast %cst_50 : f32 to vector<8x32xf32>
    %179 = arith.addf %178, %177 : vector<8x32xf32>
    %180 = arith.divf %178, %179 : vector<8x32xf32>
    %181 = vector.extract_strided_slice %168 {offsets = [0, 64], sizes = [8, 32], strides = [1, 1]} : vector<8x128xf32> to vector<8x32xf32>
    %182 = math.tanh %181 : vector<8x32xf32>
    %183 = vector.extract_strided_slice %168 {offsets = [0, 96], sizes = [8, 32], strides = [1, 1]} : vector<8x128xf32> to vector<8x32xf32>
    %184 = arith.negf %183 : vector<8x32xf32>
    %185 = math.exp %184 : vector<8x32xf32>
    %cst_51 = arith.constant 1.000000e+00 : f32
    %186 = vector.broadcast %cst_51 : f32 to vector<8x32xf32>
    %187 = arith.addf %186, %185 : vector<8x32xf32>
    %188 = arith.divf %186, %187 : vector<8x32xf32>
    %189 = arith.mulf %180, %130 : vector<8x32xf32>
    %190 = arith.mulf %174, %182 : vector<8x32xf32>
    %191 = arith.addf %189, %190 : vector<8x32xf32>
    %192 = math.tanh %191 : vector<8x32xf32>
    %193 = arith.mulf %188, %192 : vector<8x32xf32>
    %c16 = arith.constant 16 : index
    %c0_52 = arith.constant 0 : index
    %194 = vector.load %arg14[%c16, %c0_52] : memref<64x32xf32, #tpu.memory_space<vmem>>, vector<8x32xf32>
    tpu.vector_store %arg14[%c16, %c0_52], %193 {strides = array<i32>} : memref<64x32xf32, #tpu.memory_space<vmem>>, vector<8x32xf32>,
    %c3 = arith.constant 3 : index
    %c0_53 = arith.constant 0 : index
    %c0_54 = arith.constant 0 : index
    %195 = vector.load %arg0[%c3, %c0_53, %c0_54] : memref<8x8x32xf32, #tpu.memory_space<vmem>>, vector<1x8x32xf32>
    %196 = vector.shape_cast %195 : vector<1x8x32xf32> to vector<8x32xf32>
    %197 = tpu.concatenate %196, %164 in 1 : vector<8x32xf32>, vector<8x32xf32> -> vector<8x64xf32>
    %cst_55 = arith.constant dense<0.000000e+00> : vector<8x128xf32>
    %198 = tpu.matmul %197, %0, %cst_55 {dimension_numbers = #tpu.dot_dimension_numbers<[1], [0], [0], [1], [0, 0, 1, 1], [], []>} : vector<8x64xf32>, vector<64x128xf32>, vector<8x128xf32> -> vector<8x128xf32>
    %199 = vector.broadcast %2 : vector<1x128xf32> to vector<8x128xf32>
    %200 = arith.addf %198, %199 : vector<8x128xf32>
    %201 = vector.extract_strided_slice %200 {offsets = [0, 0], sizes = [8, 32], strides = [1, 1]} : vector<8x128xf32> to vector<8x32xf32>
    %202 = arith.negf %201 : vector<8x32xf32>
    %203 = math.exp %202 : vector<8x32xf32>
    %cst_56 = arith.constant 1.000000e+00 : f32
    %204 = vector.broadcast %cst_56 : f32 to vector<8x32xf32>
    %205 = arith.addf %204, %203 : vector<8x32xf32>
    %206 = arith.divf %204, %205 : vector<8x32xf32>
    %207 = vector.extract_strided_slice %200 {offsets = [0, 32], sizes = [8, 32], strides = [1, 1]} : vector<8x128xf32> to vector<8x32xf32>
    %208 = arith.negf %207 : vector<8x32xf32>
    %209 = math.exp %208 : vector<8x32xf32>
    %cst_57 = arith.constant 1.000000e+00 : f32
    %210 = vector.broadcast %cst_57 : f32 to vector<8x32xf32>
    %211 = arith.addf %210, %209 : vector<8x32xf32>
    %212 = arith.divf %210, %211 : vector<8x32xf32>
    %213 = vector.extract_strided_slice %200 {offsets = [0, 64], sizes = [8, 32], strides = [1, 1]} : vector<8x128xf32> to vector<8x32xf32>
    %214 = math.tanh %213 : vector<8x32xf32>
    %215 = vector.extract_strided_slice %200 {offsets = [0, 96], sizes = [8, 32], strides = [1, 1]} : vector<8x128xf32> to vector<8x32xf32>
    %216 = arith.negf %215 : vector<8x32xf32>
    %217 = math.exp %216 : vector<8x32xf32>
    %cst_58 = arith.constant 1.000000e+00 : f32
    %218 = vector.broadcast %cst_58 : f32 to vector<8x32xf32>
    %219 = arith.addf %218, %217 : vector<8x32xf32>
    %220 = arith.divf %218, %219 : vector<8x32xf32>
    %221 = arith.mulf %212, %162 : vector<8x32xf32>
    %222 = arith.mulf %206, %214 : vector<8x32xf32>
    %223 = arith.addf %221, %222 : vector<8x32xf32>
    %224 = math.tanh %223 : vector<8x32xf32>
    %225 = arith.mulf %220, %224 : vector<8x32xf32>
    %226 = tpu.concatenate %225, %193 in 1 : vector<8x32xf32>, vector<8x32xf32> -> vector<8x64xf32>
    %cst_59 = arith.constant dense<0.000000e+00> : vector<8x128xf32>
    %227 = tpu.matmul %226, %1, %cst_59 {dimension_numbers = #tpu.dot_dimension_numbers<[1], [0], [0], [1], [0, 0, 1, 1], [], []>} : vector<8x64xf32>, vector<64x128xf32>, vector<8x128xf32> -> vector<8x128xf32>
    %228 = vector.broadcast %3 : vector<1x128xf32> to vector<8x128xf32>
    %229 = arith.addf %227, %228 : vector<8x128xf32>
    %230 = vector.extract_strided_slice %229 {offsets = [0, 0], sizes = [8, 32], strides = [1, 1]} : vector<8x128xf32> to vector<8x32xf32>
    %231 = arith.negf %230 : vector<8x32xf32>
    %232 = math.exp %231 : vector<8x32xf32>
    %cst_60 = arith.constant 1.000000e+00 : f32
    %233 = vector.broadcast %cst_60 : f32 to vector<8x32xf32>
    %234 = arith.addf %233, %232 : vector<8x32xf32>
    %235 = arith.divf %233, %234 : vector<8x32xf32>
    %236 = vector.extract_strided_slice %229 {offsets = [0, 32], sizes = [8, 32], strides = [1, 1]} : vector<8x128xf32> to vector<8x32xf32>
    %237 = arith.negf %236 : vector<8x32xf32>
    %238 = math.exp %237 : vector<8x32xf32>
    %cst_61 = arith.constant 1.000000e+00 : f32
    %239 = vector.broadcast %cst_61 : f32 to vector<8x32xf32>
    %240 = arith.addf %239, %238 : vector<8x32xf32>
    %241 = arith.divf %239, %240 : vector<8x32xf32>
    %242 = vector.extract_strided_slice %229 {offsets = [0, 64], sizes = [8, 32], strides = [1, 1]} : vector<8x128xf32> to vector<8x32xf32>
    %243 = math.tanh %242 : vector<8x32xf32>
    %244 = vector.extract_strided_slice %229 {offsets = [0, 96], sizes = [8, 32], strides = [1, 1]} : vector<8x128xf32> to vector<8x32xf32>
    %245 = arith.negf %244 : vector<8x32xf32>
    %246 = math.exp %245 : vector<8x32xf32>
    %cst_62 = arith.constant 1.000000e+00 : f32
    %247 = vector.broadcast %cst_62 : f32 to vector<8x32xf32>
    %248 = arith.addf %247, %246 : vector<8x32xf32>
    %249 = arith.divf %247, %248 : vector<8x32xf32>
    %250 = arith.mulf %241, %191 : vector<8x32xf32>
    %251 = arith.mulf %235, %243 : vector<8x32xf32>
    %252 = arith.addf %250, %251 : vector<8x32xf32>
    %253 = math.tanh %252 : vector<8x32xf32>
    %254 = arith.mulf %249, %253 : vector<8x32xf32>
    %c24 = arith.constant 24 : index
    %c0_63 = arith.constant 0 : index
    %255 = vector.load %arg14[%c24, %c0_63] : memref<64x32xf32, #tpu.memory_space<vmem>>, vector<8x32xf32>
    tpu.vector_store %arg14[%c24, %c0_63], %254 {strides = array<i32>} : memref<64x32xf32, #tpu.memory_space<vmem>>, vector<8x32xf32>,
    %c4 = arith.constant 4 : index
    %c0_64 = arith.constant 0 : index
    %c0_65 = arith.constant 0 : index
    %256 = vector.load %arg0[%c4, %c0_64, %c0_65] : memref<8x8x32xf32, #tpu.memory_space<vmem>>, vector<1x8x32xf32>
    %257 = vector.shape_cast %256 : vector<1x8x32xf32> to vector<8x32xf32>
    %258 = tpu.concatenate %257, %225 in 1 : vector<8x32xf32>, vector<8x32xf32> -> vector<8x64xf32>
    %cst_66 = arith.constant dense<0.000000e+00> : vector<8x128xf32>
    %259 = tpu.matmul %258, %0, %cst_66 {dimension_numbers = #tpu.dot_dimension_numbers<[1], [0], [0], [1], [0, 0, 1, 1], [], []>} : vector<8x64xf32>, vector<64x128xf32>, vector<8x128xf32> -> vector<8x128xf32>
    %260 = vector.broadcast %2 : vector<1x128xf32> to vector<8x128xf32>
    %261 = arith.addf %259, %260 : vector<8x128xf32>
    %262 = vector.extract_strided_slice %261 {offsets = [0, 0], sizes = [8, 32], strides = [1, 1]} : vector<8x128xf32> to vector<8x32xf32>
    %263 = arith.negf %262 : vector<8x32xf32>
    %264 = math.exp %263 : vector<8x32xf32>
    %cst_67 = arith.constant 1.000000e+00 : f32
    %265 = vector.broadcast %cst_67 : f32 to vector<8x32xf32>
    %266 = arith.addf %265, %264 : vector<8x32xf32>
    %267 = arith.divf %265, %266 : vector<8x32xf32>
    %268 = vector.extract_strided_slice %261 {offsets = [0, 32], sizes = [8, 32], strides = [1, 1]} : vector<8x128xf32> to vector<8x32xf32>
    %269 = arith.negf %268 : vector<8x32xf32>
    %270 = math.exp %269 : vector<8x32xf32>
    %cst_68 = arith.constant 1.000000e+00 : f32
    %271 = vector.broadcast %cst_68 : f32 to vector<8x32xf32>
    %272 = arith.addf %271, %270 : vector<8x32xf32>
    %273 = arith.divf %271, %272 : vector<8x32xf32>
    %274 = vector.extract_strided_slice %261 {offsets = [0, 64], sizes = [8, 32], strides = [1, 1]} : vector<8x128xf32> to vector<8x32xf32>
    %275 = math.tanh %274 : vector<8x32xf32>
    %276 = vector.extract_strided_slice %261 {offsets = [0, 96], sizes = [8, 32], strides = [1, 1]} : vector<8x128xf32> to vector<8x32xf32>
    %277 = arith.negf %276 : vector<8x32xf32>
    %278 = math.exp %277 : vector<8x32xf32>
    %cst_69 = arith.constant 1.000000e+00 : f32
    %279 = vector.broadcast %cst_69 : f32 to vector<8x32xf32>
    %280 = arith.addf %279, %278 : vector<8x32xf32>
    %281 = arith.divf %279, %280 : vector<8x32xf32>
    %282 = arith.mulf %273, %223 : vector<8x32xf32>
    %283 = arith.mulf %267, %275 : vector<8x32xf32>
    %284 = arith.addf %282, %283 : vector<8x32xf32>
    %285 = math.tanh %284 : vector<8x32xf32>
    %286 = arith.mulf %281, %285 : vector<8x32xf32>
    %287 = tpu.concatenate %286, %254 in 1 : vector<8x32xf32>, vector<8x32xf32> -> vector<8x64xf32>
    %cst_70 = arith.constant dense<0.000000e+00> : vector<8x128xf32>
    %288 = tpu.matmul %287, %1, %cst_70 {dimension_numbers = #tpu.dot_dimension_numbers<[1], [0], [0], [1], [0, 0, 1, 1], [], []>} : vector<8x64xf32>, vector<64x128xf32>, vector<8x128xf32> -> vector<8x128xf32>
    %289 = vector.broadcast %3 : vector<1x128xf32> to vector<8x128xf32>
    %290 = arith.addf %288, %289 : vector<8x128xf32>
    %291 = vector.extract_strided_slice %290 {offsets = [0, 0], sizes = [8, 32], strides = [1, 1]} : vector<8x128xf32> to vector<8x32xf32>
    %292 = arith.negf %291 : vector<8x32xf32>
    %293 = math.exp %292 : vector<8x32xf32>
    %cst_71 = arith.constant 1.000000e+00 : f32
    %294 = vector.broadcast %cst_71 : f32 to vector<8x32xf32>
    %295 = arith.addf %294, %293 : vector<8x32xf32>
    %296 = arith.divf %294, %295 : vector<8x32xf32>
    %297 = vector.extract_strided_slice %290 {offsets = [0, 32], sizes = [8, 32], strides = [1, 1]} : vector<8x128xf32> to vector<8x32xf32>
    %298 = arith.negf %297 : vector<8x32xf32>
    %299 = math.exp %298 : vector<8x32xf32>
    %cst_72 = arith.constant 1.000000e+00 : f32
    %300 = vector.broadcast %cst_72 : f32 to vector<8x32xf32>
    %301 = arith.addf %300, %299 : vector<8x32xf32>
    %302 = arith.divf %300, %301 : vector<8x32xf32>
    %303 = vector.extract_strided_slice %290 {offsets = [0, 64], sizes = [8, 32], strides = [1, 1]} : vector<8x128xf32> to vector<8x32xf32>
    %304 = math.tanh %303 : vector<8x32xf32>
    %305 = vector.extract_strided_slice %290 {offsets = [0, 96], sizes = [8, 32], strides = [1, 1]} : vector<8x128xf32> to vector<8x32xf32>
    %306 = arith.negf %305 : vector<8x32xf32>
    %307 = math.exp %306 : vector<8x32xf32>
    %cst_73 = arith.constant 1.000000e+00 : f32
    %308 = vector.broadcast %cst_73 : f32 to vector<8x32xf32>
    %309 = arith.addf %308, %307 : vector<8x32xf32>
    %310 = arith.divf %308, %309 : vector<8x32xf32>
    %311 = arith.mulf %302, %252 : vector<8x32xf32>
    %312 = arith.mulf %296, %304 : vector<8x32xf32>
    %313 = arith.addf %311, %312 : vector<8x32xf32>
    %314 = math.tanh %313 : vector<8x32xf32>
    %315 = arith.mulf %310, %314 : vector<8x32xf32>
    %c32 = arith.constant 32 : index
    %c0_74 = arith.constant 0 : index
    %316 = vector.load %arg14[%c32, %c0_74] : memref<64x32xf32, #tpu.memory_space<vmem>>, vector<8x32xf32>
    tpu.vector_store %arg14[%c32, %c0_74], %315 {strides = array<i32>} : memref<64x32xf32, #tpu.memory_space<vmem>>, vector<8x32xf32>,
    %c5 = arith.constant 5 : index
    %c0_75 = arith.constant 0 : index
    %c0_76 = arith.constant 0 : index
    %317 = vector.load %arg0[%c5, %c0_75, %c0_76] : memref<8x8x32xf32, #tpu.memory_space<vmem>>, vector<1x8x32xf32>
    %318 = vector.shape_cast %317 : vector<1x8x32xf32> to vector<8x32xf32>
    %319 = tpu.concatenate %318, %286 in 1 : vector<8x32xf32>, vector<8x32xf32> -> vector<8x64xf32>
    %cst_77 = arith.constant dense<0.000000e+00> : vector<8x128xf32>
    %320 = tpu.matmul %319, %0, %cst_77 {dimension_numbers = #tpu.dot_dimension_numbers<[1], [0], [0], [1], [0, 0, 1, 1], [], []>} : vector<8x64xf32>, vector<64x128xf32>, vector<8x128xf32> -> vector<8x128xf32>
    %321 = vector.broadcast %2 : vector<1x128xf32> to vector<8x128xf32>
    %322 = arith.addf %320, %321 : vector<8x128xf32>
    %323 = vector.extract_strided_slice %322 {offsets = [0, 0], sizes = [8, 32], strides = [1, 1]} : vector<8x128xf32> to vector<8x32xf32>
    %324 = arith.negf %323 : vector<8x32xf32>
    %325 = math.exp %324 : vector<8x32xf32>
    %cst_78 = arith.constant 1.000000e+00 : f32
    %326 = vector.broadcast %cst_78 : f32 to vector<8x32xf32>
    %327 = arith.addf %326, %325 : vector<8x32xf32>
    %328 = arith.divf %326, %327 : vector<8x32xf32>
    %329 = vector.extract_strided_slice %322 {offsets = [0, 32], sizes = [8, 32], strides = [1, 1]} : vector<8x128xf32> to vector<8x32xf32>
    %330 = arith.negf %329 : vector<8x32xf32>
    %331 = math.exp %330 : vector<8x32xf32>
    %cst_79 = arith.constant 1.000000e+00 : f32
    %332 = vector.broadcast %cst_79 : f32 to vector<8x32xf32>
    %333 = arith.addf %332, %331 : vector<8x32xf32>
    %334 = arith.divf %332, %333 : vector<8x32xf32>
    %335 = vector.extract_strided_slice %322 {offsets = [0, 64], sizes = [8, 32], strides = [1, 1]} : vector<8x128xf32> to vector<8x32xf32>
    %336 = math.tanh %335 : vector<8x32xf32>
    %337 = vector.extract_strided_slice %322 {offsets = [0, 96], sizes = [8, 32], strides = [1, 1]} : vector<8x128xf32> to vector<8x32xf32>
    %338 = arith.negf %337 : vector<8x32xf32>
    %339 = math.exp %338 : vector<8x32xf32>
    %cst_80 = arith.constant 1.000000e+00 : f32
    %340 = vector.broadcast %cst_80 : f32 to vector<8x32xf32>
    %341 = arith.addf %340, %339 : vector<8x32xf32>
    %342 = arith.divf %340, %341 : vector<8x32xf32>
    %343 = arith.mulf %334, %284 : vector<8x32xf32>
    %344 = arith.mulf %328, %336 : vector<8x32xf32>
    %345 = arith.addf %343, %344 : vector<8x32xf32>
    %346 = math.tanh %345 : vector<8x32xf32>
    %347 = arith.mulf %342, %346 : vector<8x32xf32>
    %348 = tpu.concatenate %347, %315 in 1 : vector<8x32xf32>, vector<8x32xf32> -> vector<8x64xf32>
    %cst_81 = arith.constant dense<0.000000e+00> : vector<8x128xf32>
    %349 = tpu.matmul %348, %1, %cst_81 {dimension_numbers = #tpu.dot_dimension_numbers<[1], [0], [0], [1], [0, 0, 1, 1], [], []>} : vector<8x64xf32>, vector<64x128xf32>, vector<8x128xf32> -> vector<8x128xf32>
    %350 = vector.broadcast %3 : vector<1x128xf32> to vector<8x128xf32>
    %351 = arith.addf %349, %350 : vector<8x128xf32>
    %352 = vector.extract_strided_slice %351 {offsets = [0, 0], sizes = [8, 32], strides = [1, 1]} : vector<8x128xf32> to vector<8x32xf32>
    %353 = arith.negf %352 : vector<8x32xf32>
    %354 = math.exp %353 : vector<8x32xf32>
    %cst_82 = arith.constant 1.000000e+00 : f32
    %355 = vector.broadcast %cst_82 : f32 to vector<8x32xf32>
    %356 = arith.addf %355, %354 : vector<8x32xf32>
    %357 = arith.divf %355, %356 : vector<8x32xf32>
    %358 = vector.extract_strided_slice %351 {offsets = [0, 32], sizes = [8, 32], strides = [1, 1]} : vector<8x128xf32> to vector<8x32xf32>
    %359 = arith.negf %358 : vector<8x32xf32>
    %360 = math.exp %359 : vector<8x32xf32>
    %cst_83 = arith.constant 1.000000e+00 : f32
    %361 = vector.broadcast %cst_83 : f32 to vector<8x32xf32>
    %362 = arith.addf %361, %360 : vector<8x32xf32>
    %363 = arith.divf %361, %362 : vector<8x32xf32>
    %364 = vector.extract_strided_slice %351 {offsets = [0, 64], sizes = [8, 32], strides = [1, 1]} : vector<8x128xf32> to vector<8x32xf32>
    %365 = math.tanh %364 : vector<8x32xf32>
    %366 = vector.extract_strided_slice %351 {offsets = [0, 96], sizes = [8, 32], strides = [1, 1]} : vector<8x128xf32> to vector<8x32xf32>
    %367 = arith.negf %366 : vector<8x32xf32>
    %368 = math.exp %367 : vector<8x32xf32>
    %cst_84 = arith.constant 1.000000e+00 : f32
    %369 = vector.broadcast %cst_84 : f32 to vector<8x32xf32>
    %370 = arith.addf %369, %368 : vector<8x32xf32>
    %371 = arith.divf %369, %370 : vector<8x32xf32>
    %372 = arith.mulf %363, %313 : vector<8x32xf32>
    %373 = arith.mulf %357, %365 : vector<8x32xf32>
    %374 = arith.addf %372, %373 : vector<8x32xf32>
    %375 = math.tanh %374 : vector<8x32xf32>
    %376 = arith.mulf %371, %375 : vector<8x32xf32>
    %c40 = arith.constant 40 : index
    %c0_85 = arith.constant 0 : index
    %377 = vector.load %arg14[%c40, %c0_85] : memref<64x32xf32, #tpu.memory_space<vmem>>, vector<8x32xf32>
    tpu.vector_store %arg14[%c40, %c0_85], %376 {strides = array<i32>} : memref<64x32xf32, #tpu.memory_space<vmem>>, vector<8x32xf32>,
    %c6 = arith.constant 6 : index
    %c0_86 = arith.constant 0 : index
    %c0_87 = arith.constant 0 : index
    %378 = vector.load %arg0[%c6, %c0_86, %c0_87] : memref<8x8x32xf32, #tpu.memory_space<vmem>>, vector<1x8x32xf32>
    %379 = vector.shape_cast %378 : vector<1x8x32xf32> to vector<8x32xf32>
    %380 = tpu.concatenate %379, %347 in 1 : vector<8x32xf32>, vector<8x32xf32> -> vector<8x64xf32>
    %cst_88 = arith.constant dense<0.000000e+00> : vector<8x128xf32>
    %381 = tpu.matmul %380, %0, %cst_88 {dimension_numbers = #tpu.dot_dimension_numbers<[1], [0], [0], [1], [0, 0, 1, 1], [], []>} : vector<8x64xf32>, vector<64x128xf32>, vector<8x128xf32> -> vector<8x128xf32>
    %382 = vector.broadcast %2 : vector<1x128xf32> to vector<8x128xf32>
    %383 = arith.addf %381, %382 : vector<8x128xf32>
    %384 = vector.extract_strided_slice %383 {offsets = [0, 0], sizes = [8, 32], strides = [1, 1]} : vector<8x128xf32> to vector<8x32xf32>
    %385 = arith.negf %384 : vector<8x32xf32>
    %386 = math.exp %385 : vector<8x32xf32>
    %cst_89 = arith.constant 1.000000e+00 : f32
    %387 = vector.broadcast %cst_89 : f32 to vector<8x32xf32>
    %388 = arith.addf %387, %386 : vector<8x32xf32>
    %389 = arith.divf %387, %388 : vector<8x32xf32>
    %390 = vector.extract_strided_slice %383 {offsets = [0, 32], sizes = [8, 32], strides = [1, 1]} : vector<8x128xf32> to vector<8x32xf32>
    %391 = arith.negf %390 : vector<8x32xf32>
    %392 = math.exp %391 : vector<8x32xf32>
    %cst_90 = arith.constant 1.000000e+00 : f32
    %393 = vector.broadcast %cst_90 : f32 to vector<8x32xf32>
    %394 = arith.addf %393, %392 : vector<8x32xf32>
    %395 = arith.divf %393, %394 : vector<8x32xf32>
    %396 = vector.extract_strided_slice %383 {offsets = [0, 64], sizes = [8, 32], strides = [1, 1]} : vector<8x128xf32> to vector<8x32xf32>
    %397 = math.tanh %396 : vector<8x32xf32>
    %398 = vector.extract_strided_slice %383 {offsets = [0, 96], sizes = [8, 32], strides = [1, 1]} : vector<8x128xf32> to vector<8x32xf32>
    %399 = arith.negf %398 : vector<8x32xf32>
    %400 = math.exp %399 : vector<8x32xf32>
    %cst_91 = arith.constant 1.000000e+00 : f32
    %401 = vector.broadcast %cst_91 : f32 to vector<8x32xf32>
    %402 = arith.addf %401, %400 : vector<8x32xf32>
    %403 = arith.divf %401, %402 : vector<8x32xf32>
    %404 = arith.mulf %395, %345 : vector<8x32xf32>
    %405 = arith.mulf %389, %397 : vector<8x32xf32>
    %406 = arith.addf %404, %405 : vector<8x32xf32>
    %407 = math.tanh %406 : vector<8x32xf32>
    %408 = arith.mulf %403, %407 : vector<8x32xf32>
    %409 = tpu.concatenate %408, %376 in 1 : vector<8x32xf32>, vector<8x32xf32> -> vector<8x64xf32>
    %cst_92 = arith.constant dense<0.000000e+00> : vector<8x128xf32>
    %410 = tpu.matmul %409, %1, %cst_92 {dimension_numbers = #tpu.dot_dimension_numbers<[1], [0], [0], [1], [0, 0, 1, 1], [], []>} : vector<8x64xf32>, vector<64x128xf32>, vector<8x128xf32> -> vector<8x128xf32>
    %411 = vector.broadcast %3 : vector<1x128xf32> to vector<8x128xf32>
    %412 = arith.addf %410, %411 : vector<8x128xf32>
    %413 = vector.extract_strided_slice %412 {offsets = [0, 0], sizes = [8, 32], strides = [1, 1]} : vector<8x128xf32> to vector<8x32xf32>
    %414 = arith.negf %413 : vector<8x32xf32>
    %415 = math.exp %414 : vector<8x32xf32>
    %cst_93 = arith.constant 1.000000e+00 : f32
    %416 = vector.broadcast %cst_93 : f32 to vector<8x32xf32>
    %417 = arith.addf %416, %415 : vector<8x32xf32>
    %418 = arith.divf %416, %417 : vector<8x32xf32>
    %419 = vector.extract_strided_slice %412 {offsets = [0, 32], sizes = [8, 32], strides = [1, 1]} : vector<8x128xf32> to vector<8x32xf32>
    %420 = arith.negf %419 : vector<8x32xf32>
    %421 = math.exp %420 : vector<8x32xf32>
    %cst_94 = arith.constant 1.000000e+00 : f32
    %422 = vector.broadcast %cst_94 : f32 to vector<8x32xf32>
    %423 = arith.addf %422, %421 : vector<8x32xf32>
    %424 = arith.divf %422, %423 : vector<8x32xf32>
    %425 = vector.extract_strided_slice %412 {offsets = [0, 64], sizes = [8, 32], strides = [1, 1]} : vector<8x128xf32> to vector<8x32xf32>
    %426 = math.tanh %425 : vector<8x32xf32>
    %427 = vector.extract_strided_slice %412 {offsets = [0, 96], sizes = [8, 32], strides = [1, 1]} : vector<8x128xf32> to vector<8x32xf32>
    %428 = arith.negf %427 : vector<8x32xf32>
    %429 = math.exp %428 : vector<8x32xf32>
    %cst_95 = arith.constant 1.000000e+00 : f32
    %430 = vector.broadcast %cst_95 : f32 to vector<8x32xf32>
    %431 = arith.addf %430, %429 : vector<8x32xf32>
    %432 = arith.divf %430, %431 : vector<8x32xf32>
    %433 = arith.mulf %424, %374 : vector<8x32xf32>
    %434 = arith.mulf %418, %426 : vector<8x32xf32>
    %435 = arith.addf %433, %434 : vector<8x32xf32>
    %436 = math.tanh %435 : vector<8x32xf32>
    %437 = arith.mulf %432, %436 : vector<8x32xf32>
    %c48 = arith.constant 48 : index
    %c0_96 = arith.constant 0 : index
    %438 = vector.load %arg14[%c48, %c0_96] : memref<64x32xf32, #tpu.memory_space<vmem>>, vector<8x32xf32>
    tpu.vector_store %arg14[%c48, %c0_96], %437 {strides = array<i32>} : memref<64x32xf32, #tpu.memory_space<vmem>>, vector<8x32xf32>,
    %c7 = arith.constant 7 : index
    %c0_97 = arith.constant 0 : index
    %c0_98 = arith.constant 0 : index
    %439 = vector.load %arg0[%c7, %c0_97, %c0_98] : memref<8x8x32xf32, #tpu.memory_space<vmem>>, vector<1x8x32xf32>
    %440 = vector.shape_cast %439 : vector<1x8x32xf32> to vector<8x32xf32>
    %441 = tpu.concatenate %440, %408 in 1 : vector<8x32xf32>, vector<8x32xf32> -> vector<8x64xf32>
    %cst_99 = arith.constant dense<0.000000e+00> : vector<8x128xf32>
    %442 = tpu.matmul %441, %0, %cst_99 {dimension_numbers = #tpu.dot_dimension_numbers<[1], [0], [0], [1], [0, 0, 1, 1], [], []>} : vector<8x64xf32>, vector<64x128xf32>, vector<8x128xf32> -> vector<8x128xf32>
    %443 = vector.broadcast %2 : vector<1x128xf32> to vector<8x128xf32>
    %444 = arith.addf %442, %443 : vector<8x128xf32>
    %445 = vector.extract_strided_slice %444 {offsets = [0, 0], sizes = [8, 32], strides = [1, 1]} : vector<8x128xf32> to vector<8x32xf32>
    %446 = arith.negf %445 : vector<8x32xf32>
    %447 = math.exp %446 : vector<8x32xf32>
    %cst_100 = arith.constant 1.000000e+00 : f32
    %448 = vector.broadcast %cst_100 : f32 to vector<8x32xf32>
    %449 = arith.addf %448, %447 : vector<8x32xf32>
    %450 = arith.divf %448, %449 : vector<8x32xf32>
    %451 = vector.extract_strided_slice %444 {offsets = [0, 32], sizes = [8, 32], strides = [1, 1]} : vector<8x128xf32> to vector<8x32xf32>
    %452 = arith.negf %451 : vector<8x32xf32>
    %453 = math.exp %452 : vector<8x32xf32>
    %cst_101 = arith.constant 1.000000e+00 : f32
    %454 = vector.broadcast %cst_101 : f32 to vector<8x32xf32>
    %455 = arith.addf %454, %453 : vector<8x32xf32>
    %456 = arith.divf %454, %455 : vector<8x32xf32>
    %457 = vector.extract_strided_slice %444 {offsets = [0, 64], sizes = [8, 32], strides = [1, 1]} : vector<8x128xf32> to vector<8x32xf32>
    %458 = math.tanh %457 : vector<8x32xf32>
    %459 = vector.extract_strided_slice %444 {offsets = [0, 96], sizes = [8, 32], strides = [1, 1]} : vector<8x128xf32> to vector<8x32xf32>
    %460 = arith.negf %459 : vector<8x32xf32>
    %461 = math.exp %460 : vector<8x32xf32>
    %cst_102 = arith.constant 1.000000e+00 : f32
    %462 = vector.broadcast %cst_102 : f32 to vector<8x32xf32>
    %463 = arith.addf %462, %461 : vector<8x32xf32>
    %464 = arith.divf %462, %463 : vector<8x32xf32>
    %465 = arith.mulf %456, %406 : vector<8x32xf32>
    %466 = arith.mulf %450, %458 : vector<8x32xf32>
    %467 = arith.addf %465, %466 : vector<8x32xf32>
    %468 = math.tanh %467 : vector<8x32xf32>
    %469 = arith.mulf %464, %468 : vector<8x32xf32>
    %470 = tpu.concatenate %469, %437 in 1 : vector<8x32xf32>, vector<8x32xf32> -> vector<8x64xf32>
    %cst_103 = arith.constant dense<0.000000e+00> : vector<8x128xf32>
    %471 = tpu.matmul %470, %1, %cst_103 {dimension_numbers = #tpu.dot_dimension_numbers<[1], [0], [0], [1], [0, 0, 1, 1], [], []>} : vector<8x64xf32>, vector<64x128xf32>, vector<8x128xf32> -> vector<8x128xf32>
    %472 = vector.broadcast %3 : vector<1x128xf32> to vector<8x128xf32>
    %473 = arith.addf %471, %472 : vector<8x128xf32>
    %474 = vector.extract_strided_slice %473 {offsets = [0, 0], sizes = [8, 32], strides = [1, 1]} : vector<8x128xf32> to vector<8x32xf32>
    %475 = arith.negf %474 : vector<8x32xf32>
    %476 = math.exp %475 : vector<8x32xf32>
    %cst_104 = arith.constant 1.000000e+00 : f32
    %477 = vector.broadcast %cst_104 : f32 to vector<8x32xf32>
    %478 = arith.addf %477, %476 : vector<8x32xf32>
    %479 = arith.divf %477, %478 : vector<8x32xf32>
    %480 = vector.extract_strided_slice %473 {offsets = [0, 32], sizes = [8, 32], strides = [1, 1]} : vector<8x128xf32> to vector<8x32xf32>
    %481 = arith.negf %480 : vector<8x32xf32>
    %482 = math.exp %481 : vector<8x32xf32>
    %cst_105 = arith.constant 1.000000e+00 : f32
    %483 = vector.broadcast %cst_105 : f32 to vector<8x32xf32>
    %484 = arith.addf %483, %482 : vector<8x32xf32>
    %485 = arith.divf %483, %484 : vector<8x32xf32>
    %486 = vector.extract_strided_slice %473 {offsets = [0, 64], sizes = [8, 32], strides = [1, 1]} : vector<8x128xf32> to vector<8x32xf32>
    %487 = math.tanh %486 : vector<8x32xf32>
    %488 = vector.extract_strided_slice %473 {offsets = [0, 96], sizes = [8, 32], strides = [1, 1]} : vector<8x128xf32> to vector<8x32xf32>
    %489 = arith.negf %488 : vector<8x32xf32>
    %490 = math.exp %489 : vector<8x32xf32>
    %cst_106 = arith.constant 1.000000e+00 : f32
    %491 = vector.broadcast %cst_106 : f32 to vector<8x32xf32>
    %492 = arith.addf %491, %490 : vector<8x32xf32>
    %493 = arith.divf %491, %492 : vector<8x32xf32>
    %494 = arith.mulf %485, %435 : vector<8x32xf32>
    %495 = arith.mulf %479, %487 : vector<8x32xf32>
    %496 = arith.addf %494, %495 : vector<8x32xf32>
    %497 = math.tanh %496 : vector<8x32xf32>
    %498 = arith.mulf %493, %497 : vector<8x32xf32>
    %c56 = arith.constant 56 : index
    %c0_107 = arith.constant 0 : index
    %499 = vector.load %arg14[%c56, %c0_107] : memref<64x32xf32, #tpu.memory_space<vmem>>, vector<8x32xf32>
    tpu.vector_store %arg14[%c56, %c0_107], %498 {strides = array<i32>} : memref<64x32xf32, #tpu.memory_space<vmem>>, vector<8x32xf32>,
    %c0_108 = arith.constant 0 : index
    %c0_109 = arith.constant 0 : index
    %c0_110 = arith.constant 0 : index
    %500 = vector.load %arg12[%c0_108, %c0_109, %c0_110] : memref<2x8x32xf32, #tpu.memory_space<vmem>>, vector<1x8x32xf32>
    %501 = vector.shape_cast %500 : vector<1x8x32xf32> to vector<8x32xf32>
    %502 = vector.shape_cast %469 : vector<8x32xf32> to vector<1x8x32xf32>
    tpu.vector_store %arg12[%c0_108, %c0_109, %c0_110], %502 {strides = array<i32>} : memref<2x8x32xf32, #tpu.memory_space<vmem>>, vector<1x8x32xf32>,
    %c0_111 = arith.constant 0 : index
    %c0_112 = arith.constant 0 : index
    %c0_113 = arith.constant 0 : index
    %503 = vector.load %arg13[%c0_111, %c0_112, %c0_113] : memref<2x8x32xf32, #tpu.memory_space<vmem>>, vector<1x8x32xf32>
    %504 = vector.shape_cast %503 : vector<1x8x32xf32> to vector<8x32xf32>
    %505 = vector.shape_cast %467 : vector<8x32xf32> to vector<1x8x32xf32>
    tpu.vector_store %arg13[%c0_111, %c0_112, %c0_113], %505 {strides = array<i32>} : memref<2x8x32xf32, #tpu.memory_space<vmem>>, vector<1x8x32xf32>,
    %c1_114 = arith.constant 1 : index
    %c0_115 = arith.constant 0 : index
    %c0_116 = arith.constant 0 : index
    %506 = vector.load %arg12[%c1_114, %c0_115, %c0_116] : memref<2x8x32xf32, #tpu.memory_space<vmem>>, vector<1x8x32xf32>
    %507 = vector.shape_cast %506 : vector<1x8x32xf32> to vector<8x32xf32>
    %508 = vector.shape_cast %498 : vector<8x32xf32> to vector<1x8x32xf32>
    tpu.vector_store %arg12[%c1_114, %c0_115, %c0_116], %508 {strides = array<i32>} : memref<2x8x32xf32, #tpu.memory_space<vmem>>, vector<1x8x32xf32>,
    %c1_117 = arith.constant 1 : index
    %c0_118 = arith.constant 0 : index
    %c0_119 = arith.constant 0 : index
    %509 = vector.load %arg13[%c1_117, %c0_118, %c0_119] : memref<2x8x32xf32, #tpu.memory_space<vmem>>, vector<1x8x32xf32>
    %510 = vector.shape_cast %509 : vector<1x8x32xf32> to vector<8x32xf32>
    %511 = vector.shape_cast %496 : vector<8x32xf32> to vector<1x8x32xf32>
    tpu.vector_store %arg13[%c1_117, %c0_118, %c0_119], %511 {strides = array<i32>} : memref<2x8x32xf32, #tpu.memory_space<vmem>>, vector<1x8x32xf32>,
    %c0_120 = arith.constant 0 : index
    %c0_121 = arith.constant 0 : index
    %512 = vector.load %arg14[%c0_120, %c0_121] : memref<64x32xf32, #tpu.memory_space<vmem>>, vector<64x32xf32>
    %c0_122 = arith.constant 0 : index
    %c0_123 = arith.constant 0 : index
    %513 = vector.load %arg7[%c0_122, %c0_123] : memref<32x132xf32, #tpu.memory_space<vmem>>, vector<32x132xf32>
    %cst_124 = arith.constant dense<0.000000e+00> : vector<64x132xf32>
    %514 = tpu.matmul %512, %513, %cst_124 {dimension_numbers = #tpu.dot_dimension_numbers<[1], [0], [0], [1], [0, 0, 1, 1], [], []>} : vector<64x32xf32>, vector<32x132xf32>, vector<64x132xf32> -> vector<64x132xf32>
    %c0_125 = arith.constant 0 : index
    %c0_126 = arith.constant 0 : index
    %515 = vector.load %arg8[%c0_125, %c0_126] : memref<1x132xf32, #tpu.memory_space<vmem>>, vector<1x132xf32>
    %516 = vector.broadcast %515 : vector<1x132xf32> to vector<64x132xf32>
    %517 = arith.addf %514, %516 : vector<64x132xf32>
    %518 = vector.extract_strided_slice %517 {offsets = [0, 0], sizes = [64, 128], strides = [1, 1]} : vector<64x132xf32> to vector<64x128xf32>
    %519 = math.tanh %518 : vector<64x128xf32>
    %520 = vector.extract_strided_slice %517 {offsets = [0, 128], sizes = [64, 4], strides = [1, 1]} : vector<64x132xf32> to vector<64x4xf32>
    %cst_127 = arith.constant dense<0xFF800000> : vector<64xf32>
    %521 = vector.multi_reduction <maximumf>, %520, %cst_127 [1] : vector<64x4xf32> to vector<64xf32>
    %522 = vector.shape_cast %521 : vector<64xf32> to vector<64x1xf32>
    %523 = vector.broadcast %522 : vector<64x1xf32> to vector<64x4xf32>
    %524 = arith.subf %520, %523 : vector<64x4xf32>
    %525 = math.exp %524 : vector<64x4xf32>
    %cst_128 = arith.constant dense<0.000000e+00> : vector<64xf32>
    %526 = vector.multi_reduction <add>, %525, %cst_128 [1] : vector<64x4xf32> to vector<64xf32>
    %527 = vector.shape_cast %526 : vector<64xf32> to vector<64x1xf32>
    %528 = tpu.reciprocal %527 {approx = true} : vector<64x1xf32> -> vector<64x1xf32>
    %529 = vector.broadcast %528 : vector<64x1xf32> to vector<64x4xf32>
    %530 = arith.mulf %525, %529 : vector<64x4xf32>
    %531 = vector.extract_strided_slice %519 {offsets = [0, 0], sizes = [64, 32], strides = [1, 1]} : vector<64x128xf32> to vector<64x32xf32>
    %532 = vector.extract_strided_slice %519 {offsets = [0, 32], sizes = [64, 32], strides = [1, 1]} : vector<64x128xf32> to vector<64x32xf32>
    %533 = vector.extract_strided_slice %519 {offsets = [0, 64], sizes = [64, 32], strides = [1, 1]} : vector<64x128xf32> to vector<64x32xf32>
    %534 = vector.extract_strided_slice %519 {offsets = [0, 96], sizes = [64, 32], strides = [1, 1]} : vector<64x128xf32> to vector<64x32xf32>
    %535 = tpu.concatenate %531, %532, %533, %534 in 0 : vector<64x32xf32>, vector<64x32xf32>, vector<64x32xf32>, vector<64x32xf32> -> vector<256x32xf32>
    %c0_129 = arith.constant 0 : index
    %c0_130 = arith.constant 0 : index
    %536 = vector.load %arg9[%c0_129, %c0_130] : memref<32x256xf32, #tpu.memory_space<vmem>>, vector<32x256xf32>
    %cst_131 = arith.constant dense<0.000000e+00> : vector<256x256xf32>
    %537 = tpu.matmul %535, %536, %cst_131 {dimension_numbers = #tpu.dot_dimension_numbers<[1], [0], [0], [1], [0, 0, 1, 1], [], []>} : vector<256x32xf32>, vector<32x256xf32>, vector<256x256xf32> -> vector<256x256xf32>
    %c0_132 = arith.constant 0 : index
    %c0_133 = arith.constant 0 : index
    %538 = vector.load %arg10[%c0_132, %c0_133] : memref<1x256xf32, #tpu.memory_space<vmem>>, vector<1x256xf32>
    %539 = vector.broadcast %538 : vector<1x256xf32> to vector<256x256xf32>
    %540 = arith.addf %537, %539 : vector<256x256xf32>
    %cst_134 = arith.constant dense<0xFF800000> : vector<256xf32>
    %541 = vector.multi_reduction <maximumf>, %540, %cst_134 [1] : vector<256x256xf32> to vector<256xf32>
    %542 = vector.shape_cast %541 : vector<256xf32> to vector<256x1xf32>
    %543 = vector.broadcast %542 : vector<256x1xf32> to vector<256x256xf32>
    %544 = arith.subf %540, %543 : vector<256x256xf32>
    %545 = math.exp %544 : vector<256x256xf32>
    %cst_135 = arith.constant dense<0.000000e+00> : vector<256xf32>
    %546 = vector.multi_reduction <add>, %545, %cst_135 [1] : vector<256x256xf32> to vector<256xf32>
    %547 = vector.shape_cast %546 : vector<256xf32> to vector<256x1xf32>
    %548 = tpu.reciprocal %547 {approx = true} : vector<256x1xf32> -> vector<256x1xf32>
    %549 = vector.broadcast %548 : vector<256x1xf32> to vector<256x256xf32>
    %550 = arith.mulf %545, %549 : vector<256x256xf32>
    %551 = vector.extract_strided_slice %550 {offsets = [0, 0], sizes = [64, 256], strides = [1, 1]} : vector<256x256xf32> to vector<64x256xf32>
    %552 = vector.extract_strided_slice %530 {offsets = [0, 0], sizes = [64, 1], strides = [1, 1]} : vector<64x4xf32> to vector<64x1xf32>
    %553 = vector.broadcast %552 : vector<64x1xf32> to vector<64x256xf32>
    %554 = arith.mulf %551, %553 : vector<64x256xf32>
    %555 = vector.extract_strided_slice %550 {offsets = [64, 0], sizes = [64, 256], strides = [1, 1]} : vector<256x256xf32> to vector<64x256xf32>
    %556 = vector.extract_strided_slice %530 {offsets = [0, 1], sizes = [64, 1], strides = [1, 1]} : vector<64x4xf32> to vector<64x1xf32>
    %557 = vector.broadcast %556 : vector<64x1xf32> to vector<64x256xf32>
    %558 = arith.mulf %555, %557 : vector<64x256xf32>
    %559 = arith.addf %554, %558 : vector<64x256xf32>
    %560 = vector.extract_strided_slice %550 {offsets = [128, 0], sizes = [64, 256], strides = [1, 1]} : vector<256x256xf32> to vector<64x256xf32>
    %561 = vector.extract_strided_slice %530 {offsets = [0, 2], sizes = [64, 1], strides = [1, 1]} : vector<64x4xf32> to vector<64x1xf32>
    %562 = vector.broadcast %561 : vector<64x1xf32> to vector<64x256xf32>
    %563 = arith.mulf %560, %562 : vector<64x256xf32>
    %564 = arith.addf %559, %563 : vector<64x256xf32>
    %565 = vector.extract_strided_slice %550 {offsets = [192, 0], sizes = [64, 256], strides = [1, 1]} : vector<256x256xf32> to vector<64x256xf32>
    %566 = vector.extract_strided_slice %530 {offsets = [0, 3], sizes = [64, 1], strides = [1, 1]} : vector<64x4xf32> to vector<64x1xf32>
    %567 = vector.broadcast %566 : vector<64x1xf32> to vector<64x256xf32>
    %568 = arith.mulf %565, %567 : vector<64x256xf32>
    %569 = arith.addf %564, %568 : vector<64x256xf32>
    %cst_136 = arith.constant 9.99999993E-9 : f32
    %570 = vector.broadcast %cst_136 : f32 to vector<64x256xf32>
    %571 = arith.addf %569, %570 : vector<64x256xf32>
    %572 = math.log %571 : vector<64x256xf32>
    %c0_137 = arith.constant 0 : index
    %c0_138 = arith.constant 0 : index
    %573 = vector.load %arg11[%c0_137, %c0_138] : memref<64x256xf32, #tpu.memory_space<vmem>>, vector<64x256xf32>
    tpu.vector_store %arg11[%c0_137, %c0_138], %572 {strides = array<i32>} : memref<64x256xf32, #tpu.memory_space<vmem>>, vector<64x256xf32>,
    return
  }
}

</mosaic_0001>

<bundles_post_ra>
// kernel: mos_rnn_forward.1
= control target key start
LH: loop header
LB: loop body
LE: loop exit
PB: predicated region body
PF: predicated region fallthrough
CT: control target
= control target key end

     0   :  { %v4249_v1 = vmov 0.0   ;;  %vm4250_vm0 = vmmov 0   ;;  %s4251_s14 = smov 32   ;;  %vm70_vm1 = vcmask 261120   ;;  %vm78_vm2 = vcmask 523264   ;;  %s4252_s17 = smov 64   ;;  %s6304_s1 = inlined_call_operand.vmem [shape: f32[2,8,32], index: 1, kind: input, shape index: {}]   ;;  %s6305_s3 = inlined_call_operand.vmem [shape: f32[64,128], index: 3, kind: input, shape index: {}]   ;;  %s6306_s2 = inlined_call_operand.vmem [shape: f32[2,8,32], index: 2, kind: input, shape index: {}]   ;;  %s6307_s0 = inlined_call_operand.vmem [shape: f32[8,8,32], index: 0, kind: input, shape index: {}]   ;;  %s6308_s4 = inlined_call_operand.vmem [shape: f32[1,128], index: 4, kind: input, shape index: {}]   ;;  %s6309_s5 = inlined_call_operand.vmem [shape: f32[64,128], index: 5, kind: input, shape index: {}]   ;;  %s6310_s6 = inlined_call_operand.vmem [shape: f32[1,128], index: 6, kind: input, shape index: {}]   ;;  %s6311_s12 = inlined_call_operand.vmem [shape: f32[2,8,32], index: 12, kind: output, shape index: {1}]   ;;  %s6312_s7 = inlined_call_operand.vmem [shape: f32[32,132], index: 7, kind: input, shape index: {}]   ;;  %s6313_s8 = inlined_call_operand.vmem [shape: f32[1,132], index: 8, kind: input, shape index: {}]   ;;  %s6314_s9 = inlined_call_operand.vmem [shape: f32[32,256], index: 9, kind: input, shape index: {}]   ;;  %s6315_s13 = inlined_call_operand.vmem [shape: f32[2,8,32], index: 13, kind: output, shape index: {2}]   ;;  %s6316_s10 = inlined_call_operand.vmem [shape: f32[1,256], index: 10, kind: input, shape index: {}]   ;;  %s6317_s11 = inlined_call_operand.vmem [shape: f32[64,256], index: 11, kind: output, shape index: {0}]  }
   0x1   :  { %v59_v0 = vld [vmem:[%s6304_s1] sm:$0xff]  ;;  %3498 = vmatprep.subr.mxu0 %v4249_v1  ;;  %v4335_v2 = vld [vmem:[%s6305_s3 + $0x38] sm:$0xff]  ;;  %v4340_v3 = vld [vmem:[%s6305_s3 + $0x30] sm:$0xff]  ;;  %3514 = vmatprep.mubr.msk.f32.mxu0 %vm4250_vm0, %v4249_v1  ;;  %vm1979_vm3 = vcmask 31744  }
   0x2   :  { %67 = vrot.lane.b32.xlu0 %v59_v0, %s4251_s14  ;;  %3499 = vmatpush3.msra.mxu0 %v4335_v2  ;;  %v4350_v4 = vld [vmem:[%s6305_s3 + $0x28] sm:$0xff]  ;;  %v62_v5 = vld [vmem:[%s6306_s2] sm:$0xff]  ;;  %v4371_v7 = vld [vmem:[%s6305_s3 + $0x18] sm:$0xff] }
   0x3   :  { %3500 = vmatprep.subr.mxu0 %v4249_v1  ;;  %3517 = vmatprep.subr.mxu1 %v4249_v1  ;;  %v4363_v6 = vld [vmem:[%s6305_s3 + $0x20] sm:$0xff]  ;;  %v4378_v8 = vld [vmem:[%s6305_s3 + $0x10] sm:$0xff]  ;;  %v4385_v9 = vld [vmem:[%s6305_s3 + $0x8] sm:$0xff] }
   0x4   :  { %3501 = vmatpush3.msra.mxu0 %v4340_v3  ;;  %3533 = vmatprep.mubr.msk.f32.mxu1 %vm4250_vm0, %v4249_v1  ;;  %v4392_v10 = vld [vmem:[%s6305_s3] sm:$0xff]  ;;  %v4435_v29 = vld [vmem:[%s6309_s5 + $0x38] sm:$0xff]  ;;  %v4440_v30 = vld [vmem:[%s6309_s5 + $0x30] sm:$0xff] }
   0x5   :  { %3502 = vmatprep.subr.mxu0 %v4249_v1  ;;  %160 = vrot.lane.b32.xlu1 %v62_v5, %s4251_s14  ;;  %v65_v11 = vld [vmem:[%s6307_s0] sm:$0xff]  ;;  %v4447_v31 = vld [vmem:[%s6309_s5 + $0x28] sm:$0xff]  ;;  %v4462_v34 = vld [vmem:[%s6309_s5 + $0x18] sm:$0xff] }
   0x6   :  { %3503 = vmatpush3.msra.mxu0 %v4350_v4  ;;  %v4424_v14 = vld [vmem:[%s6308_s4] ss:$0 sm:$0xff]  ;;  %3518 = vmatpush3.msra.mxu1 %v4435_v29  ;;  %v3269_v35 = vld [vmem:[%s6304_s1 + $0x8] sm:$0xff]  ;;  %v4472_v36 = vld [vmem:[%s6309_s5 + $0x10] sm:$0xff] }
   0x7   :  { %3504 = vmatprep.subr.mxu0 %v4249_v1  ;;  %3519 = vmatprep.subr.mxu1 %v4249_v1  ;;  %v4454_v32 = vld [vmem:[%s6309_s5 + $0x20] sm:$0xff]  ;;  %v4480_v37 = vld [vmem:[%s6309_s5 + $0x8] sm:$0xff] }
   0x8   :  { %3505 = vmatpush3.msra.mxu0 %v4363_v6  ;;  %3520 = vmatpush3.msra.mxu1 %v4440_v30  ;;  %v4489_v38 = vld [vmem:[%s6309_s5] sm:$0xff]  ;;  %v3277_v44 = vld [vmem:[%s6307_s0 + $0x8] sm:$0xff] }
   0x9   :  { %3506 = vmatprep.subr.mxu0 %v4249_v1  ;;  %3521 = vmatprep.subr.mxu1 %v4249_v1  ;;  %v4541_v47 = vld [vmem:[%s6310_s6] ss:$0 sm:$0xff]  ;;  %v3270_v55 = vld [vmem:[%s6306_s2 + $0x8] sm:$0xff] }
   0xa   :  { %3507 = vmatpush3.msra.mxu0 %v4371_v7  ;;  %3522 = vmatpush3.msra.mxu1 %v4447_v31 }
   0xb   :  { %3508 = vmatprep.subr.mxu0 %v4249_v1  ;;  %3523 = vmatprep.subr.mxu1 %v4249_v1 }
   0xc   :  { %3509 = vmatpush3.msra.mxu0 %v4378_v8  ;;  %3524 = vmatpush3.msra.mxu1 %v4454_v32 }
   0xd   :  { %3510 = vmatprep.subr.mxu0 %v4249_v1  ;;  %3525 = vmatprep.subr.mxu1 %v4249_v1 }
   0xe   :  { %3511 = vmatpush3.msra.mxu0 %v4385_v9  ;;  %3526 = vmatpush3.msra.mxu1 %v4462_v34 }
   0xf   :  { %3512 = vmatprep.subr.mxu0 %v4249_v1  ;;  %3527 = vmatprep.subr.mxu1 %v4249_v1 }
  0x10   :  { %3513 = vmatpush3.msra.mxu0 %v4392_v10  ;;  %3528 = vmatpush3.msra.mxu1 %v4472_v36 }
  0x11   :  { %3536 = vmatprep.subr.mxu0 %v4249_v1  ;;  %3529 = vmatprep.subr.mxu1 %v4249_v1 }
  0x12   :  { %3530 = vmatpush3.msra.mxu1 %v4480_v37 }
  0x13   :  { %3531 = vmatprep.subr.mxu1 %v4249_v1 }
  0x14   :  { %3532 = vmatpush3.msra.mxu1 %v4489_v38 }
  0x15   :  { %3555 = vmatprep.subr.mxu1 %v4249_v1 }
  0x74   :  { %v68_v12 = vpop.permute.xlu0 %67 }
  0x75   :  { %v71_v13 = vsel %vm70_vm1, %v65_v11, %v68_v12 }
  0x76   :  { %3515 = vmatmul.mubr.msk.f32.vlgmr.msra.gmra.mxu0 %vm78_vm2, %v71_v13 }
  0x77   :  { %3537 = vmatpush3.msra.mxu0 %v4335_v2  ;;  %3552 = vmatprep.mubr.msk.f32.mxu0 %vm4250_vm0, %v4249_v1  ;;  %v161_v25 = vpop.permute.xlu1 %160 }
  0x78   :  { %3538 = vmatprep.subr.mxu0 %v4249_v1 }
  0x79   :  { %3539 = vmatpush3.msra.mxu0 %v4340_v3 }
  0x7a   :  { %3540 = vmatprep.subr.mxu0 %v4249_v1 }
  0x7b   :  { %3541 = vmatpush3.msra.mxu0 %v4350_v4 }
  0x7c   :  { %3542 = vmatprep.subr.mxu0 %v4249_v1 }
  0x7d   :  { %3543 = vmatpush3.msra.mxu0 %v4363_v6 }
  0x7e   :  { %3544 = vmatprep.subr.mxu0 %v4249_v1 }
  0x7f   :  { %3545 = vmatpush3.msra.mxu0 %v4371_v7 }
  0x80   :  { %3546 = vmatprep.subr.mxu0 %v4249_v1 }
  0x81   :  { %3547 = vmatpush3.msra.mxu0 %v4378_v8 }
  0x82   :  { %3548 = vmatprep.subr.mxu0 %v4249_v1 }
  0x83   :  { %3549 = vmatpush3.msra.mxu0 %v4385_v9 }
  0x84   :  { %3550 = vmatprep.subr.mxu0 %v4249_v1 }
  0x85   :  { %3551 = vmatpush3.msra.mxu0 %v4392_v10 }
  0x86   :  { %3574 = vmatprep.subr.mxu0 %v4249_v1 }
 0x136   :  { %v148_v15 = vpop.f32.mrf.mxu0 }
 0x137   :  { %v149_v16 = vadd.f32 %v4424_v14, %v148_v15 }
 0x138   :  { %v3516_v17 = vpop.f32.mrf.mxu0 }
 0x139   :  { %3831 = vtanh.f32 %v149_v16  ;;  %v3273_v19 = vmul.f32 -1.442695, %v149_v16 }
 0x13b   :  { %3833 = vpow2.f32 %v3273_v19 }
 0x146   :  { %v3832_v18 = vpop.eup %3831 }
 0x147   :  { %165 = vrot.lane.b32.xlu0 %v3832_v18, %s4252_s17 }
 0x148   :  { %v3834_v20 = vpop.eup %3833 }
 0x149   :  { %v155_v21 = vadd.f32 1.0, %v3834_v20 }
 0x14b   :  { %3835 = vrcp.f32 %v155_v21 }
 0x158   :  { %v3836_v22 = vpop.eup %3835 }
 0x159   :  { %v163_v26 = vmul.f32 %v3836_v22, %v161_v25 }
 0x1b9   :  { %v166_v23 = vpop.permute.xlu0 %165 }
 0x1ba   :  { %v168_v24 = vmul.f32 %v3836_v22, %v166_v23 }
 0x1bc   :  { %170 = vrot.lane.b32.xlu1 %v168_v24, %s4251_s14 }
 0x22e   :  { %v171_v27 = vpop.permute.xlu1 %170 }
 0x22f   :  { %v4429_v28 = vadd.f32 %v171_v27, %v163_v26 }
 0x231   :  { %3837 = vtanh.f32 %v4429_v28 }
 0x23e   :  { %v3838_v33 = vpop.eup %3837 }
 0x23f   :  { %176 = vrot.lane.b32.xlu0 %v3838_v33, %s4252_s17 }
 0x243   :  { %185 = vrot.lane.b32.xlu0 %v3269_v35, %s4251_s14 }
 0x2b1   :  { %v177_v39 = vpop.permute.xlu0 %176 }
 0x2b2   :  { %v179_v40 = vmul.f32 %v3836_v22, %v177_v39  ;;  %v3282_v39 = vld [vmem:[%s6307_s0 + $0x10] sm:$0xff] }
 0x2b4   :  { %181 = vrot.lane.b32.xlu1 %v179_v40, %s4251_s14 }
 0x2b5   :  { %v186_v41 = vpop.permute.xlu0 %185 }
 0x2b8   :  { %303 = vrot.lane.b32.xlu1 %v179_v40, %s4252_s17 }
 0x326   :  { %v182_v42 = vpop.permute.xlu1 %181 }
 0x327   :  { %v188_v43 = vsel %vm70_vm1, %v182_v42, %v186_v41 }
 0x328   :  { %3534 = vmatmul.mubr.msk.f32.vlgmr.msra.gmra.mxu1 %vm78_vm2, %v188_v43 }
 0x329   :  { %3556 = vmatpush3.msra.mxu1 %v4435_v29  ;;  %3571 = vmatprep.mubr.msk.f32.mxu1 %vm4250_vm0, %v4249_v1 }
 0x32a   :  { %v304_v45 = vpop.permute.xlu1 %303  ;;  %3557 = vmatprep.subr.mxu1 %v4249_v1 }
 0x32b   :  { %v306_v46 = vsel %vm70_vm1, %v3277_v44, %v304_v45  ;;  %3558 = vmatpush3.msra.mxu1 %v4440_v30 }
 0x32c   :  { %3553 = vmatmul.mubr.msk.f32.vlgmr.msra.gmra.mxu0 %vm78_vm2, %v306_v46  ;;  %3559 = vmatprep.subr.mxu1 %v4249_v1 }
 0x32d   :  { %3560 = vmatpush3.msra.mxu1 %v4447_v31  ;;  %3575 = vmatpush3.msra.mxu0 %v4335_v2 }
 0x32e   :  { %3561 = vmatprep.subr.mxu1 %v4249_v1  ;;  %3576 = vmatprep.subr.mxu0 %v4249_v1 }
 0x32f   :  { %3562 = vmatpush3.msra.mxu1 %v4454_v32  ;;  %3577 = vmatpush3.msra.mxu0 %v4340_v3 }
 0x330   :  { %3563 = vmatprep.subr.mxu1 %v4249_v1  ;;  %3578 = vmatprep.subr.mxu0 %v4249_v1 }
 0x331   :  { %3564 = vmatpush3.msra.mxu1 %v4462_v34  ;;  %3579 = vmatpush3.msra.mxu0 %v4350_v4 }
 0x332   :  { %3565 = vmatprep.subr.mxu1 %v4249_v1  ;;  %3580 = vmatprep.subr.mxu0 %v4249_v1 }
 0x333   :  { %3566 = vmatpush3.msra.mxu1 %v4472_v36  ;;  %3581 = vmatpush3.msra.mxu0 %v4363_v6 }
 0x334   :  { %3567 = vmatprep.subr.mxu1 %v4249_v1  ;;  %3582 = vmatprep.subr.mxu0 %v4249_v1 }
 0x335   :  { %3568 = vmatpush3.msra.mxu1 %v4480_v37  ;;  %3583 = vmatpush3.msra.mxu0 %v4371_v7 }
 0x336   :  { %3569 = vmatprep.subr.mxu1 %v4249_v1  ;;  %3584 = vmatprep.subr.mxu0 %v4249_v1 }
 0x337   :  { %3570 = vmatpush3.msra.mxu1 %v4489_v38  ;;  %3585 = vmatpush3.msra.mxu0 %v4378_v8 }
 0x338   :  { %3586 = vmatprep.subr.mxu0 %v4249_v1  ;;  %3590 = vmatprep.mubr.msk.f32.mxu0 %vm4250_vm0, %v4249_v1 }
 0x339   :  { %3587 = vmatpush3.msra.mxu0 %v4385_v9  ;;  %3593 = vmatprep.subr.mxu1 %v4249_v1 }
 0x33a   :  { %3588 = vmatprep.subr.mxu0 %v4249_v1 }
 0x33b   :  { %3589 = vmatpush3.msra.mxu0 %v4392_v10 }
 0x33c   :  { %3612 = vmatprep.subr.mxu0 %v4249_v1 }
 0x3e8   :  { %v264_v48 = vpop.f32.mrf.mxu1 }
 0x3e9   :  { %v265_v49 = vadd.f32 %v4541_v47, %v264_v48 }
 0x3ea   :  { %v3535_v50 = vpop.f32.mrf.mxu1 }
 0x3eb   :  { %3839 = vtanh.f32 %v265_v49  ;;  %v3276_v57 = vmul.f32 -1.442695, %v265_v49 }
 0x3ec   :  { %v376_v51 = vpop.f32.mrf.mxu0 }
 0x3ed   :  { %v377_v52 = vadd.f32 %v4424_v14, %v376_v51 }
 0x3ee   :  { %v3554_v53 = vpop.f32.mrf.mxu0 }
 0x3ef   :  { %3841 = vtanh.f32 %v377_v52  ;;  %v3279_v58 = vmul.f32 -1.442695, %v377_v52 }
 0x3f0   :  { %3843 = vpow2.f32 %v3276_v57 }
 0x3f1   :  { %3845 = vpow2.f32 %v3279_v58 }
 0x3f8   :  { %v3840_v54 = vpop.eup %3839 }
 0x3f9   :  { %281 = vrot.lane.b32.xlu0 %v3840_v54, %s4252_s17 }
 0x3fc   :  { %v3842_v56 = vpop.eup %3841 }
 0x3fd   :  { %276 = vrot.lane.b32.xlu0 %v3270_v55, %s4251_s14  ;;  %389 = vrot.lane.b32.xlu1 %v3842_v56, %s4252_s17  ;;  %v3844_v59 = vpop.eup %3843 }
 0x3fe   :  { %v271_v60 = vadd.f32 1.0, %v3844_v59  ;;  %v3846_v61 = vpop.eup %3845 }
 0x3ff   :  { %v383_v62 = vadd.f32 1.0, %v3846_v61 }
 0x400   :  { %3847 = vrcp.f32 %v271_v60 }
 0x401   :  { %3849 = vrcp.f32 %v383_v62 }
 0x40d   :  { %v3848_v63 = vpop.eup %3847 }
 0x40e   :  { %v3850_v11 = vpop.eup %3849 }
 0x40f   :  { %v387_v19 = vmul.f32 %v3850_v11, %v4429_v28 }
 0x46b   :  { %v282_v0 = vpop.permute.xlu0 %281 }
 0x46c   :  { %v284_v5 = vmul.f32 %v3848_v63, %v282_v0 }
 0x46e   :  { %286 = vrot.lane.b32.xlu1 %v284_v5, %s4251_s14 }
 0x46f   :  { %v390_v12 = vpop.permute.xlu1 %389  ;;  %v277_v15 = vpop.permute.xlu0 %276 }
 0x470   :  { %v392_v13 = vmul.f32 %v3850_v11, %v390_v12  ;;  %v279_v16 = vmul.f32 %v3848_v63, %v277_v15 }
 0x472   :  { %394 = vrot.lane.b32.xlu0 %v392_v13, %s4251_s14 }
 0x4e0   :  { %v287_v17 = vpop.permute.xlu1 %286 }
 0x4e1   :  { %v4553_v18 = vadd.f32 %v287_v17, %v279_v16 }
 0x4e3   :  { %3851 = vtanh.f32 %v4553_v18 }
 0x4e4   :  { %v395_v20 = vpop.permute.xlu0 %394 }
 0x4e5   :  { %v4557_v21 = vadd.f32 %v395_v20, %v387_v19 }
 0x4e7   :  { %3853 = vtanh.f32 %v4557_v21 }
 0x4f0   :  { %v3852_v22 = vpop.eup %3851 }
 0x4f1   :  { %292 = vrot.lane.b32.xlu1 %v3852_v22, %s4252_s17 }
 0x4f4   :  { %v3854_v23 = vpop.eup %3853 }
 0x4f5   :  { %400 = vrot.lane.b32.xlu0 %v3854_v23, %s4252_s17 }
 0x563   :  { %v293_v24 = vpop.permute.xlu1 %292 }
 0x564   :  { %v4562_v25 = vmul.f32 %v3848_v63, %v293_v24  ;;  %v3287_v24 = vld [vmem:[%s6307_s0 + $0x18] sm:$0xff] }
 0x566   :  { %408 = vrot.lane.b32.xlu0 %v4562_v25, %s4252_s17 }
 0x567   :  { %v401_v26 = vpop.permute.xlu0 %400 }
 0x568   :  { %v403_v27 = vmul.f32 %v3850_v11, %v401_v26 }
 0x56a   :  { %405 = vrot.lane.b32.xlu1 %v403_v27, %s4251_s14 }
 0x56e   :  { %516 = vrot.lane.b32.xlu1 %v403_v27, %s4252_s17 }
 0x5d8   :  { %v409_v28 = vpop.permute.xlu0 %408 }
 0x5dc   :  { %v406_v33 = vpop.permute.xlu1 %405 }
 0x5dd   :  { %v411_v35 = vsel %vm70_vm1, %v406_v33, %v409_v28 }
 0x5de   :  { %3572 = vmatmul.mubr.msk.f32.vlgmr.msra.gmra.mxu1 %vm78_vm2, %v411_v35 }
 0x5df   :  { %3594 = vmatpush3.msra.mxu1 %v4435_v29  ;;  %3609 = vmatprep.mubr.msk.f32.mxu1 %vm4250_vm0, %v4249_v1 }
 0x5e0   :  { %v517_v40 = vpop.permute.xlu1 %516  ;;  %3595 = vmatprep.subr.mxu1 %v4249_v1 }
 0x5e1   :  { %v519_v41 = vsel %vm70_vm1, %v3282_v39, %v517_v40  ;;  %3596 = vmatpush3.msra.mxu1 %v4440_v30 }
 0x5e2   :  { %3591 = vmatmul.mubr.msk.f32.vlgmr.msra.gmra.mxu0 %vm78_vm2, %v519_v41  ;;  %3597 = vmatprep.subr.mxu1 %v4249_v1 }
 0x5e3   :  { %3598 = vmatpush3.msra.mxu1 %v4447_v31  ;;  %3613 = vmatpush3.msra.mxu0 %v4335_v2 }
 0x5e4   :  { %3599 = vmatprep.subr.mxu1 %v4249_v1  ;;  %3614 = vmatprep.subr.mxu0 %v4249_v1 }
 0x5e5   :  { %3600 = vmatpush3.msra.mxu1 %v4454_v32  ;;  %3615 = vmatpush3.msra.mxu0 %v4340_v3 }
 0x5e6   :  { %3601 = vmatprep.subr.mxu1 %v4249_v1  ;;  %3616 = vmatprep.subr.mxu0 %v4249_v1 }
 0x5e7   :  { %3602 = vmatpush3.msra.mxu1 %v4462_v34  ;;  %3617 = vmatpush3.msra.mxu0 %v4350_v4 }
 0x5e8   :  { %3603 = vmatprep.subr.mxu1 %v4249_v1  ;;  %3618 = vmatprep.subr.mxu0 %v4249_v1 }
 0x5e9   :  { %3604 = vmatpush3.msra.mxu1 %v4472_v36  ;;  %3619 = vmatpush3.msra.mxu0 %v4363_v6 }
 0x5ea   :  { %3605 = vmatprep.subr.mxu1 %v4249_v1  ;;  %3620 = vmatprep.subr.mxu0 %v4249_v1 }
 0x5eb   :  { %3606 = vmatpush3.msra.mxu1 %v4480_v37  ;;  %3621 = vmatpush3.msra.mxu0 %v4371_v7 }
 0x5ec   :  { %3607 = vmatprep.subr.mxu1 %v4249_v1  ;;  %3622 = vmatprep.subr.mxu0 %v4249_v1 }
 0x5ed   :  { %3608 = vmatpush3.msra.mxu1 %v4489_v38  ;;  %3623 = vmatpush3.msra.mxu0 %v4378_v8 }
 0x5ee   :  { %3624 = vmatprep.subr.mxu0 %v4249_v1  ;;  %3628 = vmatprep.mubr.msk.f32.mxu0 %vm4250_vm0, %v4249_v1 }
 0x5ef   :  { %3625 = vmatpush3.msra.mxu0 %v4385_v9  ;;  %3631 = vmatprep.subr.mxu1 %v4249_v1 }
 0x5f0   :  { %3626 = vmatprep.subr.mxu0 %v4249_v1 }
 0x5f1   :  { %3627 = vmatpush3.msra.mxu0 %v4392_v10 }
 0x5f2   :  { %3650 = vmatprep.subr.mxu0 %v4249_v1 }
 0x69e   :  { %v481_v42 = vpop.f32.mrf.mxu1 }
 0x69f   :  { %v482_v43 = vadd.f32 %v4541_v47, %v481_v42 }
 0x6a0   :  { %v3573_v44 = vpop.f32.mrf.mxu1 }
 0x6a1   :  { %3855 = vtanh.f32 %v482_v43  ;;  %v3281_v51 = vmul.f32 -1.442695, %v482_v43 }
 0x6a2   :  { %v589_v45 = vpop.f32.mrf.mxu0 }
 0x6a3   :  { %v590_v46 = vadd.f32 %v4424_v14, %v589_v45 }
 0x6a4   :  { %v3592_v48 = vpop.f32.mrf.mxu0 }
 0x6a5   :  { %3857 = vtanh.f32 %v590_v46  ;;  %v3284_v52 = vmul.f32 -1.442695, %v590_v46 }
 0x6a6   :  { %3859 = vpow2.f32 %v3281_v51 }
 0x6a7   :  { %3861 = vpow2.f32 %v3284_v52 }
 0x6ae   :  { %v3856_v49 = vpop.eup %3855 }
 0x6af   :  { %494 = vrot.lane.b32.xlu0 %v3856_v49, %s4252_s17 }
 0x6b2   :  { %v3858_v50 = vpop.eup %3857 }
 0x6b3   :  { %602 = vrot.lane.b32.xlu1 %v3858_v50, %s4252_s17  ;;  %v3860_v53 = vpop.eup %3859 }
 0x6b4   :  { %v488_v54 = vadd.f32 1.0, %v3860_v53  ;;  %v3862_v55 = vpop.eup %3861 }
 0x6b5   :  { %v596_v56 = vadd.f32 1.0, %v3862_v55 }
 0x6b6   :  { %3863 = vrcp.f32 %v488_v54 }
 0x6b7   :  { %3865 = vrcp.f32 %v596_v56 }
 0x6c3   :  { %v3864_v57 = vpop.eup %3863 }
 0x6c4   :  { %v3866_v60 = vpop.eup %3865  ;;  %v492_v63 = vmul.f32 %v3864_v57, %v4553_v18 }
 0x6c5   :  { %v600_v11 = vmul.f32 %v3866_v60, %v4557_v21 }
 0x721   :  { %v495_v58 = vpop.permute.xlu0 %494 }
 0x722   :  { %v497_v59 = vmul.f32 %v3864_v57, %v495_v58 }
 0x724   :  { %499 = vrot.lane.b32.xlu0 %v497_v59, %s4251_s14 }
 0x725   :  { %v603_v61 = vpop.permute.xlu1 %602 }
 0x726   :  { %v605_v62 = vmul.f32 %v3866_v60, %v603_v61 }
 0x728   :  { %607 = vrot.lane.b32.xlu1 %v605_v62, %s4251_s14 }
 0x796   :  { %v500_v0 = vpop.permute.xlu0 %499 }
 0x797   :  { %v4618_v5 = vadd.f32 %v500_v0, %v492_v63 }
 0x799   :  { %3867 = vtanh.f32 %v4618_v5 }
 0x79a   :  { %v608_v12 = vpop.permute.xlu1 %607 }
 0x79b   :  { %v4622_v13 = vadd.f32 %v608_v12, %v600_v11 }
 0x79d   :  { %3869 = vtanh.f32 %v4622_v13 }
 0x7a6   :  { %v3868_v15 = vpop.eup %3867 }
 0x7a7   :  { %505 = vrot.lane.b32.xlu0 %v3868_v15, %s4252_s17 }
 0x7aa   :  { %v3870_v16 = vpop.eup %3869 }
 0x7ab   :  { %613 = vrot.lane.b32.xlu1 %v3870_v16, %s4252_s17 }
 0x819   :  { %v506_v17 = vpop.permute.xlu0 %505 }
 0x81a   :  { %v4627_v18 = vmul.f32 %v3864_v57, %v506_v17 }
 0x81c   :  { %621 = vrot.lane.b32.xlu1 %v4627_v18, %s4252_s17 }
 0x81d   :  { %v614_v19 = vpop.permute.xlu1 %613 }
 0x81e   :  { %v616_v20 = vmul.f32 %v3866_v60, %v614_v19  ;;  %v3292_v19 = vld [vmem:[%s6307_s0 + $0x20] sm:$0xff] }
 0x820   :  { %618 = vrot.lane.b32.xlu0 %v616_v20, %s4251_s14 }
 0x824   :  { %729 = vrot.lane.b32.xlu0 %v616_v20, %s4252_s17 }
 0x88e   :  { %v622_v21 = vpop.permute.xlu1 %621 }
 0x892   :  { %v619_v22 = vpop.permute.xlu0 %618 }
 0x893   :  { %v624_v23 = vsel %vm70_vm1, %v619_v22, %v622_v21 }
 0x894   :  { %3610 = vmatmul.mubr.msk.f32.vlgmr.msra.gmra.mxu1 %vm78_vm2, %v624_v23 }
 0x895   :  { %3632 = vmatpush3.msra.mxu1 %v4435_v29  ;;  %3647 = vmatprep.mubr.msk.f32.mxu1 %vm4250_vm0, %v4249_v1 }
 0x896   :  { %v730_v26 = vpop.permute.xlu0 %729  ;;  %3633 = vmatprep.subr.mxu1 %v4249_v1 }
 0x897   :  { %v732_v27 = vsel %vm70_vm1, %v3287_v24, %v730_v26  ;;  %3634 = vmatpush3.msra.mxu1 %v4440_v30 }
 0x898   :  { %3629 = vmatmul.mubr.msk.f32.vlgmr.msra.gmra.mxu0 %vm78_vm2, %v732_v27  ;;  %3635 = vmatprep.subr.mxu1 %v4249_v1 }
 0x899   :  { %3636 = vmatpush3.msra.mxu1 %v4447_v31  ;;  %3651 = vmatpush3.msra.mxu0 %v4335_v2 }
 0x89a   :  { %3637 = vmatprep.subr.mxu1 %v4249_v1  ;;  %3652 = vmatprep.subr.mxu0 %v4249_v1 }
 0x89b   :  { %3638 = vmatpush3.msra.mxu1 %v4454_v32  ;;  %3653 = vmatpush3.msra.mxu0 %v4340_v3 }
 0x89c   :  { %3639 = vmatprep.subr.mxu1 %v4249_v1  ;;  %3654 = vmatprep.subr.mxu0 %v4249_v1 }
 0x89d   :  { %3640 = vmatpush3.msra.mxu1 %v4462_v34  ;;  %3655 = vmatpush3.msra.mxu0 %v4350_v4 }
 0x89e   :  { %3641 = vmatprep.subr.mxu1 %v4249_v1  ;;  %3656 = vmatprep.subr.mxu0 %v4249_v1 }
 0x89f   :  { %3642 = vmatpush3.msra.mxu1 %v4472_v36  ;;  %3657 = vmatpush3.msra.mxu0 %v4363_v6 }
 0x8a0   :  { %3643 = vmatprep.subr.mxu1 %v4249_v1  ;;  %3658 = vmatprep.subr.mxu0 %v4249_v1 }
 0x8a1   :  { %3644 = vmatpush3.msra.mxu1 %v4480_v37  ;;  %3659 = vmatpush3.msra.mxu0 %v4371_v7 }
 0x8a2   :  { %3645 = vmatprep.subr.mxu1 %v4249_v1  ;;  %3660 = vmatprep.subr.mxu0 %v4249_v1 }
 0x8a3   :  { %3646 = vmatpush3.msra.mxu1 %v4489_v38  ;;  %3661 = vmatpush3.msra.mxu0 %v4378_v8 }
 0x8a4   :  { %3662 = vmatprep.subr.mxu0 %v4249_v1  ;;  %3666 = vmatprep.mubr.msk.f32.mxu0 %vm4250_vm0, %v4249_v1 }
 0x8a5   :  { %3663 = vmatpush3.msra.mxu0 %v4385_v9  ;;  %3669 = vmatprep.subr.mxu1 %v4249_v1 }
 0x8a6   :  { %3664 = vmatprep.subr.mxu0 %v4249_v1 }
 0x8a7   :  { %3665 = vmatpush3.msra.mxu0 %v4392_v10 }
 0x8a8   :  { %3688 = vmatprep.subr.mxu0 %v4249_v1 }
 0x954   :  { %v694_v28 = vpop.f32.mrf.mxu1 }
 0x955   :  { %v695_v33 = vadd.f32 %v4541_v47, %v694_v28 }
 0x956   :  { %v3611_v35 = vpop.f32.mrf.mxu1 }
 0x957   :  { %3871 = vtanh.f32 %v695_v33  ;;  %v3286_v44 = vmul.f32 -1.442695, %v695_v33 }
 0x958   :  { %v802_v39 = vpop.f32.mrf.mxu0 }
 0x959   :  { %v803_v40 = vadd.f32 %v4424_v14, %v802_v39 }
 0x95a   :  { %v3630_v41 = vpop.f32.mrf.mxu0 }
 0x95b   :  { %3873 = vtanh.f32 %v803_v40  ;;  %v3289_v45 = vmul.f32 -1.442695, %v803_v40 }
 0x95c   :  { %3875 = vpow2.f32 %v3286_v44 }
 0x95d   :  { %3877 = vpow2.f32 %v3289_v45 }
 0x964   :  { %v3872_v42 = vpop.eup %3871 }
 0x965   :  { %707 = vrot.lane.b32.xlu1 %v3872_v42, %s4252_s17 }
 0x968   :  { %v3874_v43 = vpop.eup %3873 }
 0x969   :  { %815 = vrot.lane.b32.xlu0 %v3874_v43, %s4252_s17  ;;  %v3876_v46 = vpop.eup %3875 }
 0x96a   :  { %v701_v48 = vadd.f32 1.0, %v3876_v46  ;;  %v3878_v49 = vpop.eup %3877 }
 0x96b   :  { %v809_v50 = vadd.f32 1.0, %v3878_v49 }
 0x96c   :  { %3879 = vrcp.f32 %v701_v48 }
 0x96d   :  { %3881 = vrcp.f32 %v809_v50 }
 0x979   :  { %v3880_v51 = vpop.eup %3879 }
 0x97a   :  { %v3882_v54 = vpop.eup %3881  ;;  %v705_v57 = vmul.f32 %v3880_v51, %v4618_v5 }
 0x97b   :  { %v813_v60 = vmul.f32 %v3882_v54, %v4622_v13 }
 0x9d7   :  { %v708_v52 = vpop.permute.xlu1 %707 }
 0x9d8   :  { %v710_v53 = vmul.f32 %v3880_v51, %v708_v52 }
 0x9da   :  { %712 = vrot.lane.b32.xlu1 %v710_v53, %s4251_s14 }
 0x9db   :  { %v816_v55 = vpop.permute.xlu0 %815 }
 0x9dc   :  { %v818_v56 = vmul.f32 %v3882_v54, %v816_v55 }
 0x9de   :  { %820 = vrot.lane.b32.xlu0 %v818_v56, %s4251_s14 }
 0xa4c   :  { %v713_v58 = vpop.permute.xlu1 %712 }
 0xa4d   :  { %v4683_v59 = vadd.f32 %v713_v58, %v705_v57 }
 0xa4f   :  { %3883 = vtanh.f32 %v4683_v59 }
 0xa50   :  { %v821_v61 = vpop.permute.xlu0 %820 }
 0xa51   :  { %v4687_v62 = vadd.f32 %v821_v61, %v813_v60 }
 0xa53   :  { %3885 = vtanh.f32 %v4687_v62 }
 0xa5c   :  { %v3884_v63 = vpop.eup %3883 }
 0xa5d   :  { %718 = vrot.lane.b32.xlu1 %v3884_v63, %s4252_s17 }
 0xa60   :  { %v3886_v0 = vpop.eup %3885 }
 0xa61   :  { %826 = vrot.lane.b32.xlu0 %v3886_v0, %s4252_s17 }
 0xacf   :  { %v719_v11 = vpop.permute.xlu1 %718 }
 0xad0   :  { %v4692_v5 = vmul.f32 %v3880_v51, %v719_v11 }
 0xad2   :  { %834 = vrot.lane.b32.xlu0 %v4692_v5, %s4252_s17 }
 0xad3   :  { %v827_v12 = vpop.permute.xlu0 %826 }
 0xad4   :  { %v829_v15 = vmul.f32 %v3882_v54, %v827_v12 }
 0xad6   :  { %831 = vrot.lane.b32.xlu1 %v829_v15, %s4251_s14 }
 0xada   :  { %942 = vrot.lane.b32.xlu1 %v829_v15, %s4252_s17  ;;  %v3297_v15 = vld [vmem:[%s6307_s0 + $0x28] sm:$0xff] }
 0xb44   :  { %v835_v13 = vpop.permute.xlu0 %834 }
 0xb48   :  { %v832_v16 = vpop.permute.xlu1 %831 }
 0xb49   :  { %v837_v17 = vsel %vm70_vm1, %v832_v16, %v835_v13 }
 0xb4a   :  { %3648 = vmatmul.mubr.msk.f32.vlgmr.msra.gmra.mxu1 %vm78_vm2, %v837_v17 }
 0xb4b   :  { %3670 = vmatpush3.msra.mxu1 %v4435_v29  ;;  %3685 = vmatprep.mubr.msk.f32.mxu1 %vm4250_vm0, %v4249_v1 }
 0xb4c   :  { %v943_v20 = vpop.permute.xlu1 %942  ;;  %3671 = vmatprep.subr.mxu1 %v4249_v1 }
 0xb4d   :  { %v945_v21 = vsel %vm70_vm1, %v3292_v19, %v943_v20  ;;  %3672 = vmatpush3.msra.mxu1 %v4440_v30 }
 0xb4e   :  { %3667 = vmatmul.mubr.msk.f32.vlgmr.msra.gmra.mxu0 %vm78_vm2, %v945_v21  ;;  %3673 = vmatprep.subr.mxu1 %v4249_v1 }
 0xb4f   :  { %3674 = vmatpush3.msra.mxu1 %v4447_v31  ;;  %3689 = vmatpush3.msra.mxu0 %v4335_v2 }
 0xb50   :  { %3675 = vmatprep.subr.mxu1 %v4249_v1  ;;  %3690 = vmatprep.subr.mxu0 %v4249_v1 }
 0xb51   :  { %3676 = vmatpush3.msra.mxu1 %v4454_v32  ;;  %3691 = vmatpush3.msra.mxu0 %v4340_v3 }
 0xb52   :  { %3677 = vmatprep.subr.mxu1 %v4249_v1  ;;  %3692 = vmatprep.subr.mxu0 %v4249_v1 }
 0xb53   :  { %3678 = vmatpush3.msra.mxu1 %v4462_v34  ;;  %3693 = vmatpush3.msra.mxu0 %v4350_v4 }
 0xb54   :  { %3679 = vmatprep.subr.mxu1 %v4249_v1  ;;  %3694 = vmatprep.subr.mxu0 %v4249_v1 }
 0xb55   :  { %3680 = vmatpush3.msra.mxu1 %v4472_v36  ;;  %3695 = vmatpush3.msra.mxu0 %v4363_v6 }
 0xb56   :  { %3681 = vmatprep.subr.mxu1 %v4249_v1  ;;  %3696 = vmatprep.subr.mxu0 %v4249_v1 }
 0xb57   :  { %3682 = vmatpush3.msra.mxu1 %v4480_v37  ;;  %3697 = vmatpush3.msra.mxu0 %v4371_v7 }
 0xb58   :  { %3683 = vmatprep.subr.mxu1 %v4249_v1  ;;  %3698 = vmatprep.subr.mxu0 %v4249_v1 }
 0xb59   :  { %3684 = vmatpush3.msra.mxu1 %v4489_v38  ;;  %3699 = vmatpush3.msra.mxu0 %v4378_v8 }
 0xb5a   :  { %3700 = vmatprep.subr.mxu0 %v4249_v1  ;;  %3704 = vmatprep.mubr.msk.f32.mxu0 %vm4250_vm0, %v4249_v1 }
 0xb5b   :  { %3701 = vmatpush3.msra.mxu0 %v4385_v9  ;;  %3707 = vmatprep.subr.mxu1 %v4249_v1 }
 0xb5c   :  { %3702 = vmatprep.subr.mxu0 %v4249_v1 }
 0xb5d   :  { %3703 = vmatpush3.msra.mxu0 %v4392_v10 }
 0xb5e   :  { %3726 = vmatprep.subr.mxu0 %v4249_v1 }
 0xc0a   :  { %v907_v22 = vpop.f32.mrf.mxu1 }
 0xc0b   :  { %v908_v23 = vadd.f32 %v4541_v47, %v907_v22 }
 0xc0c   :  { %v3649_v24 = vpop.f32.mrf.mxu1 }
 0xc0d   :  { %3887 = vtanh.f32 %v908_v23  ;;  %v3291_v39 = vmul.f32 -1.442695, %v908_v23 }
 0xc0e   :  { %v1015_v26 = vpop.f32.mrf.mxu0 }
 0xc0f   :  { %v1016_v27 = vadd.f32 %v4424_v14, %v1015_v26 }
 0xc10   :  { %v3668_v28 = vpop.f32.mrf.mxu0 }
 0xc11   :  { %3889 = vtanh.f32 %v1016_v27  ;;  %v3294_v40 = vmul.f32 -1.442695, %v1016_v27 }
 0xc12   :  { %3891 = vpow2.f32 %v3291_v39 }
 0xc13   :  { %3893 = vpow2.f32 %v3294_v40 }
 0xc1a   :  { %v3888_v33 = vpop.eup %3887 }
 0xc1b   :  { %920 = vrot.lane.b32.xlu0 %v3888_v33, %s4252_s17 }
 0xc1e   :  { %v3890_v35 = vpop.eup %3889 }
 0xc1f   :  { %1028 = vrot.lane.b32.xlu1 %v3890_v35, %s4252_s17  ;;  %v3892_v41 = vpop.eup %3891 }
 0xc20   :  { %v914_v42 = vadd.f32 1.0, %v3892_v41  ;;  %v3894_v43 = vpop.eup %3893 }
 0xc21   :  { %v1022_v44 = vadd.f32 1.0, %v3894_v43 }
 0xc22   :  { %3895 = vrcp.f32 %v914_v42 }
 0xc23   :  { %3897 = vrcp.f32 %v1022_v44 }
 0xc2f   :  { %v3896_v45 = vpop.eup %3895 }
 0xc30   :  { %v3898_v49 = vpop.eup %3897  ;;  %v918_v52 = vmul.f32 %v3896_v45, %v4683_v59 }
 0xc31   :  { %v1026_v55 = vmul.f32 %v3898_v49, %v4687_v62 }
 0xc8d   :  { %v921_v46 = vpop.permute.xlu0 %920 }
 0xc8e   :  { %v923_v48 = vmul.f32 %v3896_v45, %v921_v46 }
 0xc90   :  { %925 = vrot.lane.b32.xlu0 %v923_v48, %s4251_s14 }
 0xc91   :  { %v1029_v50 = vpop.permute.xlu1 %1028 }
 0xc92   :  { %v1031_v51 = vmul.f32 %v3898_v49, %v1029_v50 }
 0xc94   :  { %1033 = vrot.lane.b32.xlu1 %v1031_v51, %s4251_s14 }
 0xd02   :  { %v926_v53 = vpop.permute.xlu0 %925 }
 0xd03   :  { %v4748_v54 = vadd.f32 %v926_v53, %v918_v52 }
 0xd05   :  { %3899 = vtanh.f32 %v4748_v54 }
 0xd06   :  { %v1034_v56 = vpop.permute.xlu1 %1033 }
 0xd07   :  { %v4752_v57 = vadd.f32 %v1034_v56, %v1026_v55 }
 0xd09   :  { %3901 = vtanh.f32 %v4752_v57 }
 0xd12   :  { %v3900_v58 = vpop.eup %3899 }
 0xd13   :  { %931 = vrot.lane.b32.xlu0 %v3900_v58, %s4252_s17 }
 0xd16   :  { %v3902_v60 = vpop.eup %3901 }
 0xd17   :  { %1039 = vrot.lane.b32.xlu1 %v3902_v60, %s4252_s17 }
 0xd85   :  { %v932_v61 = vpop.permute.xlu0 %931 }
 0xd86   :  { %v4757_v59 = vmul.f32 %v3896_v45, %v932_v61 }
 0xd88   :  { %1047 = vrot.lane.b32.xlu1 %v4757_v59, %s4252_s17 }
 0xd89   :  { %v1040_v63 = vpop.permute.xlu1 %1039 }
 0xd8a   :  { %v1042_v0 = vmul.f32 %v3898_v49, %v1040_v63  ;;  %v4890_v63 = vld [vmem:[%s6308_s4] ss:$0 sm:$0xff] }
 0xd8c   :  { %1044 = vrot.lane.b32.xlu0 %v1042_v0, %s4251_s14 }
 0xd90   :  { %1155 = vrot.lane.b32.xlu0 %v1042_v0, %s4252_s17 }
 0xdfa   :  { %v1048_v62 = vpop.permute.xlu1 %1047 }
 0xdfe   :  { %v1045_v11 = vpop.permute.xlu0 %1044 }
 0xdff   :  { %v1050_v12 = vsel %vm70_vm1, %v1045_v11, %v1048_v62 }
 0xe00   :  { %3686 = vmatmul.mubr.msk.f32.vlgmr.msra.gmra.mxu1 %vm78_vm2, %v1050_v12 }
 0xe01   :  { %3708 = vmatpush3.msra.mxu1 %v4435_v29  ;;  %3723 = vmatprep.mubr.msk.f32.mxu1 %vm4250_vm0, %v4249_v1 }
 0xe02   :  { %v1156_v13 = vpop.permute.xlu0 %1155  ;;  %3709 = vmatprep.subr.mxu1 %v4249_v1 }
 0xe03   :  { %v1158_v16 = vsel %vm70_vm1, %v3297_v15, %v1156_v13  ;;  %3710 = vmatpush3.msra.mxu1 %v4440_v30 }
 0xe04   :  { %3705 = vmatmul.mubr.msk.f32.vlgmr.msra.gmra.mxu0 %vm78_vm2, %v1158_v16  ;;  %3711 = vmatprep.subr.mxu1 %v4249_v1 }
 0xe05   :  { %3712 = vmatpush3.msra.mxu1 %v4447_v31  ;;  %3727 = vmatpush3.msra.mxu0 %v4335_v2 }
 0xe06   :  { %3713 = vmatprep.subr.mxu1 %v4249_v1  ;;  %3728 = vmatprep.subr.mxu0 %v4249_v1 }
 0xe07   :  { %3714 = vmatpush3.msra.mxu1 %v4454_v32  ;;  %3729 = vmatpush3.msra.mxu0 %v4340_v3 }
 0xe08   :  { %3715 = vmatprep.subr.mxu1 %v4249_v1  ;;  %3730 = vmatprep.subr.mxu0 %v4249_v1 }
 0xe09   :  { %3716 = vmatpush3.msra.mxu1 %v4462_v34  ;;  %3731 = vmatpush3.msra.mxu0 %v4350_v4 }
 0xe0a   :  { %3717 = vmatprep.subr.mxu1 %v4249_v1  ;;  %3732 = vmatprep.subr.mxu0 %v4249_v1 }
 0xe0b   :  { %3718 = vmatpush3.msra.mxu1 %v4472_v36  ;;  %3733 = vmatpush3.msra.mxu0 %v4363_v6 }
 0xe0c   :  { %3719 = vmatprep.subr.mxu1 %v4249_v1  ;;  %3734 = vmatprep.subr.mxu0 %v4249_v1 }
 0xe0d   :  { %3720 = vmatpush3.msra.mxu1 %v4480_v37  ;;  %3735 = vmatpush3.msra.mxu0 %v4371_v7 }
 0xe0e   :  { %3721 = vmatprep.subr.mxu1 %v4249_v1  ;;  %3736 = vmatprep.subr.mxu0 %v4249_v1 }
 0xe0f   :  { %3722 = vmatpush3.msra.mxu1 %v4489_v38  ;;  %3737 = vmatpush3.msra.mxu0 %v4378_v8 }
 0xe10   :  { %3738 = vmatprep.subr.mxu0 %v4249_v1  ;;  %3742 = vmatprep.mubr.msk.f32.mxu0 %vm4250_vm0, %v4249_v1 }
 0xe11   :  { %3739 = vmatpush3.msra.mxu0 %v4385_v9  ;;  %3745 = vmatprep.subr.mxu1 %v4249_v1 }
 0xe12   :  { %3740 = vmatprep.subr.mxu0 %v4249_v1 }
 0xe13   :  { %3741 = vmatpush3.msra.mxu0 %v4392_v10 }
 0xe14   :  { %3764 = vmatprep.subr.mxu0 %v4249_v1 }
 0xec0   :  { %v1120_v2 = vpop.f32.mrf.mxu1 }
 0xec1   :  { %v1121_v3 = vadd.f32 %v4541_v47, %v1120_v2 }
 0xec2   :  { %v3687_v4 = vpop.f32.mrf.mxu1 }
 0xec3   :  { %3903 = vtanh.f32 %v1121_v3  ;;  %v3296_v19 = vmul.f32 -1.442695, %v1121_v3 }
 0xec4   :  { %v1228_v6 = vpop.f32.mrf.mxu0 }
 0xec5   :  { %v1229_v7 = vadd.f32 %v4424_v14, %v1228_v6 }
 0xec6   :  { %v3706_v8 = vpop.f32.mrf.mxu0 }
 0xec7   :  { %3905 = vtanh.f32 %v1229_v7  ;;  %v3299_v10 = vmul.f32 -1.442695, %v1229_v7 }
 0xec8   :  { %3907 = vpow2.f32 %v3296_v19 }
 0xec9   :  { %3909 = vpow2.f32 %v3299_v10 }
 0xed0   :  { %v3904_v17 = vpop.eup %3903 }
 0xed1   :  { %1133 = vrot.lane.b32.xlu1 %v3904_v17, %s4252_s17 }
 0xed4   :  { %v3906_v9 = vpop.eup %3905 }
 0xed5   :  { %1241 = vrot.lane.b32.xlu0 %v3906_v9, %s4252_s17  ;;  %v3908_v20 = vpop.eup %3907 }
 0xed6   :  { %v1127_v21 = vadd.f32 1.0, %v3908_v20  ;;  %v3910_v22 = vpop.eup %3909 }
 0xed7   :  { %v1235_v23 = vadd.f32 1.0, %v3910_v22 }
 0xed8   :  { %3911 = vrcp.f32 %v1127_v21 }
 0xed9   :  { %3913 = vrcp.f32 %v1235_v23 }
 0xee5   :  { %v3912_v24 = vpop.eup %3911 }
 0xee6   :  { %v3914_v27 = vpop.eup %3913  ;;  %v1131_v35 = vmul.f32 %v3912_v24, %v4748_v54  ;;  %v3302_v54 = vld [vmem:[%s6307_s0 + $0x30] sm:$0xff] }
 0xee7   :  { %v1239_v41 = vmul.f32 %v3914_v27, %v4752_v57 }
 0xf43   :  { %v1134_v14 = vpop.permute.xlu1 %1133 }
 0xf44   :  { %v1136_v26 = vmul.f32 %v3912_v24, %v1134_v14 }
 0xf46   :  { %1138 = vrot.lane.b32.xlu1 %v1136_v26, %s4251_s14 }
 0xf47   :  { %v1242_v28 = vpop.permute.xlu0 %1241 }
 0xf48   :  { %v1244_v33 = vmul.f32 %v3914_v27, %v1242_v28 }
 0xf4a   :  { %1246 = vrot.lane.b32.xlu0 %v1244_v33, %s4251_s14 }
 0xfb8   :  { %v1139_v39 = vpop.permute.xlu1 %1138 }
 0xfb9   :  { %v4813_v40 = vadd.f32 %v1139_v39, %v1131_v35 }
 0xfbb   :  { %3915 = vtanh.f32 %v4813_v40 }
 0xfbc   :  { %v1247_v42 = vpop.permute.xlu0 %1246 }
 0xfbd   :  { %v4817_v43 = vadd.f32 %v1247_v42, %v1239_v41  ;;  %v3307_v41 = vld [vmem:[%s6307_s0 + $0x38] sm:$0xff] }
 0xfbe   :  { %v4240_v42 = vld [vmem:[%s6309_s5 + $0x38] sm:$0xff] }
 0xfbf   :  { %3917 = vtanh.f32 %v4817_v43 }
 0xfc8   :  { %v3916_v44 = vpop.eup %3915 }
 0xfc9   :  { %1144 = vrot.lane.b32.xlu1 %v3916_v44, %s4252_s17 }
 0xfcc   :  { %v3918_v45 = vpop.eup %3917 }
 0xfcd   :  { %1252 = vrot.lane.b32.xlu0 %v3918_v45, %s4252_s17  ;;  %v4241_v45 = vld [vmem:[%s6309_s5 + $0x30] sm:$0xff] }
0x103b   :  { %v1145_v46 = vpop.permute.xlu1 %1144 }
0x103c   :  { %v4822_v48 = vmul.f32 %v3912_v24, %v1145_v46  ;;  %v4242_v46 = vld [vmem:[%s6309_s5 + $0x28] sm:$0xff] }
0x103e   :  { %1260 = vrot.lane.b32.xlu0 %v4822_v48, %s4252_s17 }
0x103f   :  { %v1253_v49 = vpop.permute.xlu0 %1252 }
0x1040   :  { %v1255_v50 = vmul.f32 %v3914_v27, %v1253_v49  ;;  %v4243_v49 = vld [vmem:[%s6309_s5 + $0x20] sm:$0xff] }
0x1042   :  { %1257 = vrot.lane.b32.xlu1 %v1255_v50, %s4251_s14 }
0x1046   :  { %1368 = vrot.lane.b32.xlu1 %v1255_v50, %s4252_s17  ;;  %v4244_v50 = vld [vmem:[%s6309_s5 + $0x18] sm:$0xff] }
0x10b0   :  { %v1261_v51 = vpop.permute.xlu0 %1260 }
0x10b4   :  { %v1258_v52 = vpop.permute.xlu1 %1257 }
0x10b5   :  { %v1263_v53 = vsel %vm70_vm1, %v1258_v52, %v1261_v51  ;;  %v4245_v51 = vld [vmem:[%s6309_s5 + $0x10] sm:$0xff]  ;;  %v4246_v52 = vld [vmem:[%s6309_s5 + $0x8] sm:$0xff] }
0x10b6   :  { %3724 = vmatmul.mubr.msk.f32.vlgmr.msra.gmra.mxu1 %vm78_vm2, %v1263_v53  ;;  %v4247_v53 = vld [vmem:[%s6309_s5] sm:$0xff] }
0x10b7   :  { %3746 = vmatpush3.msra.mxu1 %v4435_v29  ;;  %3761 = vmatprep.mubr.msk.f32.mxu1 %vm4250_vm0, %v4249_v1  ;;  %v4231_v29 = vld [vmem:[%s6305_s3 + $0x38] sm:$0xff] }
0x10b8   :  { %v1369_v55 = vpop.permute.xlu1 %1368  ;;  %3747 = vmatprep.subr.mxu1 %v4249_v1 }
0x10b9   :  { %v1371_v56 = vsel %vm70_vm1, %v3302_v54, %v1369_v55  ;;  %3748 = vmatpush3.msra.mxu1 %v4440_v30  ;;  %v4232_v30 = vld [vmem:[%s6305_s3 + $0x30] sm:$0xff]  ;;  %v4248_v55 = vld [vmem:[%s6310_s6] ss:$0 sm:$0xff] }
0x10ba   :  { %3743 = vmatmul.mubr.msk.f32.vlgmr.msra.gmra.mxu0 %vm78_vm2, %v1371_v56  ;;  %3749 = vmatprep.subr.mxu1 %v4249_v1 }
0x10bb   :  { %3750 = vmatpush3.msra.mxu1 %v4447_v31  ;;  %3765 = vmatpush3.msra.mxu0 %v4231_v29  ;;  %v4233_v31 = vld [vmem:[%s6305_s3 + $0x28] sm:$0xff] }
0x10bc   :  { %3751 = vmatprep.subr.mxu1 %v4249_v1  ;;  %3766 = vmatprep.subr.mxu0 %v4249_v1 }
0x10bd   :  { %3752 = vmatpush3.msra.mxu1 %v4454_v32  ;;  %3767 = vmatpush3.msra.mxu0 %v4232_v30  ;;  %v4234_v32 = vld [vmem:[%s6305_s3 + $0x20] sm:$0xff] }
0x10be   :  { %3753 = vmatprep.subr.mxu1 %v4249_v1  ;;  %3768 = vmatprep.subr.mxu0 %v4249_v1 }
0x10bf   :  { %3754 = vmatpush3.msra.mxu1 %v4462_v34  ;;  %3769 = vmatpush3.msra.mxu0 %v4233_v31  ;;  %v4235_v34 = vld [vmem:[%s6305_s3 + $0x18] sm:$0xff] }
0x10c0   :  { %3755 = vmatprep.subr.mxu1 %v4249_v1  ;;  %3770 = vmatprep.subr.mxu0 %v4249_v1 }
0x10c1   :  { %3756 = vmatpush3.msra.mxu1 %v4472_v36  ;;  %3771 = vmatpush3.msra.mxu0 %v4234_v32  ;;  %v4236_v36 = vld [vmem:[%s6305_s3 + $0x10] sm:$0xff] }
0x10c2   :  { %3757 = vmatprep.subr.mxu1 %v4249_v1  ;;  %3772 = vmatprep.subr.mxu0 %v4249_v1 }
0x10c3   :  { %3758 = vmatpush3.msra.mxu1 %v4480_v37  ;;  %3773 = vmatpush3.msra.mxu0 %v4235_v34  ;;  %v4237_v37 = vld [vmem:[%s6305_s3 + $0x8] sm:$0xff] }
0x10c4   :  { %3759 = vmatprep.subr.mxu1 %v4249_v1  ;;  %3774 = vmatprep.subr.mxu0 %v4249_v1 }
0x10c5   :  { %3760 = vmatpush3.msra.mxu1 %v4489_v38  ;;  %3775 = vmatpush3.msra.mxu0 %v4236_v36  ;;  %v4238_v38 = vld [vmem:[%s6305_s3] sm:$0xff] }
0x10c6   :  { %3776 = vmatprep.subr.mxu0 %v4249_v1  ;;  %3780 = vmatprep.mubr.msk.f32.mxu0 %vm4250_vm0, %v4249_v1 }
0x10c7   :  { %3777 = vmatpush3.msra.mxu0 %v4237_v37  ;;  %3783 = vmatprep.subr.mxu1 %v4249_v1 }
0x10c8   :  { %3778 = vmatprep.subr.mxu0 %v4249_v1 }
0x10c9   :  { %3779 = vmatpush3.msra.mxu0 %v4238_v38 }
0x1176   :  { %v1333_v57 = vpop.f32.mrf.mxu1 }
0x1177   :  { %v1334_v58 = vadd.f32 %v4541_v47, %v1333_v57 }
0x1178   :  { %v3725_v60 = vpop.f32.mrf.mxu1 }
0x1179   :  { %3919 = vtanh.f32 %v1334_v58  ;;  %v3301_v15 = vmul.f32 -1.442695, %v1334_v58 }
0x117a   :  { %v1441_v61 = vpop.f32.mrf.mxu0 }
0x117b   :  { %v1442_v0 = vadd.f32 %v4890_v63, %v1441_v61 }
0x117c   :  { %v3744_v62 = vpop.f32.mrf.mxu0 }
0x117d   :  { %3921 = vtanh.f32 %v1442_v0  ;;  %v3304_v47 = vmul.f32 -1.442695, %v1442_v0 }
0x117e   :  { %3923 = vpow2.f32 %v3301_v15 }
0x117f   :  { %3925 = vpow2.f32 %v3304_v47 }
0x1186   :  { %v3920_v11 = vpop.eup %3919 }
0x1187   :  { %1346 = vrot.lane.b32.xlu0 %v3920_v11, %s4252_s17 }
0x118a   :  { %v3922_v12 = vpop.eup %3921 }
0x118b   :  { %1454 = vrot.lane.b32.xlu1 %v3922_v12, %s4252_s17  ;;  %v3924_v13 = vpop.eup %3923 }
0x118c   :  { %v1340_v16 = vadd.f32 1.0, %v3924_v13  ;;  %v3926_v2 = vpop.eup %3925 }
0x118d   :  { %v1448_v3 = vadd.f32 1.0, %v3926_v2 }
0x118e   :  { %3927 = vrcp.f32 %v1340_v16 }
0x118f   :  { %3929 = vrcp.f32 %v1448_v3 }
0x119b   :  { %v3928_v4 = vpop.eup %3927 }
0x119c   :  { %v3930_v8 = vpop.eup %3929  ;;  %v1344_v19 = vmul.f32 %v3928_v4, %v4813_v40 }
0x119d   :  { %v1452_v21 = vmul.f32 %v3930_v8, %v4817_v43 }
0x11f9   :  { %v1347_v6 = vpop.permute.xlu0 %1346 }
0x11fa   :  { %v1349_v7 = vmul.f32 %v3928_v4, %v1347_v6 }
0x11fc   :  { %1351 = vrot.lane.b32.xlu0 %v1349_v7, %s4251_s14 }
0x11fd   :  { %v1455_v17 = vpop.permute.xlu1 %1454 }
0x11fe   :  { %v1457_v9 = vmul.f32 %v3930_v8, %v1455_v17 }
0x1200   :  { %1459 = vrot.lane.b32.xlu1 %v1457_v9, %s4251_s14 }
0x126e   :  { %v1352_v10 = vpop.permute.xlu0 %1351 }
0x126f   :  { %v4898_v20 = vadd.f32 %v1352_v10, %v1344_v19 }
0x1271   :  { %3931 = vtanh.f32 %v4898_v20 }
0x1272   :  { %v1460_v22 = vpop.permute.xlu1 %1459 }
0x1273   :  { %v4902_v23 = vadd.f32 %v1460_v22, %v1452_v21 }
0x1275   :  { %3933 = vtanh.f32 %v4902_v23 }
0x127e   :  { %v3932_v24 = vpop.eup %3931 }
0x127f   :  { %1357 = vrot.lane.b32.xlu0 %v3932_v24, %s4252_s17 }
0x1282   :  { %v3934_v14 = vpop.eup %3933 }
0x1283   :  { %1465 = vrot.lane.b32.xlu1 %v3934_v14, %s4252_s17 }
0x12f1   :  { %v1358_v26 = vpop.permute.xlu0 %1357 }
0x12f2   :  { %v4907_v27 = vmul.f32 %v3928_v4, %v1358_v26 }
0x12f4   :  { %1473 = vrot.lane.b32.xlu1 %v4907_v27, %s4252_s17 }
0x12f5   :  { %v1466_v28 = vpop.permute.xlu1 %1465 }
0x12f6   :  { %v1468_v33 = vmul.f32 %v3930_v8, %v1466_v28 }
0x12f8   :  { %1470 = vrot.lane.b32.xlu0 %v1468_v33, %s4251_s14 }
0x12fc   :  { %1581 = vrot.lane.b32.xlu0 %v1468_v33, %s4252_s17 }
0x1366   :  { %v1474_v35 = vpop.permute.xlu1 %1473 }
0x136a   :  { %v1471_v39 = vpop.permute.xlu0 %1470 }
0x136b   :  { %v1476_v40 = vsel %vm70_vm1, %v1471_v39, %v1474_v35  ;;  %v1821_v35 = vld [vmem:[%s6312_s7 + $0x38] sm:$0xff]  ;;  %v1820_v39 = vld [vmem:[%s6312_s7 + $0x30] sm:$0xff] }
0x136c   :  { %3762 = vmatmul.mubr.msk.f32.vlgmr.msra.gmra.mxu1 %vm78_vm2, %v1476_v40  ;;  %1882 = vmatprep.subr.mxu0 %v1821_v35  ;;  %v1819_v40 = vld [vmem:[%s6312_s7 + $0x28] sm:$0xff] }
0x136d   :  { %3784 = vmatpush3.msra.mxu1 %v4240_v42  ;;  %3799 = vmatprep.mubr.msk.f32.mxu1 %vm4250_vm0, %v4249_v1  ;;  %v1817_v42 = vld [vmem:[%s6312_s7 + $0x18] sm:$0xff] }
0x136e   :  { %v1582_v43 = vpop.permute.xlu0 %1581  ;;  %3785 = vmatprep.subr.mxu1 %v4249_v1 }
0x136f   :  { %v1584_v44 = vsel %vm70_vm1, %v3307_v41, %v1582_v43  ;;  %3786 = vmatpush3.msra.mxu1 %v4241_v45  ;;  %v1818_v41 = vld [vmem:[%s6312_s7 + $0x20] sm:$0xff]  ;;  %v1816_v43 = vld [vmem:[%s6312_s7 + $0x10] sm:$0xff] }
0x1370   :  { %3781 = vmatmul.mubr.msk.f32.vlgmr.msra.gmra.mxu0 %vm78_vm2, %v1584_v44  ;;  %3787 = vmatprep.subr.mxu1 %v4249_v1  ;;  %v1815_v44 = vld [vmem:[%s6312_s7 + $0x8] sm:$0xff]  ;;  %v1814_v45 = vld [vmem:[%s6312_s7] sm:$0xff] }
0x1371   :  { %3788 = vmatpush3.msra.mxu1 %v4242_v46  ;;  %1922 = vmatprep.mubr.f32.mxu0 %v4249_v1 }
0x1372   :  { %3789 = vmatprep.subr.mxu1 %v4249_v1  ;;  %1883 = vmatpush1.msra.mxu0 %v1820_v39 }
0x1373   :  { %3790 = vmatpush3.msra.mxu1 %v4243_v49  ;;  %1884 = vmatprep.subr.mxu0 %v1819_v40 }
0x1374   :  { %3791 = vmatprep.subr.mxu1 %v4249_v1  ;;  %1885 = vmatpush1.msra.mxu0 %v1818_v41 }
0x1375   :  { %3792 = vmatpush3.msra.mxu1 %v4244_v50  ;;  %1886 = vmatprep.subr.mxu0 %v1817_v42 }
0x1376   :  { %3793 = vmatprep.subr.mxu1 %v4249_v1  ;;  %1887 = vmatpush1.msra.mxu0 %v1816_v43 }
0x1377   :  { %3794 = vmatpush3.msra.mxu1 %v4245_v51  ;;  %1888 = vmatprep.subr.mxu0 %v1815_v44 }
0x1378   :  { %3795 = vmatprep.subr.mxu1 %v4249_v1  ;;  %1889 = vmatpush1.msra.mxu0 %v1814_v45 }
0x1379   :  { %3796 = vmatpush3.msra.mxu1 %v4246_v52 }
0x137a   :  { %3797 = vmatprep.subr.mxu1 %v4249_v1 }
0x137b   :  { %3798 = vmatpush3.msra.mxu1 %v4247_v53 }
0x142c   :  { %v1546_v54 = vpop.f32.mrf.mxu1 }
0x142d   :  { %v1547_v56 = vadd.f32 %v4248_v55, %v1546_v54 }
0x142e   :  { %v3763_v29 = vpop.f32.mrf.mxu1 }
0x142f   :  { %3935 = vtanh.f32 %v1547_v56  ;;  %v3306_v37 = vmul.f32 -1.442695, %v1547_v56  ;;  %v1824_v29 = vlaneseq }
0x1430   :  { %v1654_v30 = vpop.f32.mrf.mxu0 }
0x1431   :  { %v1655_v31 = vadd.f32 %v4890_v63, %v1654_v30  ;;  %v5027_v30 = vshrl.u32 %v1824_v29, 7 }
0x1432   :  { %v3782_v32 = vpop.f32.mrf.mxu0 }
0x1433   :  { %3937 = vtanh.f32 %v1655_v31  ;;  %v3309_v38 = vmul.f32 -1.442695, %v1655_v31  ;;  %v1830_v31 = vsub.s32 1, %v5027_v30  ;;  %v1822_v32 = vld [vmem:[%s6313_s8] sm:$0x3] }
0x1434   :  { %3939 = vpow2.f32 %v3306_v37  ;;  %v2127_v37 = vld [vmem:[%s6314_s9 + $0x18] sm:$0xff] }
0x1435   :  { %3941 = vpow2.f32 %v3309_v38  ;;  %v2126_v38 = vld [vmem:[%s6314_s9 + $0x10] sm:$0xff] }
0x143c   :  { %v3936_v34 = vpop.eup %3935 }
0x143d   :  { %1559 = vrot.lane.b32.xlu1 %v3936_v34, %s4252_s17  ;;  %v5035_v34 = vrot.slane %v1822_v32, %v1830_v31 }
0x1440   :  { %v3938_v36 = vpop.eup %3937 }
0x1441   :  { %1667 = vrot.lane.b32.xlu0 %v3938_v36, %s4252_s17  ;;  %v3940_v57 = vpop.eup %3939  ;;  %v2128_v36 = vld [vmem:[%s6314_s9 + $0x20] sm:$0xff] }
0x1442   :  { %v1553_v58 = vadd.f32 1.0, %v3940_v57  ;;  %v3942_v60 = vpop.eup %3941  ;;  %v2125_v57 = vld [vmem:[%s6314_s9 + $0x8] sm:$0xff] }
0x1443   :  { %v1661_v61 = vadd.f32 1.0, %v3942_v60 }
0x1444   :  { %3943 = vrcp.f32 %v1553_v58  ;;  %v2124_v58 = vld [vmem:[%s6314_s9] sm:$0xff] }
0x1445   :  { %3945 = vrcp.f32 %v1661_v61 }
0x1451   :  { %v3944_v0 = vpop.eup %3943 }
0x1452   :  { %v3946_v11 = vpop.eup %3945  ;;  %v1557_v47 = vmul.f32 %v3944_v0, %v4898_v20 }
0x1453   :  { %v1665_v2 = vmul.f32 %v3946_v11, %v4902_v23 }
0x14af   :  { %v1560_v63 = vpop.permute.xlu1 %1559 }
0x14b0   :  { %v1562_v62 = vmul.f32 %v3944_v0, %v1560_v63 }
0x14b2   :  { %1564 = vrot.lane.b32.xlu1 %v1562_v62, %s4251_s14 }
0x14b3   :  { %v1668_v12 = vpop.permute.xlu0 %1667 }
0x14b4   :  { %v1670_v15 = vmul.f32 %v3946_v11, %v1668_v12 }
0x14b6   :  { %1672 = vrot.lane.b32.xlu0 %v1670_v15, %s4251_s14 }
0x1524   :  { %v1565_v13 = vpop.permute.xlu1 %1564 }
0x1525   :  { %v1567_v16 = vadd.f32 %v1565_v13, %v1557_v47 }
0x1527   :  { %3947 = vtanh.f32 %v1567_v16 }
0x1528   :  { %v1673_v3 = vpop.permute.xlu0 %1672 }
0x1529   :  { %v4964_v4 = vadd.f32 %v1673_v3, %v1665_v2  ;;  %v1826_v2 = vsub.s32 0, %v5027_v30 }
0x152b   :  { %3949 = vtanh.f32 %v4964_v4  ;;  %v5080_v3 = vrot.slane %v1822_v32, %v1826_v2 }
0x1534   :  { %v3948_v6 = vpop.eup %3947 }
0x1535   :  { %1570 = vrot.lane.b32.xlu1 %v3948_v6, %s4252_s17 }
0x1538   :  { %v3950_v7 = vpop.eup %3949 }
0x1539   :  { %1678 = vrot.lane.b32.xlu0 %v3950_v7, %s4252_s17 }
0x15a7   :  { %v1571_v8 = vpop.permute.xlu1 %1570 }
0x15a8   :  { %v1573_v17 = vmul.f32 %v3944_v0, %v1571_v8 }
0x15aa   :  { %1686 = vrot.lane.b32.xlu0 %v1573_v17, %s4252_s17 }
0x15ab   :  { %v1679_v9 = vpop.permute.xlu0 %1678 }
0x15ac   :  { %v1681_v19 = vmul.f32 %v3946_v11, %v1679_v9 }
0x15ae   :  { %1683 = vrot.lane.b32.xlu1 %v1681_v19, %s4251_s14 }
0x161c   :  { %v1687_v10 = vpop.permute.xlu0 %1686 }
0x1620   :  { %v1684_v20 = vpop.permute.xlu1 %1683 }
0x1621   :  { %v1689_v21 = vsel %vm70_vm1, %v1684_v20, %v1687_v10  ;;  %1792 = vst.msk [vmem:[%s6311_s12] sm:$0xff] %vm70_vm1, %v1684_v20 }
0x1622   :  { %3800 = vmatmul.mubr.msk.f32.vlgmr.msra.gmra.mxu1 %vm78_vm2, %v1689_v21 }
0x1623   :  { %2344 = vmatprep.mubr.f32.mxu1 %v4249_v1 }
0x16e2   :  { %v1759_v22 = vpop.f32.mrf.mxu1 }
0x16e3   :  { %v1760_v23 = vadd.f32 %v4248_v55, %v1759_v22 }
0x16e4   :  { %v3801_v24 = vpop.f32.mrf.mxu1 }
0x16e5   :  { %3951 = vtanh.f32 %v1760_v23  ;;  %v3311_v26 = vmul.f32 -1.442695, %v1760_v23 }
0x16e7   :  { %3953 = vpow2.f32 %v3311_v26 }
0x16f2   :  { %v3952_v14 = vpop.eup %3951 }
0x16f3   :  { %1772 = vrot.lane.b32.xlu1 %v3952_v14, %s4252_s17 }
0x16f4   :  { %v3954_v28 = vpop.eup %3953 }
0x16f5   :  { %v1766_v33 = vadd.f32 1.0, %v3954_v28 }
0x16f7   :  { %3955 = vrcp.f32 %v1766_v33 }
0x1704   :  { %v3956_v46 = vpop.eup %3955 }
0x1705   :  { %v1770_v51 = vmul.f32 %v3956_v46, %v1567_v16 }
0x1765   :  { %v1773_v49 = vpop.permute.xlu1 %1772 }
0x1766   :  { %v1775_v50 = vmul.f32 %v3956_v46, %v1773_v49 }
0x1768   :  { %1777 = vrot.lane.b32.xlu0 %v1775_v50, %s4251_s14 }
0x176c   :  { %297 = vrot.lane.b32.xlu0 %v4562_v25, %s4251_s14 }
0x1770   :  { %723 = vrot.lane.b32.xlu0 %v4692_v5, %s4251_s14 }
0x1774   :  { %1149 = vrot.lane.b32.xlu0 %v4822_v48, %s4251_s14 }
0x1778   :  { %1575 = vrot.lane.b32.xlu0 %v1573_v17, %s4251_s14 }
0x17da   :  { %v1778_v52 = vpop.permute.xlu0 %1777 }
0x17db   :  { %v5011_v53 = vadd.f32 %v1778_v52, %v1770_v51 }
0x17dd   :  { %3957 = vtanh.f32 %v5011_v53 }
0x17de   :  { %v298_v54 = vpop.permute.xlu0 %297 }
0x17df   :  { %300 = vst.msk [vmem:[#allocation2] sm:$0xff] %vm70_vm1, %v298_v54 }
0x17e2   :  { %v724_v55 = vpop.permute.xlu0 %723 }
0x17e3   :  { %726 = vst.msk [vmem:[#allocation2 + $0x10] sm:$0xff] %vm70_vm1, %v724_v55 }
0x17e6   :  { %v1150_v25 = vpop.permute.xlu0 %1149  ;;  %v1806_v56 = vld [vmem:[#allocation2] sm:$0xff] }
0x17e7   :  { %1152 = vst.msk [vmem:[#allocation2 + $0x20] sm:$0xff] %vm70_vm1, %v1150_v25  ;;  %3314 = vmatmul.mubr.msk.f32.vlgmr.msra.gmra.mxu0 %vm70_vm1, %v1806_v56 }
0x17e8   :  { %1928 = vmatprep.mubr.f32.mxu0 %v4249_v1 }
0x17ea   :  { %v3958_v5 = vpop.eup %3957  ;;  %v1576_v48 = vpop.permute.xlu0 %1575  ;;  %v1808_v12 = vld [vmem:[#allocation2 + $0x10] sm:$0xff] }
0x17eb   :  { %1578 = vst.msk [vmem:[#allocation2 + $0x30] sm:$0xff] %vm70_vm1, %v1576_v48  ;;  %1783 = vrot.lane.b32.xlu1 %v3958_v5, %s4252_s17 }
0x17ee   :  { %v1810_v47 = vld [vmem:[#allocation2 + $0x20] sm:$0xff] }
0x17ef   :  { %510 = vrot.lane.b32.xlu1 %v4627_v18, %s4251_s14  ;;  %v2131_v18 = vld [vmem:[%s6314_s9 + $0x38] sm:$0xff] }
0x17f0   :  { %2232 = vmatprep.subr.mxu0 %v2131_v18  ;;  %3802 = vmatprep.subr.mxu1 %v2131_v18 }
0x17f2   :  { %v1812_v16 = vld [vmem:[#allocation2 + $0x30] sm:$0xff] }
0x17f3   :  { %936 = vrot.lane.b32.xlu1 %v4757_v59, %s4251_s14  ;;  %v2130_v59 = vld [vmem:[%s6314_s9 + $0x30] sm:$0xff] }
0x17f4   :  { %2233 = vmatpush1.msra.mxu0 %v2130_v59  ;;  %3806 = vmatpush1.msra.mxu1 %v2130_v59 }
0x17f7   :  { %1362 = vrot.lane.b32.xlu1 %v4907_v27, %s4251_s14  ;;  %v2129_v27 = vld [vmem:[%s6314_s9 + $0x28] sm:$0xff] }
0x17f8   :  { %2234 = vmatprep.subr.mxu0 %v2129_v27  ;;  %3803 = vmatprep.subr.mxu1 %v2129_v27 }
0x17f9   :  { %2235 = vmatpush1.msra.mxu0 %v2128_v36  ;;  %3807 = vmatpush1.msra.mxu1 %v2128_v36 }
0x17fa   :  { %2236 = vmatprep.subr.mxu0 %v2127_v37  ;;  %3804 = vmatprep.subr.mxu1 %v2127_v37 }
0x17fb   :  { %2237 = vmatpush1.msra.mxu0 %v2126_v38  ;;  %3808 = vmatpush1.msra.mxu1 %v2126_v38 }
0x17fc   :  { %2238 = vmatprep.subr.mxu0 %v2125_v57  ;;  %3805 = vmatprep.subr.mxu1 %v2125_v57 }
0x17fd   :  { %2239 = vmatpush1.msra.mxu0 %v2124_v58  ;;  %3809 = vmatpush1.msra.mxu1 %v2124_v58 }
0x185d   :  { %v1784_v60 = vpop.permute.xlu1 %1783 }
0x185e   :  { %v1786_v61 = vmul.f32 %v3956_v46, %v1784_v60 }
0x1860   :  { %1788 = vrot.lane.b32.xlu1 %v1786_v61, %s4251_s14 }
0x1861   :  { %v511_v0 = vpop.permute.xlu1 %510 }
0x1862   :  { %513 = vst.msk [vmem:[#allocation2 + $0x8] sm:$0xff] %vm70_vm1, %v511_v0 }
0x1865   :  { %v937_v63 = vpop.permute.xlu1 %936 }
0x1866   :  { %939 = vst.msk [vmem:[#allocation2 + $0x18] sm:$0xff] %vm70_vm1, %v937_v63 }
0x1869   :  { %v1363_v62 = vpop.permute.xlu1 %1362  ;;  %v1807_v11 = vld [vmem:[#allocation2 + $0x8] sm:$0xff] }
0x186a   :  { %1365 = vst.msk [vmem:[#allocation2 + $0x28] sm:$0xff] %vm70_vm1, %v1363_v62  ;;  %3315 = vmatmul.mubr.msk.f32.gmra.mxu0 %vm70_vm1, %v1807_v11 }
0x186b   :  { %1934 = vmatprep.mubr.f32.mxu0 %v4249_v1 }
0x186d   :  { %v1809_v15 = vld [vmem:[#allocation2 + $0x18] sm:$0xff] }
0x186e   :  { %3316 = vmatmul.mubr.msk.f32.gmra.mxu0 %vm70_vm1, %v1808_v12 }
0x186f   :  { %1940 = vmatprep.mubr.f32.mxu0 %v4249_v1 }
0x1871   :  { %v1811_v13 = vld [vmem:[#allocation2 + $0x28] sm:$0xff] }
0x1872   :  { %3317 = vmatmul.mubr.msk.f32.gmra.mxu0 %vm70_vm1, %v1809_v15 }
0x1873   :  { %1946 = vmatprep.mubr.f32.mxu0 %v4249_v1 }
0x1876   :  { %3318 = vmatmul.mubr.msk.f32.gmra.mxu0 %vm70_vm1, %v1810_v47 }
0x1877   :  { %1952 = vmatprep.mubr.f32.mxu0 %v4249_v1 }
0x187a   :  { %3319 = vmatmul.mubr.msk.f32.gmra.mxu0 %vm70_vm1, %v1811_v13 }
0x187b   :  { %1958 = vmatprep.mubr.f32.mxu0 %v4249_v1 }
0x187e   :  { %3320 = vmatmul.mubr.msk.f32.gmra.mxu0 %vm70_vm1, %v1812_v16 }
0x187f   :  { %1964 = vmatprep.mubr.f32.mxu0 %v4249_v1 }
0x18a7   :  { %v1924_v6 = vpop.f32.mrf.mxu0 }
0x18a8   :  { %v1925_v7 = vadd.f32 %v1924_v6, %v5080_v3 }
0x18a9   :  { %v5092_v19 = vpop.f32.mrf.mxu0 }
0x18aa   :  { %3959 = vtanh.f32 %v1925_v7  ;;  %v5156_v56 = vadd.f32 %v5092_v19, %v5035_v34 }
0x18ac   :  { %v1980_v29 = vsel %vm1979_vm3, %v5156_v56, -inf }
0x18b7   :  { %v3960_v9 = vpop.eup %3959 }
0x18d2   :  { %v1789_v8 = vpop.permute.xlu1 %1788 }
0x18d3   :  { %1791 = vst.msk [vmem:[#allocation2 + $0x38] sm:$0xff] %vm70_vm1, %v1789_v8  ;;  %3312 = vst.msk [vmem:[%s6311_s12 + $0x8] sm:$0xff] %vm70_vm1, %v1789_v8  ;;  %s4253_s12 = smov 96  }
0x18da   :  { %v1813_v17 = vld [vmem:[#allocation2 + $0x38] sm:$0xff] }
0x18db   :  { %3321 = vmatmul.mubr.msk.f32.gmra.mxu0 %vm70_vm1, %v1813_v17 }
0x18dc   :  { %2272 = vmatprep.mubr.f32.mxu0 %v4249_v1 }
0x18df   :  { %3322 = vmatmul.mubr.msk.f32.vlgmr.msra.gmra.mxu0 %vm70_vm1, %v3960_v9 }
0x18e0   :  { %2278 = vmatprep.mubr.f32.mxu0 %v4249_v1 }
0x192a   :  { %v1930_v10 = vpop.f32.mrf.mxu0 }
0x192b   :  { %v1931_v20 = vadd.f32 %v1930_v10, %v5080_v3 }
0x192c   :  { %v5095_v21 = vpop.f32.mrf.mxu0 }
0x192d   :  { %3961 = vtanh.f32 %v1931_v20  ;;  %v5147_v54 = vadd.f32 %v5095_v21, %v5035_v34 }
0x192e   :  { %v1936_v22 = vpop.f32.mrf.mxu0 }
0x192f   :  { %v1937_v23 = vadd.f32 %v1936_v22, %v5080_v3 }
0x1930   :  { %v5098_v24 = vpop.f32.mrf.mxu0 }
0x1931   :  { %3963 = vtanh.f32 %v1937_v23  ;;  %v5165_v48 = vadd.f32 %v5098_v24, %v5035_v34 }
0x1932   :  { %v1942_v14 = vpop.f32.mrf.mxu0 }
0x1933   :  { %v1943_v26 = vadd.f32 %v1942_v14, %v5080_v3  ;;  %v1986_v36 = vsel %vm1979_vm3, %v5165_v48, -inf }
0x1934   :  { %v5101_v28 = vpop.f32.mrf.mxu0 }
0x1935   :  { %3965 = vtanh.f32 %v1943_v26  ;;  %v5174_v27 = vadd.f32 %v5101_v28, %v5035_v34 }
0x1936   :  { %v1948_v33 = vpop.f32.mrf.mxu0 }
0x1937   :  { %v1949_v35 = vadd.f32 %v1948_v33, %v5080_v3  ;;  %v1989_v38 = vsel %vm1979_vm3, %v5174_v27, -inf }
0x1938   :  { %v1950_v39 = vpop.f32.mrf.mxu0 }
0x1939   :  { %3967 = vtanh.f32 %v1949_v35  ;;  %v5150_v55 = vadd.f32 %v1950_v39, %v5035_v34 }
0x193a   :  { %v3962_v40 = vpop.eup %3961  ;;  %v1954_v41 = vpop.f32.mrf.mxu0 }
0x193b   :  { %v1955_v42 = vadd.f32 %v1954_v41, %v5080_v3  ;;  %3323 = vmatmul.mubr.msk.f32.gmra.mxu0 %vm70_vm1, %v3962_v40 }
0x193c   :  { %v5106_v43 = vpop.f32.mrf.mxu0  ;;  %2284 = vmatprep.mubr.f32.mxu0 %v4249_v1 }
0x193d   :  { %3969 = vtanh.f32 %v1955_v42  ;;  %v5180_v37 = vadd.f32 %v5106_v43, %v5035_v34 }
0x193e   :  { %v3964_v44 = vpop.eup %3963  ;;  %v1960_v45 = vpop.f32.mrf.mxu0 }
0x193f   :  { %v1961_v46 = vadd.f32 %v1960_v45, %v5080_v3  ;;  %3324 = vmatmul.mubr.msk.f32.gmra.mxu0 %vm70_vm1, %v3964_v44  ;;  %v1995_v57 = vsel %vm1979_vm3, %v5180_v37, -inf }
0x1940   :  { %2290 = vmatprep.mubr.f32.mxu0 %v4249_v1  ;;  %v1962_v25 = vpop.f32.mrf.mxu0 }
0x1941   :  { %3971 = vtanh.f32 %v1961_v46  ;;  %v5159_v5 = vadd.f32 %v1962_v25, %v5035_v34 }
0x1942   :  { %v3966_v49 = vpop.eup %3965 }
0x1943   :  { %3325 = vmatmul.mubr.msk.f32.gmra.mxu0 %vm70_vm1, %v3966_v49  ;;  %v1998_v32 = vsel %vm1979_vm3, %v5159_v5, -inf }
0x1944   :  { %2296 = vmatprep.mubr.f32.mxu0 %v4249_v1 }
0x1946   :  { %v3968_v50 = vpop.eup %3967 }
0x1947   :  { %2084 = vrot.lane.b32.xlu0 %v3968_v50, %s4253_s12  ;;  %3326 = vmatmul.mubr.msk.f32.gmra.mxu0 %vm70_vm1, %v3968_v50 }
0x1948   :  { %2302 = vmatprep.mubr.f32.mxu0 %v4249_v1 }
0x194a   :  { %v3970_v51 = vpop.eup %3969 }
0x194b   :  { %2086 = vrot.lane.b32.xlu1 %v3970_v51, %s4253_s12  ;;  %3327 = vmatmul.mubr.msk.f32.gmra.mxu0 %vm70_vm1, %v3970_v51 }
0x194c   :  { %2308 = vmatprep.mubr.f32.mxu0 %v4249_v1 }
0x194e   :  { %v3972_v52 = vpop.eup %3971 }
0x194f   :  { %2088 = vrot.lane.b32.xlu0 %v3972_v52, %s4253_s12  ;;  %2094 = vrot.lane.b32.xlu1 %v3962_v40, %s4252_s17 }
0x1950   :  { %3328 = vmatmul.mubr.msk.f32.gmra.mxu0 %vm70_vm1, %v3972_v52 }
0x1951   :  { %2314 = vmatprep.mubr.f32.mxu0 %v4249_v1 }
0x1953   :  { %2098 = vrot.lane.b32.xlu1 %v3966_v49, %s4252_s17  ;;  %2092 = vrot.lane.b32.xlu0 %v3960_v9, %s4252_s17 }
0x1957   :  { %2102 = vrot.lane.b32.xlu1 %v3970_v51, %s4252_s17  ;;  %2096 = vrot.lane.b32.xlu0 %v3964_v44, %s4252_s17 }
0x195b   :  { %2110 = vrot.lane.b32.xlu1 %v3962_v40, %s4251_s14  ;;  %2100 = vrot.lane.b32.xlu0 %v3968_v50, %s4252_s17 }
0x195f   :  { %2076 = vrot.lane.b32.xlu1 %v3960_v9, %s4253_s12  ;;  %2104 = vrot.lane.b32.xlu0 %v3972_v52, %s4252_s17 }
0x1963   :  { %2078 = vrot.lane.b32.xlu1 %v3962_v40, %s4253_s12  ;;  %2108 = vrot.lane.b32.xlu0 %v3960_v9, %s4251_s14 }
0x1967   :  { %2080 = vrot.lane.b32.xlu1 %v3964_v44, %s4253_s12  ;;  %2112 = vrot.lane.b32.xlu0 %v3964_v44, %s4251_s14 }
0x196b   :  { %2082 = vrot.lane.b32.xlu1 %v3966_v49, %s4253_s12  ;;  %2114 = vrot.lane.b32.xlu0 %v3966_v49, %s4251_s14 }
0x196f   :  { %1801 = vrot.lane.b32.xlu1 %v5011_v53, %s4253_s12  ;;  %2116 = vrot.lane.b32.xlu0 %v3968_v50, %s4251_s14  ;;  %v1983_v53 = vsel %vm1979_vm3, %v5147_v54, -inf }
0x1973   :  { %2118 = vrot.lane.b32.xlu0 %v3970_v51, %s4251_s14 }
0x1977   :  { %2120 = vrot.lane.b32.xlu0 %v3972_v52, %s4251_s14 }
0x197b   :  { %1794 = vrot.lane.b32.xlu0 %v4964_v4, %s4253_s12  ;;  %v1992_v4 = vsel %vm1979_vm3, %v5150_v55, -inf }
0x1993   :  { %1984 = vmax.xlane.f32.xlu1 %v1983_v53 }
0x1997   :  { %1993 = vmax.xlane.f32.xlu1 %v1992_v4 }
0x199a   :  { %1981 = vmax.xlane.f32.xlu0 %v1980_v29 }
0x199b   :  { %v1966_v18 = vpop.f32.mrf.mxu0  ;;  %1999 = vmax.xlane.f32.xlu1 %v1998_v32 }
0x199c   :  { %v1967_v59 = vadd.f32 %v1966_v18, %v5080_v3 }
0x199e   :  { %3973 = vtanh.f32 %v1967_v59  ;;  %1987 = vmax.xlane.f32.xlu0 %v1986_v36 }
0x19a2   :  { %1990 = vmax.xlane.f32.xlu0 %v1989_v38 }
0x19a6   :  { %1996 = vmax.xlane.f32.xlu0 %v1995_v57 }
0x19ab   :  { %v5186_v58 = vpop.eup %3973 }
0x19ac   :  { %3329 = vmatmul.mubr.msk.f32.gmra.mxu0 %vm70_vm1, %v5186_v58 }
0x19ad   :  { %2320 = vmatprep.mubr.f32.mxu0 %v4249_v1 }
0x19b9   :  { %v2085_v60 = vpop.permute.xlu0 %2084 }
0x19ba   :  { %3334 = vmatmul.mubr.msk.f32.vlgmr.msra.gmra.mxu1 %vm70_vm1, %v2085_v60  ;;  %v1968_v60 = vpop.f32.mrf.mxu0 }
0x19bb   :  { %2350 = vmatprep.mubr.f32.mxu1 %v4249_v1 }
0x19bd   :  { %v2087_v61 = vpop.permute.xlu1 %2086 }
0x19be   :  { %3335 = vmatmul.mubr.msk.f32.gmra.mxu1 %vm70_vm1, %v2087_v61  ;;  %v2132_v61 = vld [vmem:[%s6316_s10] sm:$0x3] }
0x19bf   :  { %2356 = vmatprep.mubr.f32.mxu1 %v4249_v1 }
0x19c1   :  { %v2089_v0 = vpop.permute.xlu0 %2088  ;;  %v5195_v63 = vpop.permute.xlu1 %2094 }
0x19c2   :  { %3336 = vmatmul.mubr.msk.f32.gmra.mxu1 %vm70_vm1, %v2089_v0  ;;  %v2274_v0 = vpop.f32.mrf.mxu0 }
0x19c3   :  { %2362 = vmatprep.mubr.f32.mxu1 %v4249_v1 }
0x19c5   :  { %v5199_v62 = vpop.permute.xlu1 %2098  ;;  %v5201_v11 = vpop.permute.xlu0 %2092 }
0x19c9   :  { %v5203_v12 = vpop.permute.xlu1 %2102  ;;  %v5205_v15 = vpop.permute.xlu0 %2096 }
0x19cd   :  { %v5207_v47 = vpop.permute.xlu1 %2110  ;;  %v5209_v13 = vpop.permute.xlu0 %2100 }
0x19d1   :  { %v2077_v16 = vpop.permute.xlu1 %2076  ;;  %v5211_v3 = vpop.permute.xlu0 %2104 }
0x19d2   :  { %3330 = vmatmul.mubr.msk.f32.gmra.mxu0 %vm70_vm1, %v2077_v16 }
0x19d3   :  { %2326 = vmatprep.mubr.f32.mxu0 %v4249_v1 }
0x19d5   :  { %v2079_v6 = vpop.permute.xlu1 %2078  ;;  %v5215_v7 = vpop.permute.xlu0 %2108 }
0x19d6   :  { %3331 = vmatmul.mubr.msk.f32.gmra.mxu0 %vm70_vm1, %v2079_v6  ;;  %v5280_v6 = vrot.slane %v2132_v61, %v1826_v2 }
0x19d7   :  { %2332 = vmatprep.mubr.f32.mxu0 %v4249_v1 }
0x19d8   :  { %v5292_v2 = vadd.f32 %v2274_v0, %v5280_v6 }
0x19d9   :  { %v2081_v8 = vpop.permute.xlu1 %2080  ;;  %v5219_v17 = vpop.permute.xlu0 %2112 }
0x19da   :  { %3332 = vmatmul.mubr.msk.f32.gmra.mxu0 %vm70_vm1, %v2081_v8  ;;  %v5284_v8 = vrot.slane %v2132_v61, %v1830_v31 }
0x19db   :  { %2338 = vmatprep.mubr.f32.mxu0 %v4249_v1 }
0x19dd   :  { %v2083_v9 = vpop.permute.xlu1 %2082  ;;  %v5223_v19 = vpop.permute.xlu0 %2114 }
0x19de   :  { %3333 = vmatmul.mubr.msk.f32.gmra.mxu0 %vm70_vm1, %v2083_v9  ;;  %v2276_v9 = vpop.f32.mrf.mxu0 }
0x19e1   :  { %v1802_v10 = vpop.permute.xlu1 %1801  ;;  %v5226_v20 = vpop.permute.xlu0 %2116 }
0x19e2   :  { %3313 = vst.msk [vmem:[%s6315_s13 + $0x8] sm:$0xff] %vm70_vm1, %v1802_v10 }
0x19e5   :  { %v5232_v21 = vpop.permute.xlu0 %2118 }
0x19e9   :  { %v5234_v22 = vpop.permute.xlu0 %2120 }
0x19ed   :  { %v1795_v23 = vpop.permute.xlu0 %1794 }
0x19ee   :  { %1797 = vst.msk [vmem:[%s6315_s13] sm:$0xff] %vm70_vm1, %v1795_v23 }
0x1a1c   :  { %v1985_v24 = vpop.xlane.xlu1 %1984 }
0x1a1d   :  { %v2005_v14 = vsub.f32 %v5147_v54, %v1985_v24 }
0x1a1f   :  { %v2014_v26 = vmul.f32 1.442695, %v2005_v14 }
0x1a20   :  { %v1994_v28 = vpop.xlane.xlu1 %1993 }
0x1a21   :  { %3975 = vpow2.f32 %v2014_v26  ;;  %v2008_v39 = vsub.f32 %v5150_v55, %v1994_v28  ;;  %v5289_v26 = vadd.f32 %v2276_v9, %v5284_v8 }
0x1a23   :  { %v1982_v33 = vpop.xlane.xlu0 %1981  ;;  %v2020_v44 = vmul.f32 1.442695, %v2008_v39  ;;  %v2465_v39 = vmax.f32 %v5292_v2, %v5289_v26 }
0x1a24   :  { %v2004_v35 = vsub.f32 %v5156_v56, %v1982_v33  ;;  %v2000_v41 = vpop.xlane.xlu1 %1999  ;;  %v2280_v33 = vpop.f32.mrf.mxu0 }
0x1a25   :  { %v2010_v45 = vsub.f32 %v5159_v5, %v2000_v41  ;;  %v5299_v41 = vadd.f32 %v1968_v60, %v5035_v34 }
0x1a26   :  { %v2012_v40 = vmul.f32 1.442695, %v2004_v35 }
0x1a27   :  { %v1988_v42 = vpop.xlane.xlu0 %1987  ;;  %v2024_v52 = vmul.f32 1.442695, %v2010_v45  ;;  %v5307_v45 = vadd.f32 %v2280_v33, %v5280_v6 }
0x1a28   :  { %3977 = vpow2.f32 %v2012_v40  ;;  %v2006_v43 = vsub.f32 %v5165_v48, %v1988_v42  ;;  %v2282_v42 = vpop.f32.mrf.mxu0 }
0x1a2a   :  { %v2016_v46 = vmul.f32 1.442695, %v2006_v43  ;;  %v5302_v43 = vadd.f32 %v2282_v42, %v5284_v8 }
0x1a2b   :  { %v1991_v49 = vpop.xlane.xlu0 %1990 }
0x1a2c   :  { %3979 = vpow2.f32 %v2016_v46  ;;  %v2007_v50 = vsub.f32 %v5174_v27, %v1991_v49  ;;  %v2468_v46 = vmax.f32 %v5307_v45, %v5302_v43 }
0x1a2d   :  { %3981 = vpow2.f32 %v2020_v44  ;;  %v2001_v44 = vsel %vm1979_vm3, %v5299_v41, -inf }
0x1a2e   :  { %v5246_v51 = vpop.eup %3975  ;;  %v2018_v54 = vmul.f32 1.442695, %v2007_v50  ;;  %v4254_v50 = vmov 0  }
0x1a2f   :  { %v1997_v55 = vpop.xlane.xlu0 %1996  ;;  %v2031_v53 = vsel %vm1979_vm3, %v5246_v51, 0.0  ;;  %3820 = vset.pattern.permute.xlu0 %v4254_v50  ;;  %3819 = vset.pattern.permute.xlu1 %v4254_v50 }
0x1a30   :  { %3983 = vpow2.f32 %v2018_v54  ;;  %v2009_v25 = vsub.f32 %v5180_v37, %v1997_v55  ;;  %2032 = vadd.xlane.f32.xlu0 %v2031_v53 }
0x1a31   :  { %3985 = vpow2.f32 %v2024_v52 }
0x1a32   :  { %v2022_v56 = vmul.f32 1.442695, %v2009_v25 }
0x1a34   :  { %3987 = vpow2.f32 %v2022_v56 }
0x1a35   :  { %v5251_v5 = vpop.eup %3977 }
0x1a36   :  { %v2028_v4 = vsel %vm1979_vm3, %v5251_v5, 0.0 }
0x1a37   :  { %2029 = vadd.xlane.f32.xlu1 %v2028_v4 }
0x1a39   :  { %v5255_v48 = vpop.eup %3979 }
0x1a3a   :  { %v2034_v29 = vsel %vm1979_vm3, %v5255_v48, 0.0  ;;  %v5259_v32 = vpop.eup %3981 }
0x1a3b   :  { %2035 = vadd.xlane.f32.xlu1 %v2034_v29  ;;  %v2040_v59 = vsel %vm1979_vm3, %v5259_v32, 0.0 }
0x1a3d   :  { %v5261_v18 = vpop.eup %3983 }
0x1a3e   :  { %v2037_v27 = vsel %vm1979_vm3, %v5261_v18, 0.0  ;;  %v5267_v36 = vpop.eup %3985 }
0x1a3f   :  { %2041 = vadd.xlane.f32.xlu1 %v2040_v59  ;;  %2038 = vadd.xlane.f32.xlu0 %v2037_v27  ;;  %v2046_v38 = vsel %vm1979_vm3, %v5267_v36, 0.0 }
0x1a41   :  { %v5269_v37 = vpop.eup %3987 }
0x1a42   :  { %v2043_v57 = vsel %vm1979_vm3, %v5269_v37, 0.0 }
0x1a43   :  { %2047 = vadd.xlane.f32.xlu1 %v2046_v38  ;;  %2044 = vadd.xlane.f32.xlu0 %v2043_v57 }
0x1a7a   :  { %v2346_v16 = vpop.f32.mrf.mxu1 }
0x1a7b   :  { %v2347_v23 = vadd.f32 %v2346_v16, %v5280_v6 }
0x1a7c   :  { %v2348_v10 = vpop.f32.mrf.mxu1 }
0x1a7d   :  { %v2349_v24 = vadd.f32 %v2348_v10, %v5284_v8 }
0x1a7e   :  { %v2352_v14 = vpop.f32.mrf.mxu1 }
0x1a7f   :  { %v2501_v28 = vmax.f32 %v2347_v23, %v2349_v24  ;;  %v2353_v30 = vadd.f32 %v2352_v14, %v5280_v6 }
0x1a80   :  { %v2354_v35 = vpop.f32.mrf.mxu1 }
0x1a81   :  { %v2355_v31 = vadd.f32 %v2354_v35, %v5284_v8  ;;  %2502 = vmax.xlane.f32.xlu1 %v2501_v28 }
0x1a82   :  { %v2358_v34 = vpop.f32.mrf.mxu1 }
0x1a83   :  { %v2504_v40 = vmax.f32 %v2353_v30, %v2355_v31  ;;  %v5319_v54 = vadd.f32 %v2358_v34, %v5280_v6 }
0x1a84   :  { %v2360_v49 = vpop.f32.mrf.mxu1 }
0x1a85   :  { %2505 = vmax.xlane.f32.xlu0 %v2504_v40  ;;  %2466 = vmax.xlane.f32.xlu1 %v2465_v39  ;;  %v5316_v52 = vadd.f32 %v2360_v49, %v5284_v8 }
0x1a87   :  { %v2507_v55 = vmax.f32 %v5319_v54, %v5316_v52 }
0x1a89   :  { %2002 = vmax.xlane.f32.xlu0 %v2001_v44 }
0x1a8d   :  { %2469 = vmax.xlane.f32.xlu0 %v2468_v46 }
0x1a96   :  { %2090 = vrot.lane.b32.xlu1 %v5186_v58, %s4253_s12 }
0x1ab9   :  { %v2033_v56 = vpop.xlane.xlu0 %2032 }
0x1aba   :  { %2508 = vmax.xlane.f32.xlu1 %v2507_v55 }
0x1ac0   :  { %v2030_v53 = vpop.xlane.xlu1 %2029 }
0x1ac4   :  { %v2036_v25 = vpop.xlane.xlu1 %2035 }
0x1ac8   :  { %v2042_v4 = vpop.xlane.xlu1 %2041  ;;  %v2039_v29 = vpop.xlane.xlu0 %2038 }
0x1acb   :  { %2106 = vrot.lane.b32.xlu1 %v5186_v58, %s4252_s17 }
0x1acc   :  { %v2048_v59 = vpop.xlane.xlu1 %2047  ;;  %v5325_v27 = vpop.xlane.xlu0 %2044 }
0x1b0a   :  { %v2503_v38 = vpop.xlane.xlu1 %2502 }
0x1b0b   :  { %v2585_v57 = vsub.f32 %v2347_v23, %v2503_v38  ;;  %v2586_v60 = vsub.f32 %v2349_v24, %v2503_v38 }
0x1b0d   :  { %v2673_v61 = vmul.f32 1.442695, %v2585_v57  ;;  %v2675_v0 = vmul.f32 1.442695, %v2586_v60 }
0x1b0e   :  { %v2506_v16 = vpop.xlane.xlu0 %2505  ;;  %v5327_v9 = vpop.xlane.xlu1 %2466 }
0x1b0f   :  { %3989 = vpow2.f32 %v2673_v61  ;;  %v2587_v10 = vsub.f32 %v2353_v30, %v2506_v16  ;;  %v2588_v14 = vsub.f32 %v2355_v31, %v2506_v16 }
0x1b10   :  { %3991 = vpow2.f32 %v2675_v0 }
0x1b11   :  { %v2677_v28 = vmul.f32 1.442695, %v2587_v10  ;;  %v2679_v33 = vmul.f32 1.442695, %v2588_v14 }
0x1b12   :  { %v2091_v35 = vpop.permute.xlu1 %2090 }
0x1b13   :  { %3993 = vpow2.f32 %v2677_v28  ;;  %3337 = vmatmul.mubr.msk.f32.gmra.mxu1 %vm70_vm1, %v2091_v35 }
0x1b14   :  { %3995 = vpow2.f32 %v2679_v33  ;;  %2368 = vmatprep.mubr.f32.mxu1 %v4249_v1 }
0x1b15   :  { %3997 = vrcp.f32 %v2033_v56 }
0x1b16   :  { %3999 = vrcp.f32 %v2042_v4  ;;  %v2003_v4 = vpop.xlane.xlu0 %2002 }
0x1b17   :  { %3338 = vmatmul.mubr.msk.f32.gmra.mxu1 %vm70_vm1, %v5201_v11  ;;  %4001 = vrcp.f32 %v2048_v59 }
0x1b18   :  { %2374 = vmatprep.mubr.f32.mxu1 %v4249_v1  ;;  %4003 = vrcp.f32 %v2030_v53 }
0x1b19   :  { %4005 = vrcp.f32 %v2039_v29 }
0x1b1a   :  { %4007 = vrcp.f32 %v2036_v25  ;;  %v4257_v25 = vmov 1   ;;  %v2470_v29 = vpop.xlane.xlu0 %2469 }
0x1b1b   :  { %3339 = vmatmul.mubr.msk.f32.gmra.mxu1 %vm70_vm1, %v5195_v63  ;;  %4009 = vrcp.f32 %v5325_v27  ;;  %v2563_v27 = vsub.f32 %v5307_v45, %v2470_v29  ;;  %v2564_v38 = vsub.f32 %v5302_v43, %v2470_v29 }
0x1b1c   :  { %v5336_v23 = vpop.eup %3989  ;;  %2380 = vmatprep.mubr.f32.mxu1 %v4249_v1 }
0x1b1d   :  { %v5339_v24 = vpop.eup %3991  ;;  %v2629_v60 = vmul.f32 1.442695, %v2563_v27  ;;  %v2631_v61 = vmul.f32 1.442695, %v2564_v38 }
0x1b1e   :  { %v2789_v30 = vadd.f32 %v5339_v24, %v5336_v23 }
0x1b1f   :  { %3340 = vmatmul.mubr.msk.f32.gmra.mxu1 %vm70_vm1, %v5205_v15 }
0x1b20   :  { %v5345_v31 = vpop.eup %3993  ;;  %2790 = vadd.xlane.f32.xlu1 %v2789_v30  ;;  %2386 = vmatprep.mubr.f32.mxu1 %v4249_v1 }
0x1b21   :  { %v5348_v11 = vpop.eup %3995 }
0x1b22   :  { %v2792_v63 = vadd.f32 %v5348_v11, %v5345_v31 }
0x1b23   :  { %3341 = vmatmul.mubr.msk.f32.gmra.mxu1 %vm70_vm1, %v5199_v62  ;;  %v3998_v62 = vpop.eup %3997 }
0x1b24   :  { %2793 = vadd.xlane.f32.xlu0 %v2792_v63  ;;  %2392 = vmatprep.mubr.f32.mxu1 %v4249_v1  ;;  %v5367_v15 = vmul.f32 %v3998_v62, %v5246_v51 }
0x1b27   :  { %3342 = vmatmul.mubr.msk.f32.gmra.mxu1 %vm70_vm1, %v5209_v13  ;;  %v6318_v13 = vmov 2  }
0x1b28   :  { %2398 = vmatprep.mubr.f32.mxu1 %v4249_v1 }
0x1b2b   :  { %3343 = vmatmul.mubr.msk.f32.gmra.mxu1 %vm70_vm1, %v5203_v12  ;;  %v4000_v12 = vpop.eup %3999 }
0x1b2c   :  { %2404 = vmatprep.mubr.f32.mxu1 %v4249_v1  ;;  %v4002_v39 = vpop.eup %4001 }
0x1b2d   :  { %v5379_v42 = vmul.f32 %v4002_v39, %v5267_v36  ;;  %v4004_v34 = vpop.eup %4003  ;;  %v6319_v36 = vmov 3  }
0x1b2e   :  { %v5386_v49 = vmul.f32 %v4004_v34, %v5251_v5 }
0x1b2f   :  { %3344 = vmatmul.mubr.msk.f32.gmra.mxu1 %vm70_vm1, %v5211_v3  ;;  %v5373_v3 = vmul.f32 %v4000_v12, %v5259_v32  ;;  %6363 = vst [vmem:[#allocation4_spill] sm:$0xff] %v5379_v42 }
0x1b30   :  { %2410 = vmatprep.mubr.f32.mxu1 %v4249_v1 }
0x1b31   :  { %2122 = vrot.lane.b32.xlu1 %v5186_v58, %s4251_s14  ;;  %6362 = vst [vmem:[#allocation3_spill] sm:$0xff] %v5373_v3 }
0x1b3a   :  { %2952 = vperm.xlu0 %3820, %v5367_v15  }
0x1b3e   :  { %3823 = vset.pattern.permute.xlu0 %v6318_v13 }
0x1b3f   :  { %3070 = vperm.xlu0 %3823, %v5367_v15  }
0x1b43   :  { %3082 = vperm.xlu0 %3823, %v5373_v3   ;;  %v2509_v58 = vpop.xlane.xlu1 %2508 }
0x1b44   :  { %v2589_v51 = vsub.f32 %v5319_v54, %v2509_v58  ;;  %v2590_v40 = vsub.f32 %v5316_v52, %v2509_v58  ;;  %v4006_v52 = vpop.eup %4005 }
0x1b45   :  { %v5394_v54 = vmul.f32 %v4006_v52, %v5261_v18  ;;  %v4008_v55 = vpop.eup %4007 }
0x1b46   :  { %v2681_v44 = vmul.f32 1.442695, %v2589_v51  ;;  %v2683_v46 = vmul.f32 1.442695, %v2590_v40  ;;  %v5401_v5 = vmul.f32 %v4008_v55, %v5255_v48  ;;  %v4010_v53 = vpop.eup %4009  ;;  %v2561_v40 = vsub.f32 %v5292_v2, %v5327_v9 }
0x1b47   :  { %3090 = vperm.xlu0 %3823, %v5379_v42   ;;  %v2107_v32 = vpop.permute.xlu1 %2106  ;;  %v5414_v56 = vmul.f32 %v4010_v53, %v5269_v37 }
0x1b48   :  { %4011 = vpow2.f32 %v2681_v44  ;;  %3345 = vmatmul.mubr.msk.f32.gmra.mxu1 %vm70_vm1, %v2107_v32  ;;  %v2562_v44 = vsub.f32 %v5289_v26, %v5327_v9 }
0x1b49   :  { %4013 = vpow2.f32 %v2683_v46  ;;  %2416 = vmatprep.mubr.f32.mxu1 %v4249_v1  ;;  %v2625_v46 = vmul.f32 1.442695, %v2561_v40 }
0x1b4a   :  { %v2627_v34 = vmul.f32 1.442695, %v2562_v44 }
0x1b4b   :  { %3824 = vset.pattern.permute.xlu0 %v6319_v36 }
0x1b4c   :  { %3130 = vperm.xlu0 %3824, %v5386_v49   ;;  %3346 = vmatmul.mubr.msk.f32.gmra.mxu1 %vm70_vm1, %v5215_v7 }
0x1b4d   :  { %2422 = vmatprep.mubr.f32.mxu1 %v4249_v1 }
0x1b50   :  { %3142 = vperm.xlu0 %3824, %v5394_v54   ;;  %3347 = vmatmul.mubr.msk.f32.gmra.mxu1 %vm70_vm1, %v5207_v47  ;;  %v5411_v47 = vpop.f32.mrf.mxu0 }
0x1b51   :  { %2428 = vmatprep.mubr.f32.mxu1 %v4249_v1  ;;  %v5511_v2 = vadd.f32 %v5411_v47, %v5280_v6 }
0x1b54   :  { %3826 = vset.pattern.permute.xlu0 %v4257_v25  ;;  %3348 = vmatmul.mubr.msk.f32.gmra.mxu1 %vm70_vm1, %v5219_v17  ;;  %v5422_v17 = vpop.f32.mrf.mxu0 }
0x1b55   :  { %v5405_v7 = vpop.eup %4011  ;;  %3010 = vperm.xlu0 %3826, %v5401_v5   ;;  %2434 = vmatprep.mubr.f32.mxu1 %v4249_v1 }
0x1b56   :  { %v5409_v18 = vpop.eup %4013  ;;  %v2292_v37 = vpop.f32.mrf.mxu0 }
0x1b57   :  { %v2795_v48 = vadd.f32 %v5409_v18, %v5405_v7  ;;  %v5447_v43 = vadd.f32 %v2292_v37, %v5280_v6 }
0x1b58   :  { %3349 = vmatmul.mubr.msk.f32.gmra.mxu1 %vm70_vm1, %v5223_v19  ;;  %v2294_v19 = vpop.f32.mrf.mxu0 }
0x1b59   :  { %3022 = vperm.xlu0 %3826, %v5414_v56   ;;  %2796 = vadd.xlane.f32.xlu1 %v2795_v48 }
0x1b5a   :  { %2440 = vmatprep.mubr.f32.mxu1 %v4249_v1  ;;  %v5433_v59 = vpop.f32.mrf.mxu0 }
0x1b5b   :  { %v5523_v53 = vadd.f32 %v5433_v59, %v5280_v6 }
0x1b5c   :  { %3350 = vmatmul.mubr.msk.f32.gmra.mxu1 %vm70_vm1, %v5226_v20  ;;  %v2011_v20 = vsub.f32 %v5299_v41, %v2003_v4 }
0x1b5d   :  { %2446 = vmatprep.mubr.f32.mxu1 %v4249_v1 }
0x1b5e   :  { %v2026_v57 = vmul.f32 1.442695, %v2011_v20 }
0x1b60   :  { %3351 = vmatmul.mubr.msk.f32.gmra.mxu1 %vm70_vm1, %v5232_v21  ;;  %v5439_v21 = vpop.f32.mrf.mxu0  ;;  %4015 = vpow2.f32 %v2026_v57 }
0x1b61   :  { %2452 = vmatprep.mubr.f32.mxu1 %v4249_v1  ;;  %4017 = vpow2.f32 %v2629_v60  ;;  %v5517_v9 = vadd.f32 %v5439_v21, %v5284_v8 }
0x1b62   :  { %4019 = vpow2.f32 %v2631_v61 }
0x1b64   :  { %3352 = vmatmul.mubr.msk.f32.gmra.mxu1 %vm70_vm1, %v5234_v22  ;;  %v2304_v22 = vpop.f32.mrf.mxu0 }
0x1b65   :  { %2458 = vmatprep.mubr.f32.mxu1 %v4249_v1  ;;  %v5443_v1 = vadd.f32 %v2294_v19, %v5284_v8  ;;  %v5456_v16 = vadd.f32 %v2304_v22, %v5280_v6 }
0x1b66   :  { %v2306_v41 = vpop.f32.mrf.mxu0 }
0x1b67   :  { %v2474_v45 = vmax.f32 %v5447_v43, %v5443_v1  ;;  %v5452_v0 = vadd.f32 %v2306_v41, %v5284_v8 }
0x1b68   :  { %v2310_v52 = vpop.f32.mrf.mxu0 }
0x1b69   :  { %v2480_v10 = vmax.f32 %v5456_v16, %v5452_v0  ;;  %v5533_v4 = vadd.f32 %v2310_v52, %v5280_v6 }
0x1b6a   :  { %2947 = vperm.xlu1 %3819, %v5386_v49   ;;  %v2312_v55 = vpop.f32.mrf.mxu0 }
0x1b6b   :  { %v5528_v47 = vadd.f32 %v2312_v55, %v5284_v8 }
0x1b6c   :  { %v2316_v41 = vpop.f32.mrf.mxu0 }
0x1b6d   :  { %v5461_v14 = vpop.eup %4015  ;;  %v2483_v20 = vmax.f32 %v5533_v4, %v5528_v47 }
0x1b6e   :  { %2957 = vperm.xlu1 %3819, %v5401_v5   ;;  %v5463_v28 = vpop.eup %4017  ;;  %v2049_v35 = vsel %vm1979_vm3, %v5461_v14, 0.0 }
0x1b6f   :  { %6364 = vst [vmem:[#allocation5_spill] sm:$0xff] %v5463_v28  ;;  %v5466_v33 = vpop.eup %4019 }
0x1b70   :  { %6365 = vst [vmem:[#allocation6_spill] sm:$0xff] %v5466_v33  ;;  %v2756_v30 = vadd.f32 %v5466_v33, %v5463_v28 }
0x1b72   :  { %2962 = vperm.xlu1 %3819, %v5394_v54  }
0x1b76   :  { %2967 = vperm.xlu1 %3819, %v5373_v3  }
0x1b78   :  { %2475 = vmax.xlane.f32.xlu0 %v2474_v45 }
0x1b7a   :  { %2972 = vperm.xlu1 %3819, %v5414_v56  }
0x1b7c   :  { %2481 = vmax.xlane.f32.xlu0 %v2480_v10  ;;  %v2318_v10 = vpop.f32.mrf.mxu0 }
0x1b7e   :  { %2977 = vperm.xlu1 %3819, %v5379_v42  }
0x1b80   :  { %2050 = vadd.xlane.f32.xlu0 %v2049_v35 }
0x1b82   :  { %3821 = vset.pattern.permute.xlu1 %v4257_v25  ;;  %v2477_v25 = vmax.f32 %v5523_v53, %v5517_v9 }
0x1b83   :  { %3002 = vperm.xlu1 %3821, %v5386_v49  }
0x1b84   :  { %2757 = vadd.xlane.f32.xlu0 %v2756_v30  ;;  %v5561_v30 = vpop.f32.mrf.mxu0 }
0x1b86   :  { %v5567_v52 = vpop.f32.mrf.mxu0 }
0x1b87   :  { %3006 = vperm.xlu1 %3821, %v5367_v15  }
0x1b8b   :  { %3014 = vperm.xlu1 %3821, %v5394_v54  }
0x1b8f   :  { %3018 = vperm.xlu1 %3821, %v5373_v3  }
0x1b93   :  { %3026 = vperm.xlu1 %3821, %v5379_v42  }
0x1b97   :  { %3822 = vset.pattern.permute.xlu1 %v6318_v13 }
0x1b98   :  { %3066 = vperm.xlu1 %3822, %v5386_v49  }
0x1b9c   :  { %3074 = vperm.xlu1 %3822, %v5401_v5  }
0x1ba0   :  { %3078 = vperm.xlu1 %3822, %v5394_v54  }
0x1ba4   :  { %3086 = vperm.xlu1 %3822, %v5414_v56  }
0x1ba8   :  { %3825 = vset.pattern.permute.xlu1 %v6319_v36 }
0x1ba9   :  { %3134 = vperm.xlu1 %3825, %v5367_v15   ;;  %v5484_v63 = vpop.xlane.xlu1 %2790 }
0x1bad   :  { %3138 = vperm.xlu1 %3825, %v5401_v5   ;;  %v2123_v62 = vpop.permute.xlu1 %2122  ;;  %v2794_v12 = vpop.xlane.xlu0 %2793 }
0x1bae   :  { %3353 = vmatmul.mubr.msk.f32.gmra.mxu1 %vm70_vm1, %v2123_v62  ;;  %4021 = vrcp.f32 %v2794_v12 }
0x1baf   :  { %4023 = vpow2.f32 %v2625_v46 }
0x1bb0   :  { %4025 = vpow2.f32 %v2627_v34 }
0x1bb1   :  { %3827 = vset.pattern.permute.xlu1 %v4254_v50  ;;  %v5505_v50 = vadd.f32 %v5422_v17, %v5284_v8 }
0x1bb3   :  { %v2471_v26 = vmax.f32 %v5511_v2, %v5505_v50 }
0x1bb5   :  { %v5489_v39 = vpop.permute.xlu0 %2952 }
0x1bb6   :  { %6366 = vst [vmem:[#allocation7_spill] sm:$0xff] %v5489_v39 }
0x1bba   :  { %v5491_v58 = vpop.permute.xlu0 %3070 }
0x1bbb   :  { %6367 = vst [vmem:[#allocation8_spill] sm:$0xff] %v5491_v58  ;;  %v4022_v54 = vpop.eup %4021 }
0x1bbc   :  { %v2907_v48 = vmul.f32 %v4022_v54, %v5345_v31  ;;  %v2908_v17 = vmul.f32 %v4022_v54, %v5348_v11  ;;  %v5539_v59 = vpop.eup %4023 }
0x1bbd   :  { %6373 = vst [vmem:[#allocation14_spill] sm:$0xff] %v5539_v59  ;;  %v5543_v27 = vpop.eup %4025 }
0x1bbe   :  { %v5493_v51 = vpop.permute.xlu0 %3082  ;;  %6374 = vst [vmem:[#allocation15_spill] sm:$0xff] %v5543_v27  ;;  %v2753_v31 = vadd.f32 %v5543_v27, %v5539_v59 }
0x1bbf   :  { %6368 = vst [vmem:[#allocation9_spill] sm:$0xff] %v5493_v51 }
0x1bc2   :  { %v5497_v15 = vpop.permute.xlu0 %3090 }
0x1bc3   :  { %6369 = vst [vmem:[#allocation10_spill] sm:$0xff] %v5497_v15 }
0x1bc7   :  { %v5501_v32 = vpop.permute.xlu0 %3130 }
0x1bc8   :  { %6370 = vst [vmem:[#allocation11_spill] sm:$0xff] %v5501_v32 }
0x1bcb   :  { %v5507_v49 = vpop.permute.xlu0 %3142 }
0x1bcc   :  { %6371 = vst [vmem:[#allocation12_spill] sm:$0xff] %v5507_v49 }
0x1bd0   :  { %v5519_v5 = vpop.permute.xlu0 %3010 }
0x1bd1   :  { %6372 = vst [vmem:[#allocation13_spill] sm:$0xff] %v5519_v5  ;;  %2472 = vmax.xlane.f32.xlu1 %v2471_v26 }
0x1bd4   :  { %v3023_v37 = vpop.permute.xlu0 %3022 }
0x1bd5   :  { %v5535_v19 = vmul.f32 %v3023_v37, %v2907_v48  ;;  %v5537_v29 = vmul.f32 %v3023_v37, %v2908_v17  ;;  %2478 = vmax.xlane.f32.xlu1 %v2477_v25  ;;  %v2328_v17 = vpop.f32.mrf.mxu0 }
0x1bd9   :  { %2484 = vmax.xlane.f32.xlu1 %v2483_v20 }
0x1bdd   :  { %2754 = vadd.xlane.f32.xlu1 %v2753_v31  ;;  %v2330_v31 = vpop.f32.mrf.mxu0 }
0x1be2   :  { %v2797_v11 = vpop.xlane.xlu1 %2796 }
0x1be3   :  { %4027 = vrcp.f32 %v2797_v11 }
0x1be6   :  { %v5547_v38 = vpop.permute.xlu1 %2947 }
0x1be7   :  { %6375 = vst [vmem:[#allocation16_spill] sm:$0xff] %v5547_v38 }
0x1bea   :  { %v5549_v21 = vpop.permute.xlu1 %2957 }
0x1beb   :  { %6376 = vst [vmem:[#allocation17_spill] sm:$0xff] %v5549_v21 }
0x1bee   :  { %v5551_v57 = vpop.permute.xlu1 %2962 }
0x1bef   :  { %6377 = vst [vmem:[#allocation18_spill] sm:$0xff] %v5551_v57 }
0x1bf2   :  { %v5553_v60 = vpop.permute.xlu1 %2967 }
0x1bf3   :  { %6378 = vst [vmem:[#allocation19_spill] sm:$0xff] %v5553_v60 }
0x1bf6   :  { %v5555_v61 = vpop.permute.xlu1 %2972 }
0x1bfa   :  { %v5557_v22 = vpop.permute.xlu1 %2977 }
0x1bfb   :  { %6379 = vst [vmem:[#allocation20_spill] sm:$0xff] %v5557_v22 }
0x1bfe   :  { %v5559_v45 = vpop.permute.xlu1 %3002 }
0x1bff   :  { %6380 = vst [vmem:[#allocation21_spill] sm:$0xff] %v5559_v45 }
0x1c01   :  { %v2476_v35 = vpop.xlane.xlu0 %2475 }
0x1c02   :  { %v2567_v62 = vsub.f32 %v5447_v43, %v2476_v35  ;;  %v2568_v12 = vsub.f32 %v5443_v1, %v2476_v35  ;;  %v5565_v40 = vpop.permute.xlu1 %3006  ;;  %v4028_v43 = vpop.eup %4027 }
0x1c03   :  { %6381 = vst [vmem:[#allocation22_spill] sm:$0xff] %v5565_v40  ;;  %v2909_v37 = vmul.f32 %v4028_v43, %v5405_v7  ;;  %v2910_v20 = vmul.f32 %v4028_v43, %v5409_v18  ;;  %v5581_v35 = vpop.f32.mrf.mxu0  ;;  %v5601_v43 = vadd.f32 %v2316_v41, %v5280_v6 }
0x1c04   :  { %v2637_v44 = vmul.f32 1.442695, %v2567_v62  ;;  %v2639_v46 = vmul.f32 1.442695, %v2568_v12 }
0x1c05   :  { %v2482_v34 = vpop.xlane.xlu0 %2481 }
0x1c06   :  { %4029 = vpow2.f32 %v2637_v44  ;;  %v2571_v26 = vsub.f32 %v5456_v16, %v2482_v34  ;;  %v2572_v54 = vsub.f32 %v5452_v0, %v2482_v34  ;;  %v5571_v55 = vpop.permute.xlu1 %3014  ;;  %v2364_v44 = vpop.f32.mrf.mxu1 }
0x1c07   :  { %6382 = vst [vmem:[#allocation23_spill] sm:$0xff] %v5571_v55  ;;  %4031 = vpow2.f32 %v2639_v46  ;;  %v5589_v34 = vpop.f32.mrf.mxu0  ;;  %v5658_v33 = vadd.f32 %v2364_v44, %v5280_v6 }
0x1c08   :  { %v2645_v25 = vmul.f32 1.442695, %v2571_v26  ;;  %v2647_v48 = vmul.f32 1.442695, %v2572_v54  ;;  %v5596_v26 = vadd.f32 %v2318_v10, %v5284_v8  ;;  %v2366_v54 = vpop.f32.mrf.mxu1  ;;  %v5611_v10 = vadd.f32 %v2328_v17, %v5280_v6 }
0x1c09   :  { %v2051_v17 = vpop.xlane.xlu0 %2050  ;;  %v5653_v39 = vadd.f32 %v2366_v54, %v5284_v8 }
0x1c0a   :  { %4033 = vpow2.f32 %v2645_v25  ;;  %v5573_v1 = vpop.permute.xlu1 %3018 }
0x1c0b   :  { %4035 = vpow2.f32 %v2647_v48  ;;  %v2340_v48 = vpop.f32.mrf.mxu0  ;;  %v2510_v28 = vmax.f32 %v5658_v33, %v5653_v39 }
0x1c0c   :  { %v5621_v36 = vadd.f32 %v2340_v48, %v5280_v6  ;;  %4037 = vrcp.f32 %v2051_v17  ;;  %v6390_v17 = vmov 3  }
0x1c0e   :  { %v3027_v11 = vpop.permute.xlu1 %3026 }
0x1c0f   :  { %v5577_v16 = vmul.f32 %v3027_v11, %v2909_v37  ;;  %v5579_v0 = vmul.f32 %v3027_v11, %v2910_v20  ;;  %v2486_v37 = vmax.f32 %v5601_v43, %v5596_v26  ;;  %v5606_v20 = vadd.f32 %v2330_v31, %v5284_v8  ;;  %v5608_v11 = vpop.f32.mrf.mxu1 }
0x1c11   :  { %6383 = vst [vmem:[#allocation24_spill] sm:$0xff] %v5577_v16  ;;  %6384 = vst [vmem:[#allocation25_spill] sm:$0xff] %v5579_v0  ;;  %v2492_v13 = vmax.f32 %v5611_v10, %v5606_v20 }
0x1c13   :  { %v5583_v62 = vpop.eup %4029  ;;  %v5629_v49 = vpop.permute.xlu1 %3066 }
0x1c14   :  { %6385 = vst [vmem:[#allocation26_spill] sm:$0xff] %v5583_v62  ;;  %v5585_v12 = vpop.eup %4031  ;;  %6387 = vst [vmem:[#allocation28_spill] sm:$0xff] %v5629_v49 }
0x1c15   :  { %6386 = vst [vmem:[#allocation27_spill] sm:$0xff] %v5585_v12  ;;  %v2762_v46 = vadd.f32 %v5585_v12, %v5583_v62 }
0x1c17   :  { %v5591_v7 = vpop.eup %4033  ;;  %2763 = vadd.xlane.f32.xlu0 %v2762_v46  ;;  %v2342_v46 = vpop.f32.mrf.mxu0 }
0x1c18   :  { %v5593_v18 = vpop.eup %4035  ;;  %v5616_v41 = vadd.f32 %v2342_v46, %v5284_v8 }
0x1c19   :  { %v2768_v25 = vadd.f32 %v5593_v18, %v5591_v7  ;;  %v4038_v38 = vpop.eup %4037 }
0x1c1a   :  { %v2498_v31 = vmax.f32 %v5621_v36, %v5616_v41  ;;  %v5632_v48 = vmul.f32 %v4038_v38, %v5461_v14 }
0x1c1b   :  { %2769 = vadd.xlane.f32.xlu0 %v2768_v25  ;;  %v5618_v25 = vpop.f32.mrf.mxu1 }
0x1c1c   :  { %6388 = vst [vmem:[#allocation29_spill] sm:$0xff] %v5632_v48 }
0x1c1d   :  { %v2376_v32 = vpop.f32.mrf.mxu1 }
0x1c1e   :  { %v5670_v57 = vadd.f32 %v2376_v32, %v5280_v6 }
0x1c1f   :  { %2487 = vmax.xlane.f32.xlu0 %v2486_v37  ;;  %v2378_v15 = vpop.f32.mrf.mxu1 }
0x1c21   :  { %v5625_v37 = vpop.f32.mrf.mxu1 }
0x1c23   :  { %2493 = vmax.xlane.f32.xlu0 %v2492_v13  ;;  %v5627_v51 = vpop.f32.mrf.mxu1 }
0x1c25   :  { %v2388_v46 = vpop.f32.mrf.mxu1 }
0x1c26   :  { %v5682_v32 = vadd.f32 %v2388_v46, %v5280_v6 }
0x1c27   :  { %2499 = vmax.xlane.f32.xlu0 %v2498_v31  ;;  %v2390_v45 = vpop.f32.mrf.mxu1  ;;  %v5637_v31 = vpop.permute.xlu1 %3074 }
0x1c28   :  { %6389 = vst [vmem:[#allocation30_spill] sm:$0xff] %v5637_v31  ;;  %v5675_v62 = vadd.f32 %v2390_v45, %v5284_v8 }
0x1c29   :  { %v5634_v13 = vpop.f32.mrf.mxu1 }
0x1c2b   :  { %v5639_v27 = vpop.f32.mrf.mxu1  ;;  %v5642_v59 = vpop.permute.xlu1 %3078 }
0x1c2c   :  { %6391 = vst [vmem:[#allocation31_spill] sm:$0xff] %v5642_v59 }
0x1c2d   :  { %v2400_v42 = vpop.f32.mrf.mxu1 }
0x1c2e   :  { %v5692_v46 = vadd.f32 %v2400_v42, %v5280_v6 }
0x1c2f   :  { %v2402_v5 = vpop.f32.mrf.mxu1  ;;  %v5644_v21 = vpop.permute.xlu1 %3086 }
0x1c30   :  { %6392 = vst [vmem:[#allocation32_spill] sm:$0xff] %v5644_v21  ;;  %v5663_v21 = vadd.f32 %v2378_v15, %v5284_v8  ;;  %v5687_v45 = vadd.f32 %v2402_v5, %v5284_v8 }
0x1c31   :  { %v5646_v49 = vpop.f32.mrf.mxu1 }
0x1c32   :  { %v2516_v12 = vmax.f32 %v5670_v57, %v5663_v21 }
0x1c33   :  { %v5648_v14 = vpop.permute.xlu1 %3134  ;;  %v5650_v38 = vpop.f32.mrf.mxu1 }
0x1c34   :  { %6393 = vst [vmem:[#allocation33_spill] sm:$0xff] %v5648_v14 }
0x1c35   :  { %v2412_v58 = vpop.f32.mrf.mxu1 }
0x1c37   :  { %v5655_v31 = vpop.permute.xlu1 %3138  ;;  %v2414_v40 = vpop.f32.mrf.mxu1 }
0x1c38   :  { %6394 = vst [vmem:[#allocation34_spill] sm:$0xff] %v5655_v31  ;;  %v5697_v5 = vadd.f32 %v2414_v40, %v5284_v8 }
0x1c39   :  { %v5665_v14 = vpop.f32.mrf.mxu1 }
0x1c3b   :  { %v5677_v3 = vpop.f32.mrf.mxu1 }
0x1c3d   :  { %3030 = vperm.xlu0 %3826, %v5632_v48   ;;  %v2424_v0 = vpop.f32.mrf.mxu1 }
0x1c41   :  { %3830 = vset.pattern.permute.xlu0 %v6390_v17 }
0x1c5a   :  { %v2473_v59 = vpop.xlane.xlu1 %2472 }
0x1c5b   :  { %v2565_v55 = vsub.f32 %v5511_v2, %v2473_v59  ;;  %v2566_v54 = vsub.f32 %v5505_v50, %v2473_v59 }
0x1c5c   :  { %2511 = vmax.xlane.f32.xlu0 %v2510_v28 }
0x1c5d   :  { %v2633_v31 = vmul.f32 1.442695, %v2565_v55  ;;  %v2635_v44 = vmul.f32 1.442695, %v2566_v54  ;;  %v2522_v55 = vmax.f32 %v5682_v32, %v5675_v62 }
0x1c5e   :  { %v2479_v15 = vpop.xlane.xlu1 %2478 }
0x1c5f   :  { %4039 = vpow2.f32 %v2633_v31  ;;  %v2569_v2 = vsub.f32 %v5523_v53, %v2479_v15  ;;  %v2570_v50 = vsub.f32 %v5517_v9, %v2479_v15  ;;  %v2426_v15 = vpop.f32.mrf.mxu1 }
0x1c60   :  { %4041 = vpow2.f32 %v2635_v44  ;;  %2517 = vmax.xlane.f32.xlu0 %v2516_v12  ;;  %v2528_v44 = vmax.f32 %v5692_v46, %v5687_v45 }
0x1c61   :  { %v2641_v28 = vmul.f32 1.442695, %v2569_v2  ;;  %v2643_v59 = vmul.f32 1.442695, %v2570_v50  ;;  %v5700_v2 = vadd.f32 %v2412_v58, %v5280_v6  ;;  %v5710_v50 = vadd.f32 %v2424_v0, %v5280_v6 }
0x1c62   :  { %v2485_v54 = vpop.xlane.xlu1 %2484 }
0x1c63   :  { %4043 = vpow2.f32 %v2641_v28  ;;  %v2573_v53 = vsub.f32 %v5533_v4, %v2485_v54  ;;  %v2574_v9 = vsub.f32 %v5528_v47, %v2485_v54  ;;  %v2534_v42 = vmax.f32 %v5700_v2, %v5697_v5 }
0x1c64   :  { %4045 = vpow2.f32 %v2643_v59  ;;  %2523 = vmax.xlane.f32.xlu0 %v2522_v55  ;;  %v5705_v47 = vadd.f32 %v2426_v15, %v5284_v8  ;;  %v5742_v15 = vadd.f32 %v5589_v34, %v5284_v8  ;;  %v5756_v34 = vpop.f32.mrf.mxu1 }
0x1c65   :  { %v2649_v12 = vmul.f32 1.442695, %v2573_v53  ;;  %v2651_v31 = vmul.f32 1.442695, %v2574_v9  ;;  %v5730_v9 = vadd.f32 %v5567_v52, %v5284_v8 }
0x1c66   :  { %v2540_v58 = vmax.f32 %v5710_v50, %v5705_v47 }
0x1c67   :  { %4047 = vpow2.f32 %v2649_v12 }
0x1c68   :  { %4049 = vpow2.f32 %v2651_v31  ;;  %2529 = vmax.xlane.f32.xlu0 %v2528_v44  ;;  %v5736_v31 = vadd.f32 %v5561_v30, %v5280_v6  ;;  %v6399_v30 = vmov 2  }
0x1c6a   :  { %v2489_v44 = vmax.f32 %v5736_v31, %v5730_v9 }
0x1c6c   :  { %v5707_v4 = vpop.eup %4039  ;;  %2535 = vmax.xlane.f32.xlu0 %v2534_v42  ;;  %v5746_v42 = vadd.f32 %v5581_v35, %v5280_v6  ;;  %v5760_v35 = vpop.f32.mrf.mxu1 }
0x1c6d   :  { %6395 = vst [vmem:[#allocation35_spill] sm:$0xff] %v5707_v4  ;;  %v5712_v40 = vpop.eup %4041 }
0x1c6e   :  { %6396 = vst [vmem:[#allocation36_spill] sm:$0xff] %v5712_v40  ;;  %v2759_v28 = vadd.f32 %v5712_v40, %v5707_v4  ;;  %v2495_v52 = vmax.f32 %v5746_v42, %v5742_v15 }
0x1c70   :  { %v5718_v59 = vpop.eup %4043  ;;  %2541 = vmax.xlane.f32.xlu0 %v2540_v58  ;;  %2760 = vadd.xlane.f32.xlu1 %v2759_v28  ;;  %v5754_v58 = vpop.xlane.xlu0 %2757 }
0x1c71   :  { %v5720_v55 = vpop.eup %4045  ;;  %6400 = vst [vmem:[#allocation39_spill] sm:$0xff] %v5754_v58 }
0x1c72   :  { %v2765_v54 = vadd.f32 %v5720_v55, %v5718_v59 }
0x1c74   :  { %v5724_v0 = vpop.eup %4047  ;;  %2766 = vadd.xlane.f32.xlu1 %v2765_v54 }
0x1c75   :  { %6397 = vst [vmem:[#allocation37_spill] sm:$0xff] %v5724_v0  ;;  %v5726_v53 = vpop.eup %4049 }
0x1c76   :  { %6398 = vst [vmem:[#allocation38_spill] sm:$0xff] %v5726_v53  ;;  %v2771_v12 = vadd.f32 %v5726_v53, %v5724_v0 }
0x1c78   :  { %2772 = vadd.xlane.f32.xlu1 %v2771_v12  ;;  %v2436_v12 = vpop.f32.mrf.mxu1 }
0x1c7a   :  { %v2438_v40 = vpop.f32.mrf.mxu1 }
0x1c7c   :  { %2490 = vmax.xlane.f32.xlu1 %v2489_v44 }
0x1c80   :  { %2496 = vmax.xlane.f32.xlu1 %v2495_v52 }
0x1c91   :  { %2982 = vperm.xlu1 %3827, %v5632_v48  }
0x1c95   :  { %3828 = vset.pattern.permute.xlu1 %v6399_v30 }
0x1c96   :  { %3094 = vperm.xlu1 %3828, %v5632_v48  }
0x1c9a   :  { %3829 = vset.pattern.permute.xlu1 %v6390_v17 }
0x1ca0   :  { %v5758_v28 = vpop.xlane.xlu0 %2763 }
0x1ca1   :  { %6401 = vst [vmem:[#allocation40_spill] sm:$0xff] %v5758_v28  ;;  %v5766_v28 = vpop.f32.mrf.mxu1 }
0x1ca3   :  { %v5768_v60 = vpop.f32.mrf.mxu1 }
0x1ca4   :  { %v2770_v54 = vpop.xlane.xlu0 %2769 }
0x1ca5   :  { %4051 = vrcp.f32 %v2770_v54 }
0x1ca8   :  { %v2488_v44 = vpop.xlane.xlu0 %2487 }
0x1ca9   :  { %v2575_v52 = vsub.f32 %v5601_v43, %v2488_v44  ;;  %v2576_v30 = vsub.f32 %v5596_v26, %v2488_v44  ;;  %v5811_v44 = vadd.f32 %v2438_v40, %v5284_v8 }
0x1cab   :  { %v2653_v4 = vmul.f32 1.442695, %v2575_v52  ;;  %v2655_v48 = vmul.f32 1.442695, %v2576_v30  ;;  %v5817_v52 = vadd.f32 %v5634_v13, %v5280_v6  ;;  %v5820_v30 = vadd.f32 %v2436_v12, %v5280_v6 }
0x1cac   :  { %v2494_v17 = vpop.xlane.xlu0 %2493  ;;  %v5838_v12 = vadd.f32 %v5646_v49, %v5280_v6  ;;  %v5855_v49 = vadd.f32 %v5665_v14, %v5280_v6 }
0x1cad   :  { %4053 = vpow2.f32 %v2653_v4  ;;  %v2579_v58 = vsub.f32 %v5611_v10, %v2494_v17  ;;  %v2580_v16 = vsub.f32 %v5606_v20, %v2494_v17  ;;  %v5775_v10 = vadd.f32 %v5618_v25, %v5284_v8 }
0x1cae   :  { %4055 = vpow2.f32 %v2655_v48  ;;  %v2546_v13 = vmax.f32 %v5820_v30, %v5811_v44 }
0x1caf   :  { %v2661_v22 = vmul.f32 1.442695, %v2579_v58  ;;  %v2663_v54 = vmul.f32 1.442695, %v2580_v16  ;;  %v5782_v58 = vadd.f32 %v5608_v11, %v5280_v6  ;;  %v5798_v11 = vadd.f32 %v5625_v37, %v5280_v6 }
0x1cb0   :  { %v2500_v53 = vpop.xlane.xlu0 %2499 }
0x1cb1   :  { %4057 = vpow2.f32 %v2661_v22  ;;  %v2583_v4 = vsub.f32 %v5621_v36, %v2500_v53  ;;  %v2584_v20 = vsub.f32 %v5616_v41, %v2500_v53  ;;  %v5786_v22 = vadd.f32 %v5627_v51, %v5284_v8  ;;  %v2448_v36 = vpop.f32.mrf.mxu1 }
0x1cb2   :  { %v4052_v0 = vpop.eup %4051  ;;  %4059 = vpow2.f32 %v2663_v54  ;;  %v2513_v25 = vmax.f32 %v5782_v58, %v5775_v10  ;;  %v5830_v54 = vadd.f32 %v5650_v38, %v5284_v8  ;;  %v5846_v38 = vadd.f32 %v5677_v3, %v5284_v8 }
0x1cb3   :  { %v2891_v26 = vmul.f32 %v4052_v0, %v5591_v7  ;;  %v2892_v43 = vmul.f32 %v4052_v0, %v5593_v18  ;;  %v2669_v41 = vmul.f32 1.442695, %v2583_v4  ;;  %v2450_v53 = vpop.f32.mrf.mxu1 }
0x1cb4   :  { %v2531_v4 = vmax.f32 %v5838_v12, %v5830_v54  ;;  %v2537_v3 = vmax.f32 %v5855_v49, %v5846_v38 }
0x1cb5   :  { %v2995_v16 = vmul.f32 %v5555_v61, %v2891_v26  ;;  %v2996_v48 = vmul.f32 %v5555_v61, %v2892_v43  ;;  %v2671_v61 = vmul.f32 1.442695, %v2584_v20  ;;  %4061 = vpow2.f32 %v2669_v41  ;;  %v5822_v17 = vpop.f32.mrf.mxu1 }
0x1cb6   :  { %v5849_v20 = vadd.f32 %v2450_v53, %v5284_v8  ;;  %v5858_v41 = vadd.f32 %v2448_v36, %v5280_v6  ;;  %v5874_v36 = vadd.f32 %v5756_v34, %v5280_v6 }
0x1cb7   :  { %v5789_v7 = vadd.f32 %v5535_v19, %v2995_v16  ;;  %v5792_v18 = vadd.f32 %v5537_v29, %v2996_v48  ;;  %v2519_v19 = vmax.f32 %v5798_v11, %v5786_v22  ;;  %v5808_v29 = vadd.f32 %v5639_v27, %v5284_v8  ;;  %v5840_v43 = vpop.f32.mrf.mxu1 }
0x1cb8   :  { %4063 = vpow2.f32 %v2671_v61  ;;  %v5866_v61 = vadd.f32 %v5760_v35, %v5284_v8 }
0x1cb9   :  { %6402 = vst [vmem:[#allocation41_spill] sm:$0xff] %v5789_v7  ;;  %6403 = vst [vmem:[#allocation42_spill] sm:$0xff] %v5792_v18  ;;  %v2525_v40 = vmax.f32 %v5817_v52, %v5808_v29  ;;  %v2460_v48 = vpop.f32.mrf.mxu1 }
0x1cba   :  { %v5800_v0 = vpop.eup %4053  ;;  %2514 = vmax.xlane.f32.xlu1 %v2513_v25 }
0x1cbb   :  { %v5802_v51 = vpop.eup %4055  ;;  %v2462_v14 = vpop.f32.mrf.mxu1 }
0x1cbc   :  { %v2774_v37 = vadd.f32 %v5802_v51, %v5800_v0 }
0x1cbe   :  { %2775 = vadd.xlane.f32.xlu0 %v2774_v37  ;;  %2520 = vmax.xlane.f32.xlu1 %v2519_v19  ;;  %v5824_v27 = vpop.eup %4057  ;;  %v2552_v19 = vmax.f32 %v5858_v41, %v5849_v20  ;;  %v2543_v37 = vmax.f32 %v5874_v36, %v5866_v61 }
0x1cbf   :  { %6404 = vst [vmem:[#allocation43_spill] sm:$0xff] %v5824_v27  ;;  %v5834_v26 = vpop.eup %4059 }
0x1cc0   :  { %6405 = vst [vmem:[#allocation44_spill] sm:$0xff] %v5834_v26  ;;  %v2780_v16 = vadd.f32 %v5834_v26, %v5824_v27 }
0x1cc2   :  { %2547 = vmax.xlane.f32.xlu0 %v2546_v13  ;;  %2526 = vmax.xlane.f32.xlu1 %v2525_v40  ;;  %v5860_v25 = vpop.eup %4061  ;;  %v5879_v40 = vadd.f32 %v2462_v14, %v5284_v8  ;;  %v5884_v13 = vadd.f32 %v2460_v48, %v5280_v6 }
0x1cc4   :  { %v2558_v34 = vmax.f32 %v5884_v13, %v5879_v40 }
0x1cc5   :  { %v5870_v53 = vpop.eup %4063 }
0x1cc6   :  { %2781 = vadd.xlane.f32.xlu0 %v2780_v16  ;;  %2532 = vmax.xlane.f32.xlu1 %v2531_v4  ;;  %v2786_v35 = vadd.f32 %v5870_v53, %v5860_v25  ;;  %v5888_v4 = vpop.permute.xlu0 %3030 }
0x1cc7   :  { %6406 = vst [vmem:[#allocation45_spill] sm:$0xff] %v5888_v4  ;;  %v5896_v4 = vpop.xlane.xlu1 %2754 }
0x1cca   :  { %2553 = vmax.xlane.f32.xlu0 %v2552_v19  ;;  %2538 = vmax.xlane.f32.xlu1 %v2537_v3 }
0x1cce   :  { %2787 = vadd.xlane.f32.xlu0 %v2786_v35  ;;  %2544 = vmax.xlane.f32.xlu1 %v2543_v37 }
0x1cd2   :  { %2559 = vmax.xlane.f32.xlu0 %v2558_v34 }
0x1ce5   :  { %v2512_v16 = vpop.xlane.xlu0 %2511 }
0x1ce6   :  { %v2591_v19 = vsub.f32 %v5658_v33, %v2512_v16  ;;  %v2592_v14 = vsub.f32 %v5653_v39, %v2512_v16 }
0x1ce8   :  { %3150 = vperm.xlu0 %3830, %v5414_v56   ;;  %v2685_v7 = vmul.f32 1.442695, %v2591_v19  ;;  %v2687_v35 = vmul.f32 1.442695, %v2592_v14 }
0x1ce9   :  { %v2518_v3 = vpop.xlane.xlu0 %2517 }
0x1cea   :  { %v2595_v48 = vsub.f32 %v5670_v57, %v2518_v3  ;;  %v2596_v37 = vsub.f32 %v5663_v21, %v2518_v3  ;;  %4065 = vpow2.f32 %v2685_v7 }
0x1ceb   :  { %4067 = vpow2.f32 %v2687_v35 }
0x1cec   :  { %v2693_v34 = vmul.f32 1.442695, %v2595_v48  ;;  %v2695_v56 = vmul.f32 1.442695, %v2596_v37 }
0x1ced   :  { %v2524_v18 = vpop.xlane.xlu0 %2523 }
0x1cee   :  { %v2599_v27 = vsub.f32 %v5682_v32, %v2524_v18  ;;  %v2600_v33 = vsub.f32 %v5675_v62, %v2524_v18  ;;  %4069 = vpow2.f32 %v2693_v34 }
0x1cef   :  { %4071 = vpow2.f32 %v2695_v56 }
0x1cf0   :  { %v2701_v19 = vmul.f32 1.442695, %v2599_v27  ;;  %v2703_v57 = vmul.f32 1.442695, %v2600_v33  ;;  %4073 = vrcp.f32 %v5484_v63 }
0x1cf1   :  { %v2530_v26 = vpop.xlane.xlu0 %2529 }
0x1cf2   :  { %v2603_v39 = vsub.f32 %v5692_v46, %v2530_v26  ;;  %v2604_v21 = vsub.f32 %v5687_v45, %v2530_v26  ;;  %4075 = vpow2.f32 %v2701_v19 }
0x1cf3   :  { %4077 = vpow2.f32 %v2703_v57 }
0x1cf4   :  { %v2709_v32 = vmul.f32 1.442695, %v2603_v39  ;;  %v2711_v14 = vmul.f32 1.442695, %v2604_v21 }
0x1cf5   :  { %v2536_v16 = vpop.xlane.xlu0 %2535 }
0x1cf6   :  { %v2607_v7 = vsub.f32 %v5700_v2, %v2536_v16  ;;  %v2608_v62 = vsub.f32 %v5697_v5, %v2536_v16  ;;  %4079 = vpow2.f32 %v2709_v32 }
0x1cf7   :  { %v5907_v45 = vpop.eup %4065 }
0x1cf8   :  { %v2717_v27 = vmul.f32 1.442695, %v2607_v7  ;;  %v2719_v26 = vmul.f32 1.442695, %v2608_v62  ;;  %v5910_v37 = vpop.eup %4067 }
0x1cf9   :  { %v5901_v3 = vpop.xlane.xlu1 %2760  ;;  %v2542_v46 = vpop.xlane.xlu0 %2541 }
0x1cfa   :  { %v2611_v48 = vsub.f32 %v5710_v50, %v2542_v46  ;;  %v2612_v63 = vsub.f32 %v5705_v47, %v2542_v46  ;;  %v2798_v50 = vadd.f32 %v5910_v37, %v5907_v45 }
0x1cfb   :  { %v5912_v5 = vpop.eup %4069 }
0x1cfc   :  { %v2725_v2 = vmul.f32 1.442695, %v2611_v48  ;;  %v2727_v34 = vmul.f32 1.442695, %v2612_v63  ;;  %v5916_v33 = vpop.eup %4071 }
0x1cfd   :  { %v2767_v18 = vpop.xlane.xlu1 %2766  ;;  %v4074_v16 = vpop.eup %4073  ;;  %v2804_v7 = vadd.f32 %v5916_v33, %v5912_v5 }
0x1cfe   :  { %4081 = vrcp.f32 %v2767_v18  ;;  %v2906_v48 = vmul.f32 %v4074_v16, %v5339_v24 }
0x1cff   :  { %4083 = vpow2.f32 %v2711_v14  ;;  %v5920_v21 = vpop.eup %4075 }
0x1d00   :  { %v5924_v14 = vpop.eup %4077 }
0x1d01   :  { %v2773_v35 = vpop.xlane.xlu1 %2772  ;;  %v2810_v63 = vadd.f32 %v5924_v14, %v5920_v21 }
0x1d02   :  { %4085 = vrcp.f32 %v2773_v35 }
0x1d03   :  { %4087 = vpow2.f32 %v2717_v27  ;;  %v2905_v27 = vmul.f32 %v4074_v16, %v5336_v23  ;;  %v6407_v23 = vld [vmem:[#allocation19_spill] sm:$0xff]  ;;  %v6409_v16 = vld [vmem:[#allocation38_spill] sm:$0xff] }
0x1d04   :  { %4089 = vpow2.f32 %v2719_v26 }
0x1d05   :  { %v2491_v56 = vpop.xlane.xlu1 %2490  ;;  %4091 = vpow2.f32 %v2725_v2 }
0x1d06   :  { %v2577_v39 = vsub.f32 %v5736_v31, %v2491_v56  ;;  %v2578_v47 = vsub.f32 %v5730_v9, %v2491_v56  ;;  %4093 = vpow2.f32 %v2727_v34  ;;  %v5928_v31 = vpop.eup %4079  ;;  %v3041_v34 = vmul.f32 %v5573_v1, %v2905_v27  ;;  %v6412_v27 = vld [vmem:[#allocation25_spill] sm:$0xff] }
0x1d07   :  { %2799 = vadd.xlane.f32.xlu0 %v2798_v50  ;;  %v3042_v56 = vmul.f32 %v5573_v1, %v2906_v48 }
0x1d08   :  { %v2657_v19 = vmul.f32 1.442695, %v2577_v39  ;;  %v2659_v57 = vmul.f32 1.442695, %v2578_v47  ;;  %v6408_v39 = vld [vmem:[#allocation37_spill] sm:$0xff] }
0x1d09   :  { %v2497_v32 = vpop.xlane.xlu1 %2496 }
0x1d0a   :  { %4095 = vpow2.f32 %v2657_v19  ;;  %v2581_v62 = vsub.f32 %v5746_v42, %v2497_v32  ;;  %v2582_v9 = vsub.f32 %v5742_v15, %v2497_v32 }
0x1d0b   :  { %4097 = vpow2.f32 %v2659_v57  ;;  %2805 = vadd.xlane.f32.xlu0 %v2804_v7  ;;  %v4082_v18 = vpop.eup %4081  ;;  %v6410_v7 = vld [vmem:[#allocation20_spill] sm:$0xff] }
0x1d0c   :  { %v2665_v46 = vmul.f32 1.442695, %v2581_v62  ;;  %v2667_v26 = vmul.f32 1.442695, %v2582_v9  ;;  %v5934_v35 = vpop.eup %4083  ;;  %v2889_v42 = vmul.f32 %v4082_v18, %v5718_v59  ;;  %v2890_v2 = vmul.f32 %v4082_v18, %v5720_v55 }
0x1d0d   :  { %v2816_v59 = vadd.f32 %v5934_v35, %v5928_v31 }
0x1d0e   :  { %4099 = vpow2.f32 %v2665_v46  ;;  %v2993_v50 = vmul.f32 %v6407_v23, %v2889_v42  ;;  %v2994_v24 = vmul.f32 %v6407_v23, %v2890_v2  ;;  %v6411_v46 = vld [vmem:[#allocation24_spill] sm:$0xff] }
0x1d0f   :  { %v4086_v15 = vpop.eup %4085  ;;  %2811 = vadd.xlane.f32.xlu0 %v2810_v63  ;;  %4101 = vpow2.f32 %v2667_v26 }
0x1d10   :  { %v2893_v47 = vmul.f32 %v4086_v15, %v6408_v39  ;;  %v2894_v19 = vmul.f32 %v4086_v15, %v6409_v16  ;;  %v5944_v57 = vpop.eup %4087  ;;  %v5950_v32 = vadd.f32 %v3041_v34, %v2993_v50  ;;  %v5952_v1 = vadd.f32 %v3042_v56, %v2994_v24 }
0x1d11   :  { %v5948_v55 = vpop.eup %4089  ;;  %v5974_v34 = vadd.f32 %v5768_v60, %v5284_v8  ;;  %v5982_v50 = vadd.f32 %v5766_v28, %v5280_v6  ;;  %v5992_v60 = vadd.f32 %v5840_v43, %v5284_v8  ;;  %v5998_v28 = vadd.f32 %v5822_v17, %v5280_v6 }
0x1d12   :  { %v2997_v62 = vmul.f32 %v6410_v7, %v2893_v47  ;;  %v2998_v9 = vmul.f32 %v6410_v7, %v2894_v19  ;;  %v5962_v26 = vpop.eup %4091  ;;  %v2822_v63 = vadd.f32 %v5948_v55, %v5944_v57  ;;  %v6003_v7 = vpop.permute.xlu1 %2982 }
0x1d13   :  { %2817 = vadd.xlane.f32.xlu0 %v2816_v59  ;;  %v5966_v42 = vpop.eup %4093  ;;  %v2549_v39 = vmax.f32 %v5982_v50, %v5974_v34  ;;  %v2555_v19 = vmax.f32 %v5998_v28, %v5992_v60  ;;  %v6414_v59 = vld [vmem:[#allocation3_spill] sm:$0xff] }
0x1d14   :  { %v5957_v18 = vadd.f32 %v6411_v46, %v2997_v62  ;;  %v5960_v48 = vadd.f32 %v6412_v27, %v2998_v9  ;;  %v2828_v56 = vadd.f32 %v5966_v42, %v5962_v26 }
0x1d16   :  { %6413 = vst [vmem:[#allocation19_spill] sm:$0xff] %v5960_v48  ;;  %v6005_v62 = vpop.permute.xlu1 %3094 }
0x1d17   :  { %v5968_v2 = vpop.eup %4095  ;;  %2823 = vadd.xlane.f32.xlu0 %v2822_v63 }
0x1d18   :  { %v5970_v15 = vpop.eup %4097 }
0x1d19   :  { %v2777_v23 = vadd.f32 %v5970_v15, %v5968_v2 }
0x1d1b   :  { %2829 = vadd.xlane.f32.xlu0 %v2828_v56  ;;  %2778 = vadd.xlane.f32.xlu1 %v2777_v23  ;;  %v5984_v24 = vpop.eup %4099 }
0x1d1c   :  { %v5988_v47 = vpop.eup %4101 }
0x1d1d   :  { %v2783_v16 = vadd.f32 %v5988_v47, %v5984_v24 }
0x1d1f   :  { %2550 = vmax.xlane.f32.xlu1 %v2549_v39 }
0x1d23   :  { %2784 = vadd.xlane.f32.xlu1 %v2783_v16 }
0x1d27   :  { %2556 = vmax.xlane.f32.xlu1 %v2555_v19 }
0x1d38   :  { %3146 = vperm.xlu1 %3829, %v6414_v59  }
0x1d43   :  { %v2515_v8 = vpop.xlane.xlu1 %2514 }
0x1d44   :  { %v2593_v43 = vsub.f32 %v5782_v58, %v2515_v8  ;;  %v2594_v9 = vsub.f32 %v5775_v10, %v2515_v8 }
0x1d46   :  { %v2689_v46 = vmul.f32 1.442695, %v2593_v43  ;;  %v2691_v27 = vmul.f32 1.442695, %v2594_v9 }
0x1d47   :  { %v6009_v6 = vpop.xlane.xlu0 %2775  ;;  %v2521_v17 = vpop.xlane.xlu1 %2520 }
0x1d48   :  { %v2597_v63 = vsub.f32 %v5798_v11, %v2521_v17  ;;  %v2598_v56 = vsub.f32 %v5786_v22, %v2521_v17  ;;  %4103 = vpow2.f32 %v2689_v46 }
0x1d49   :  { %4105 = vpow2.f32 %v2691_v27 }
0x1d4a   :  { %v2697_v23 = vmul.f32 1.442695, %v2597_v63  ;;  %v2699_v39 = vmul.f32 1.442695, %v2598_v56 }
0x1d4b   :  { %v2548_v16 = vpop.xlane.xlu0 %2547  ;;  %v2527_v19 = vpop.xlane.xlu1 %2526 }
0x1d4c   :  { %v2615_v59 = vsub.f32 %v5820_v30, %v2548_v16  ;;  %v2616_v58 = vsub.f32 %v5811_v44, %v2548_v16  ;;  %v2601_v10 = vsub.f32 %v5817_v52, %v2527_v19  ;;  %4107 = vpow2.f32 %v2697_v23 }
0x1d4d   :  { %v2602_v8 = vsub.f32 %v5808_v29, %v2527_v19  ;;  %4109 = vpow2.f32 %v2699_v39 }
0x1d4e   :  { %v2733_v43 = vmul.f32 1.442695, %v2615_v59  ;;  %v2735_v11 = vmul.f32 1.442695, %v2616_v58  ;;  %v2705_v9 = vmul.f32 1.442695, %v2601_v10 }
0x1d4f   :  { %v2707_v22 = vmul.f32 1.442695, %v2602_v8  ;;  %v6017_v46 = vpop.xlane.xlu0 %2781  ;;  %v2533_v27 = vpop.xlane.xlu1 %2532  ;;  %v6415_v10 = vld [vmem:[#allocation40_spill] sm:$0xff] }
0x1d50   :  { %4111 = vpow2.f32 %v2733_v43  ;;  %v2605_v17 = vsub.f32 %v5838_v12, %v2533_v27  ;;  %v2606_v30 = vsub.f32 %v5830_v54, %v2533_v27 }
0x1d51   :  { %4113 = vpow2.f32 %v2735_v11 }
0x1d52   :  { %4115 = vpow2.f32 %v2705_v9  ;;  %v2713_v44 = vmul.f32 1.442695, %v2605_v17  ;;  %v2715_v52 = vmul.f32 1.442695, %v2606_v30 }
0x1d53   :  { %4117 = vpow2.f32 %v2707_v22  ;;  %v2554_v63 = vpop.xlane.xlu0 %2553  ;;  %v2539_v29 = vpop.xlane.xlu1 %2538 }
0x1d54   :  { %v2619_v56 = vsub.f32 %v5858_v41, %v2554_v63  ;;  %v2620_v23 = vsub.f32 %v5849_v20, %v2554_v63  ;;  %v2609_v39 = vsub.f32 %v5855_v49, %v2539_v29  ;;  %4119 = vpow2.f32 %v2713_v44 }
0x1d55   :  { %v2610_v16 = vsub.f32 %v5846_v38, %v2539_v29  ;;  %v6025_v19 = vpop.eup %4103  ;;  %4121 = vpow2.f32 %v2715_v52 }
0x1d56   :  { %v2741_v54 = vmul.f32 1.442695, %v2619_v56  ;;  %v2743_v12 = vmul.f32 1.442695, %v2620_v23  ;;  %v2721_v59 = vmul.f32 1.442695, %v2609_v39  ;;  %v6027_v58 = vpop.eup %4105  ;;  %4123 = vrcp.f32 %v6415_v10 }
0x1d57   :  { %v2723_v8 = vmul.f32 1.442695, %v2610_v16  ;;  %v2788_v43 = vpop.xlane.xlu0 %2787  ;;  %v2545_v41 = vpop.xlane.xlu1 %2544  ;;  %v2801_v22 = vadd.f32 %v6027_v58, %v6025_v19 }
0x1d58   :  { %4125 = vpow2.f32 %v2741_v54  ;;  %v2613_v20 = vsub.f32 %v5874_v36, %v2545_v41  ;;  %v2614_v49 = vsub.f32 %v5866_v61, %v2545_v41 }
0x1d59   :  { %4127 = vpow2.f32 %v2743_v12  ;;  %v6032_v38 = vpop.eup %4107 }
0x1d5a   :  { %4129 = vpow2.f32 %v2721_v59  ;;  %v2729_v11 = vmul.f32 1.442695, %v2613_v20  ;;  %v2731_v9 = vmul.f32 1.442695, %v2614_v49  ;;  %v6036_v27 = vpop.eup %4109  ;;  %v6416_v20 = vld [vmem:[#allocation26_spill] sm:$0xff] }
0x1d5b   :  { %4131 = vpow2.f32 %v2723_v8  ;;  %v2560_v17 = vpop.xlane.xlu0 %2559  ;;  %v2807_v29 = vadd.f32 %v6036_v27, %v6032_v38 }
0x1d5c   :  { %4133 = vrcp.f32 %v2788_v43  ;;  %v2623_v30 = vsub.f32 %v5884_v13, %v2560_v17  ;;  %v2624_v36 = vsub.f32 %v5879_v40, %v2560_v17  ;;  %2802 = vadd.xlane.f32.xlu1 %v2801_v22 }
0x1d5d   :  { %v6040_v61 = vpop.eup %4111  ;;  %4135 = vpow2.f32 %v2729_v11  ;;  %v6417_v11 = vld [vmem:[#allocation27_spill] sm:$0xff] }
0x1d5e   :  { %v6042_v44 = vpop.eup %4113  ;;  %4137 = vpow2.f32 %v2731_v9  ;;  %v2749_v52 = vmul.f32 1.442695, %v2623_v30  ;;  %v2751_v63 = vmul.f32 1.442695, %v2624_v36 }
0x1d5f   :  { %v6046_v56 = vpop.eup %4115  ;;  %v2834_v23 = vadd.f32 %v6042_v44, %v6040_v61 }
0x1d60   :  { %v6050_v13 = vpop.eup %4117  ;;  %4139 = vpow2.f32 %v2749_v52  ;;  %2808 = vadd.xlane.f32.xlu1 %v2807_v29  ;;  %v6420_v29 = vld [vmem:[#allocation18_spill] sm:$0xff] }
0x1d61   :  { %4141 = vpow2.f32 %v2751_v63  ;;  %2835 = vadd.xlane.f32.xlu0 %v2834_v23  ;;  %v6052_v40 = vpop.eup %4119  ;;  %v2813_v39 = vadd.f32 %v6050_v13, %v6046_v56 }
0x1d62   :  { %v6056_v16 = vpop.eup %4121  ;;  %4143 = vrcp.f32 %v6009_v6 }
0x1d63   :  { %v4124_v54 = vpop.eup %4123  ;;  %v2819_v10 = vadd.f32 %v6056_v16, %v6052_v40 }
0x1d64   :  { %2814 = vadd.xlane.f32.xlu1 %v2813_v39  ;;  %v2887_v49 = vmul.f32 %v4124_v54, %v6416_v20  ;;  %v2888_v9 = vmul.f32 %v4124_v54, %v6417_v11  ;;  %v6421_v20 = vld [vmem:[#allocation23_spill] sm:$0xff] }
0x1d65   :  { %v6058_v12 = vpop.eup %4125 }
0x1d66   :  { %v6060_v59 = vpop.eup %4127  ;;  %v2991_v23 = vmul.f32 %v6420_v29, %v2887_v49  ;;  %v2992_v39 = vmul.f32 %v6420_v29, %v2888_v9  ;;  %v6424_v49 = vld [vmem:[#allocation29_spill] sm:$0xff]  ;;  %v6094_v9 = vpop.permute.xlu0 %3150 }
0x1d67   :  { %v6064_v8 = vpop.eup %4129  ;;  %v2840_v43 = vadd.f32 %v6060_v59, %v6058_v12 }
0x1d68   :  { %v6068_v41 = vpop.eup %4131  ;;  %2820 = vadd.xlane.f32.xlu1 %v2819_v10 }
0x1d69   :  { %v4134_v22 = vpop.eup %4133  ;;  %2841 = vadd.xlane.f32.xlu0 %v2840_v43  ;;  %v2825_v52 = vadd.f32 %v6068_v41, %v6064_v8 }
0x1d6a   :  { %v6072_v17 = vpop.eup %4135  ;;  %v2903_v30 = vmul.f32 %v4134_v22, %v5860_v25  ;;  %v2904_v36 = vmul.f32 %v4134_v22, %v5870_v53 }
0x1d6b   :  { %6418 = vst [vmem:[#allocation37_spill] sm:$0xff] %v6072_v17  ;;  %v6078_v63 = vpop.eup %4137 }
0x1d6c   :  { %6419 = vst [vmem:[#allocation38_spill] sm:$0xff] %v6078_v63  ;;  %v3039_v54 = vmul.f32 %v6421_v20, %v2903_v30  ;;  %v3040_v10 = vmul.f32 %v6421_v20, %v2904_v36  ;;  %2826 = vadd.xlane.f32.xlu1 %v2825_v52  ;;  %v2831_v22 = vadd.f32 %v6078_v63, %v6072_v17  ;;  %v6425_v52 = vld [vmem:[#allocation39_spill] sm:$0xff] }
0x1d6d   :  { %v6084_v43 = vpop.eup %4139 }
0x1d6e   :  { %6422 = vst [vmem:[#allocation20_spill] sm:$0xff] %v6084_v43  ;;  %v6086_v11 = vpop.eup %4141  ;;  %v3055_v25 = vadd.f32 %v3039_v54, %v2991_v23  ;;  %v3056_v53 = vadd.f32 %v3040_v10, %v2992_v39 }
0x1d6f   :  { %6423 = vst [vmem:[#allocation24_spill] sm:$0xff] %v6086_v11  ;;  %v2846_v48 = vadd.f32 %v6086_v11, %v6084_v43  ;;  %v4144_v23 = vpop.eup %4143 }
0x1d70   :  { %2832 = vadd.xlane.f32.xlu1 %v2831_v22  ;;  %v2896_v20 = vmul.f32 %v4144_v23, %v5802_v51 }
0x1d71   :  { %2847 = vadd.xlane.f32.xlu0 %v2846_v48  ;;  %v2895_v48 = vmul.f32 %v4144_v23, %v5800_v0 }
0x1d87   :  { %3158 = vperm.xlu0 %3830, %v6424_v49   ;;  %v2999_v49 = vmul.f32 %v6003_v7, %v2895_v48 }
0x1d90   :  { %v2800_v30 = vpop.xlane.xlu0 %2799 }
0x1d91   :  { %4145 = vrcp.f32 %v2800_v30  ;;  %v6426_v30 = vld [vmem:[#allocation45_spill] sm:$0xff] }
0x1d92   :  { %4147 = vrcp.f32 %v6425_v52 }
0x1d94   :  { %v2806_v36 = vpop.xlane.xlu0 %2805 }
0x1d98   :  { %v2812_v29 = vpop.xlane.xlu0 %2811 }
0x1d99   :  { %4149 = vrcp.f32 %v2812_v29 }
0x1d9a   :  { %4151 = vrcp.f32 %v6017_v46 }
0x1d9b   :  { %4153 = vrcp.f32 %v2806_v36  ;;  %v3000_v36 = vmul.f32 %v6003_v7, %v2896_v20 }
0x1d9c   :  { %v2818_v39 = vpop.xlane.xlu0 %2817 }
0x1d9d   :  { %4155 = vrcp.f32 %v2818_v39 }
0x1d9e   :  { %v4146_v6 = vpop.eup %4145 }
0x1d9f   :  { %v2911_v54 = vmul.f32 %v4146_v6, %v5907_v45  ;;  %v2912_v10 = vmul.f32 %v4146_v6, %v5910_v37  ;;  %v4148_v51 = vpop.eup %4147 }
0x1da0   :  { %v2824_v22 = vpop.xlane.xlu0 %2823 }
0x1da1   :  { %4157 = vrcp.f32 %v2824_v22  ;;  %v3047_v52 = vmul.f32 %v6426_v30, %v2911_v54  ;;  %v3048_v46 = vmul.f32 %v6426_v30, %v2912_v10  ;;  %v6427_v10 = vld [vmem:[#allocation31_spill] sm:$0xff] }
0x1da3   :  { %v3063_v29 = vadd.f32 %v3047_v52, %v2999_v49  ;;  %v3064_v0 = vadd.f32 %v3048_v46, %v3000_v36  ;;  %v6428_v52 = vld [vmem:[#allocation5_spill] sm:$0xff]  ;;  %v6429_v36 = vld [vmem:[#allocation43_spill] sm:$0xff] }
0x1da4   :  { %v2830_v39 = vpop.xlane.xlu0 %2829  ;;  %v6106_v11 = vpop.xlane.xlu1 %2778  ;;  %v2883_v46 = vmul.f32 %v4148_v51, %v6428_v52 }
0x1da5   :  { %4159 = vrcp.f32 %v2830_v39 }
0x1da6   :  { %v4150_v45 = vpop.eup %4149  ;;  %4161 = vrcp.f32 %v5901_v3 }
0x1da7   :  { %v4152_v23 = vpop.eup %4151  ;;  %v2919_v37 = vmul.f32 %v4150_v45, %v5920_v21  ;;  %v2920_v48 = vmul.f32 %v4150_v45, %v5924_v14  ;;  %v6430_v21 = vld [vmem:[#allocation44_spill] sm:$0xff] }
0x1da8   :  { %v2551_v6 = vpop.xlane.xlu1 %2550  ;;  %v4154_v54 = vpop.eup %4153  ;;  %v2899_v39 = vmul.f32 %v4152_v23, %v6429_v36  ;;  %v2900_v43 = vmul.f32 %v4152_v23, %v6430_v21  ;;  %v6432_v36 = vld [vmem:[#allocation32_spill] sm:$0xff]  ;;  %v6433_v23 = vld [vmem:[#allocation22_spill] sm:$0xff] }
0x1da9   :  { %v3103_v22 = vmul.f32 %v6427_v10, %v2919_v37  ;;  %v3104_v7 = vmul.f32 %v6427_v10, %v2920_v48  ;;  %v2617_v20 = vsub.f32 %v5982_v50, %v2551_v6  ;;  %v2618_v49 = vsub.f32 %v5974_v34, %v2551_v6  ;;  %v6431_v48 = vld [vmem:[#allocation6_spill] sm:$0xff] }
0x1daa   :  { %v4156_v30 = vpop.eup %4155  ;;  %v2884_v10 = vmul.f32 %v4148_v51, %v6431_v48  ;;  %v2915_v50 = vmul.f32 %v4154_v54, %v5912_v5  ;;  %v2916_v52 = vmul.f32 %v4154_v54, %v5916_v33  ;;  %v6435_v5 = vld [vmem:[#allocation42_spill] sm:$0xff]  ;;  %v6436_v54 = vld [vmem:[#allocation7_spill] sm:$0xff] }
0x1dab   :  { %v6118_v14 = vadd.f32 %v3103_v22, %v3055_v25  ;;  %v6120_v3 = vadd.f32 %v3104_v7, %v3056_v53  ;;  %v2923_v45 = vmul.f32 %v4156_v30, %v5928_v31  ;;  %v2924_v37 = vmul.f32 %v4156_v30, %v5934_v35  ;;  %v6434_v35 = vld [vmem:[#allocation41_spill] sm:$0xff] }
0x1dac   :  { %v2737_v34 = vmul.f32 1.442695, %v2617_v20  ;;  %v2739_v6 = vmul.f32 1.442695, %v2618_v49  ;;  %v2785_v63 = vpop.xlane.xlu1 %2784  ;;  %v3035_v22 = vmul.f32 %v6433_v23, %v2899_v39  ;;  %v3036_v31 = vmul.f32 %v6433_v23, %v2900_v43 }
0x1dad   :  { %v3107_v17 = vmul.f32 %v6432_v36, %v2923_v45  ;;  %v3108_v25 = vmul.f32 %v6432_v36, %v2924_v37  ;;  %4163 = vrcp.f32 %v2785_v63  ;;  %v2987_v20 = vmul.f32 %v6436_v54, %v2883_v46  ;;  %v6437_v63 = vld [vmem:[#allocation8_spill] sm:$0xff] }
0x1dae   :  { %v4158_v53 = vpop.eup %4157  ;;  %4165 = vpow2.f32 %v2737_v34  ;;  %v2988_v49 = vmul.f32 %v6436_v54, %v2884_v10  ;;  %v3099_v30 = vmul.f32 %v6437_v63, %v2915_v50  ;;  %v3100_v43 = vmul.f32 %v6437_v63, %v2916_v52 }
0x1daf   :  { %v6132_v51 = vadd.f32 %v3107_v17, %v6434_v35  ;;  %v6135_v7 = vadd.f32 %v3108_v25, %v6435_v5  ;;  %4167 = vpow2.f32 %v2739_v6  ;;  %v2927_v33 = vmul.f32 %v4158_v53, %v5944_v57 }
0x1db0   :  { %v2557_v21 = vpop.xlane.xlu1 %2556  ;;  %v2928_v39 = vmul.f32 %v4158_v53, %v5948_v55  ;;  %v3051_v34 = vadd.f32 %v3035_v22, %v2987_v20  ;;  %v3052_v57 = vadd.f32 %v3036_v31, %v2988_v49  ;;  %v6438_v53 = vld [vmem:[#allocation33_spill] sm:$0xff] }
0x1db1   :  { %v2621_v17 = vsub.f32 %v5998_v28, %v2557_v21  ;;  %v2622_v45 = vsub.f32 %v5992_v60, %v2557_v21  ;;  %v3111_v37 = vmul.f32 %v6005_v62, %v2927_v33 }
0x1db2   :  { %v4160_v48 = vpop.eup %4159  ;;  %v3112_v46 = vmul.f32 %v6005_v62, %v2928_v39  ;;  %v3115_v55 = vadd.f32 %v3099_v30, %v3051_v34  ;;  %v3116_v60 = vadd.f32 %v3100_v43, %v3052_v57  ;;  %v6441_v30 = vld [vmem:[#allocation17_spill] sm:$0xff] }
0x1db3   :  { %v2931_v10 = vmul.f32 %v4160_v48, %v5962_v26  ;;  %v2932_v50 = vmul.f32 %v4160_v48, %v5966_v42  ;;  %v2745_v6 = vmul.f32 1.442695, %v2621_v17  ;;  %v2747_v36 = vmul.f32 1.442695, %v2622_v45  ;;  %v4162_v28 = vpop.eup %4161  ;;  %v6439_v26 = vld [vmem:[#allocation35_spill] sm:$0xff]  ;;  %v6440_v42 = vld [vmem:[#allocation36_spill] sm:$0xff] }
0x1db4   :  { %v6149_v25 = vadd.f32 %v3111_v37, %v3063_v29  ;;  %v6151_v52 = vadd.f32 %v3112_v46, %v3064_v0  ;;  %v2885_v35 = vmul.f32 %v4162_v28, %v6439_v26  ;;  %v2886_v5 = vmul.f32 %v4162_v28, %v6440_v42  ;;  %v6442_v43 = vld [vmem:[#allocation13_spill] sm:$0xff] }
0x1db5   :  { %v3163_v23 = vmul.f32 %v6438_v53, %v2931_v10  ;;  %v3164_v22 = vmul.f32 %v6438_v53, %v2932_v50  ;;  %4169 = vpow2.f32 %v2745_v6 }
0x1db6   :  { %4171 = vpow2.f32 %v2747_v36  ;;  %v2989_v21 = vmul.f32 %v6441_v30, %v2885_v35  ;;  %v2990_v39 = vmul.f32 %v6441_v30, %v2886_v5  ;;  %v6443_v36 = vld [vmem:[#allocation4_spill] sm:$0xff] }
0x1db7   :  { %v3179_v62 = vadd.f32 %v3163_v23, %v3115_v55  ;;  %v3180_v31 = vadd.f32 %v3164_v22, %v3116_v60  ;;  %v6186_v55 = vpop.permute.xlu1 %3146 }
0x1db9   :  { %v3195_v33 = vadd.f32 1e-08, %v3179_v62  ;;  %v3196_v54 = vadd.f32 1e-08, %v3180_v31 }
0x1dba   :  { %v4164_v29 = vpop.eup %4163 }
0x1dbb   :  { %v6157_v20 = vpop.eup %4165  ;;  %4173 = vlog2.f32 %v3195_v33  ;;  %v2901_v0 = vmul.f32 %v4164_v29, %v5984_v24  ;;  %v2902_v49 = vmul.f32 %v4164_v29, %v5988_v47 }
0x1dbc   :  { %v6161_v63 = vpop.eup %4167  ;;  %4175 = vlog2.f32 %v3196_v54  ;;  %v6445_v54 = vld [vmem:[#allocation15_spill] sm:$0xff] }
0x1dbd   :  { %v3037_v17 = vmul.f32 %v6442_v43, %v2901_v0  ;;  %v3038_v45 = vmul.f32 %v6442_v43, %v2902_v49  ;;  %v2837_v37 = vadd.f32 %v6161_v63, %v6157_v20  ;;  %4177 = vrcp.f32 %v6106_v11 }
0x1dbe   :  { %4179 = vrcp.f32 %v5896_v4  ;;  %v6444_v4 = vld [vmem:[#allocation14_spill] sm:$0xff] }
0x1dbf   :  { %v6169_v48 = vadd.f32 %v3037_v17, %v2989_v21  ;;  %v6171_v34 = vadd.f32 %v3038_v45, %v2990_v39  ;;  %2838 = vadd.xlane.f32.xlu1 %v2837_v37  ;;  %v6446_v39 = vld [vmem:[#allocation21_spill] sm:$0xff]  ;;  %v6447_v37 = vld [vmem:[#allocation12_spill] sm:$0xff] }
0x1dc2   :  { %v6173_v24 = vpop.eup %4169 }
0x1dc3   :  { %v6175_v47 = vpop.eup %4171 }
0x1dc4   :  { %v2843_v57 = vadd.f32 %v6175_v47, %v6173_v24 }
0x1dc6   :  { %2844 = vadd.xlane.f32.xlu1 %v2843_v57 }
0x1dc8   :  { %v4174_v46 = vpop.eup %4173 }
0x1dc9   :  { %v4176_v10 = vpop.eup %4175  ;;  %v3214_v50 = vmul.f32 0.6931472, %v4174_v46 }
0x1dca   :  { %v3216_v6 = vmul.f32 0.6931472, %v4176_v10  ;;  %v4178_v31 = vpop.eup %4177 }
0x1dcb   :  { %3243 = vst [vmem:[%s6317_s11 + $0x10] sm:$0xff] %v3214_v50  ;;  %v4180_v35 = vpop.eup %4179  ;;  %v2897_v42 = vmul.f32 %v4178_v31, %v5968_v2  ;;  %v2898_v21 = vmul.f32 %v4178_v31, %v5970_v15 }
0x1dcc   :  { %3244 = vst [vmem:[%s6317_s11 + $0x18] sm:$0xff] %v3216_v6  ;;  %v2881_v33 = vmul.f32 %v4180_v35, %v6444_v4  ;;  %v2882_v29 = vmul.f32 %v4180_v35, %v6445_v54 }
0x1dcd   :  { %v3033_v43 = vmul.f32 %v6446_v39, %v2897_v42 }
0x1dd7   :  { %3154 = vperm.xlu1 %3829, %v6443_v36  }
0x1de5   :  { %v2803_v28 = vpop.xlane.xlu1 %2802 }
0x1de6   :  { %4181 = vrcp.f32 %v2803_v28 }
0x1de9   :  { %v2809_v60 = vpop.xlane.xlu1 %2808 }
0x1dea   :  { %v2836_v53 = vpop.xlane.xlu0 %2835 }
0x1deb   :  { %4183 = vrcp.f32 %v2836_v53  ;;  %v6449_v53 = vld [vmem:[#allocation9_spill] sm:$0xff] }
0x1ded   :  { %v2815_v23 = vpop.xlane.xlu1 %2814 }
0x1dee   :  { %4185 = vrcp.f32 %v2815_v23 }
0x1def   :  { %4187 = vrcp.f32 %v2809_v60 }
0x1df1   :  { %v2821_v22 = vpop.xlane.xlu1 %2820 }
0x1df2   :  { %v2842_v62 = vpop.xlane.xlu0 %2841  ;;  %4189 = vrcp.f32 %v2821_v22 }
0x1df3   :  { %4191 = vrcp.f32 %v2842_v62  ;;  %v4182_v11 = vpop.eup %4181 }
0x1df4   :  { %v2913_v2 = vmul.f32 %v4182_v11, %v6025_v19  ;;  %v3034_v19 = vmul.f32 %v6446_v39, %v2898_v21  ;;  %v2914_v60 = vmul.f32 %v4182_v11, %v6027_v58  ;;  %v6452_v21 = vld [vmem:[#allocation19_spill] sm:$0xff] }
0x1df5   :  { %v2827_v26 = vpop.xlane.xlu1 %2826 }
0x1df6   :  { %4193 = vrcp.f32 %v2827_v26 }
0x1df8   :  { %v4184_v5 = vpop.eup %4183 }
0x1df9   :  { %v2935_v0 = vmul.f32 %v4184_v5, %v6040_v61  ;;  %v2936_v49 = vmul.f32 %v4184_v5, %v6042_v44  ;;  %v2833_v30 = vpop.xlane.xlu1 %2832  ;;  %v6448_v44 = vld [vmem:[#allocation16_spill] sm:$0xff] }
0x1dfa   :  { %v2848_v17 = vpop.xlane.xlu0 %2847  ;;  %4195 = vrcp.f32 %v2833_v30  ;;  %v2985_v50 = vmul.f32 %v6448_v44, %v2881_v33  ;;  %v2986_v15 = vmul.f32 %v6448_v44, %v2882_v29  ;;  %v6451_v29 = vld [vmem:[#allocation10_spill] sm:$0xff] }
0x1dfb   :  { %v4186_v45 = vpop.eup %4185  ;;  %v3167_v57 = vmul.f32 %v6447_v37, %v2935_v0  ;;  %v3168_v46 = vmul.f32 %v6447_v37, %v2936_v49  ;;  %4197 = vrcp.f32 %v2848_v17 }
0x1dfc   :  { %v2921_v10 = vmul.f32 %v4186_v45, %v6046_v56  ;;  %v2922_v61 = vmul.f32 %v4186_v45, %v6050_v13  ;;  %v4188_v28 = vpop.eup %4187  ;;  %v3049_v62 = vadd.f32 %v3033_v43, %v2985_v50  ;;  %v6450_v13 = vld [vmem:[#allocation28_spill] sm:$0xff]  ;;  %v3050_v49 = vadd.f32 %v3034_v19, %v2986_v15  ;;  %v6453_v43 = vld [vmem:[#allocation30_spill] sm:$0xff]  ;;  %v6455_v15 = vld [vmem:[#allocation37_spill] sm:$0xff] }
0x1dfd   :  { %v3183_v6 = vadd.f32 %v3167_v57, %v6118_v14  ;;  %v3184_v36 = vadd.f32 %v3168_v46, %v6120_v3  ;;  %v3097_v31 = vmul.f32 %v6450_v13, %v2913_v2  ;;  %v2917_v11 = vmul.f32 %v4188_v28, %v6032_v38  ;;  %v6454_v57 = vld [vmem:[#allocation11_spill] sm:$0xff] }
0x1dfe   :  { %v3105_v23 = vmul.f32 %v6449_v53, %v2921_v10  ;;  %v3106_v22 = vmul.f32 %v6449_v53, %v2922_v61  ;;  %v3098_v54 = vmul.f32 %v6450_v13, %v2914_v60  ;;  %v6458_v60 = vld [vmem:[#allocation24_spill] sm:$0xff] }
0x1dff   :  { %v4190_v56 = vpop.eup %4189  ;;  %v3199_v26 = vadd.f32 1e-08, %v3183_v6  ;;  %v3200_v35 = vadd.f32 1e-08, %v3184_v36  ;;  %v3101_v17 = vmul.f32 %v6453_v43, %v2917_v11  ;;  %v3113_v2 = vadd.f32 %v3097_v31, %v3049_v62  ;;  %v6456_v36 = vld [vmem:[#allocation38_spill] sm:$0xff] }
0x1e00   :  { %v4192_v42 = vpop.eup %4191  ;;  %v6212_v14 = vadd.f32 %v3105_v23, %v5950_v32  ;;  %v6215_v3 = vadd.f32 %v3106_v22, %v5952_v1  ;;  %v2925_v5 = vmul.f32 %v4190_v56, %v6052_v40  ;;  %v2926_v58 = vmul.f32 %v4190_v56, %v6056_v16  ;;  %v6459_v56 = vld [vmem:[#allocation34_spill] sm:$0xff] }
0x1e01   :  { %4199 = vlog2.f32 %v3199_v26  ;;  %v2939_v4 = vmul.f32 %v4192_v42, %v6058_v12  ;;  %v2940_v33 = vmul.f32 %v4192_v42, %v6060_v59  ;;  %v2918_v40 = vmul.f32 %v4188_v28, %v6036_v27  ;;  %v6457_v28 = vld [vmem:[#allocation20_spill] sm:$0xff] }
0x1e02   :  { %4201 = vlog2.f32 %v3200_v35  ;;  %v3109_v32 = vmul.f32 %v6451_v29, %v2925_v5  ;;  %v3110_v0 = vmul.f32 %v6451_v29, %v2926_v58  ;;  %v3114_v37 = vadd.f32 %v3098_v54, %v3050_v49  ;;  %v3159_v13 = vpop.permute.xlu0 %3158 }
0x1e03   :  { %v4194_v1 = vpop.eup %4193  ;;  %v3171_v16 = vmul.f32 %v6094_v9, %v2939_v4  ;;  %v3172_v30 = vmul.f32 %v6094_v9, %v2940_v33 }
0x1e04   :  { %v2929_v38 = vmul.f32 %v4194_v1, %v6064_v8  ;;  %v2930_v12 = vmul.f32 %v4194_v1, %v6068_v41  ;;  %v6231_v59 = vadd.f32 %v3109_v32, %v5957_v18  ;;  %v6234_v39 = vadd.f32 %v3110_v0, %v6452_v21 }
0x1e05   :  { %v3187_v45 = vadd.f32 %v3171_v16, %v6132_v51  ;;  %v3188_v27 = vadd.f32 %v3172_v30, %v6135_v7  ;;  %v3102_v41 = vmul.f32 %v6453_v43, %v2918_v40  ;;  %v3117_v7 = vadd.f32 %v3101_v17, %v6169_v48 }
0x1e06   :  { %v3161_v9 = vmul.f32 %v6454_v57, %v2929_v38  ;;  %v3162_v8 = vmul.f32 %v6454_v57, %v2930_v12 }
0x1e07   :  { %v4196_v46 = vpop.eup %4195  ;;  %v3203_v18 = vadd.f32 1e-08, %v3187_v45  ;;  %v3204_v10 = vadd.f32 1e-08, %v3188_v27  ;;  %v3118_v31 = vadd.f32 %v3102_v41, %v6171_v34 }
0x1e08   :  { %v4198_v61 = vpop.eup %4197  ;;  %v3177_v44 = vadd.f32 %v3161_v9, %v3113_v2  ;;  %v3178_v50 = vadd.f32 %v3162_v8, %v3114_v37  ;;  %v2933_v6 = vmul.f32 %v4196_v46, %v6455_v15  ;;  %v2934_v51 = vmul.f32 %v4196_v46, %v6456_v36 }
0x1e09   :  { %4203 = vlog2.f32 %v3203_v18  ;;  %v2943_v19 = vmul.f32 %v4198_v61, %v6457_v28  ;;  %v2944_v53 = vmul.f32 %v4198_v61, %v6458_v60 }
0x1e0a   :  { %4205 = vlog2.f32 %v3204_v10  ;;  %v3193_v23 = vadd.f32 1e-08, %v3177_v44  ;;  %v3194_v22 = vadd.f32 1e-08, %v3178_v50  ;;  %v3165_v62 = vmul.f32 %v6459_v56, %v2933_v6 }
0x1e0b   :  { %v3166_v26 = vmul.f32 %v6459_v56, %v2934_v51  ;;  %v3175_v35 = vmul.f32 %v3159_v13, %v2943_v19  ;;  %v3176_v42 = vmul.f32 %v3159_v13, %v2944_v53 }
0x1e0c   :  { %4207 = vlog2.f32 %v3193_v23  ;;  %v3181_v5 = vadd.f32 %v3165_v62, %v3117_v7 }
0x1e0d   :  { %4209 = vlog2.f32 %v3194_v22  ;;  %v3182_v48 = vadd.f32 %v3166_v26, %v3118_v31  ;;  %v3191_v58 = vadd.f32 %v3175_v35, %v6149_v25  ;;  %v3192_v11 = vadd.f32 %v3176_v42, %v6151_v52 }
0x1e0e   :  { %v4200_v4 = vpop.eup %4199  ;;  %v3197_v33 = vadd.f32 1e-08, %v3181_v5 }
0x1e0f   :  { %v4202_v54 = vpop.eup %4201  ;;  %v3222_v29 = vmul.f32 0.6931472, %v4200_v4  ;;  %v3198_v32 = vadd.f32 1e-08, %v3182_v48  ;;  %v3207_v0 = vadd.f32 1e-08, %v3191_v58 }
0x1e10   :  { %v3224_v1 = vmul.f32 0.6931472, %v4202_v54  ;;  %4211 = vlog2.f32 %v3197_v33  ;;  %v3208_v34 = vadd.f32 1e-08, %v3192_v11 }
0x1e11   :  { %3247 = vst [vmem:[%s6317_s11 + $0x30] sm:$0xff] %v3222_v29  ;;  %4213 = vlog2.f32 %v3198_v32 }
0x1e12   :  { %3248 = vst [vmem:[%s6317_s11 + $0x38] sm:$0xff] %v3224_v1  ;;  %4215 = vlog2.f32 %v3207_v0 }
0x1e13   :  { %4217 = vlog2.f32 %v3208_v34 }
0x1e16   :  { %v4204_v25 = vpop.eup %4203 }
0x1e17   :  { %v4206_v52 = vpop.eup %4205  ;;  %v3230_v49 = vmul.f32 0.6931472, %v4204_v25 }
0x1e18   :  { %v3232_v40 = vmul.f32 0.6931472, %v4206_v52 }
0x1e19   :  { %v4208_v16 = vpop.eup %4207  ;;  %3251 = vst [vmem:[%s6317_s11 + $0x50] sm:$0xff] %v3230_v49 }
0x1e1a   :  { %v4210_v30 = vpop.eup %4209  ;;  %3252 = vst [vmem:[%s6317_s11 + $0x58] sm:$0xff] %v3232_v40  ;;  %v3210_v38 = vmul.f32 0.6931472, %v4208_v16 }
0x1e1b   :  { %v3212_v12 = vmul.f32 0.6931472, %v4210_v30 }
0x1e1c   :  { %3241 = vst [vmem:[%s6317_s11] sm:$0xff] %v3210_v38 }
0x1e1d   :  { %v4212_v21 = vpop.eup %4211  ;;  %3242 = vst [vmem:[%s6317_s11 + $0x8] sm:$0xff] %v3212_v12 }
0x1e1e   :  { %v4214_v43 = vpop.eup %4213  ;;  %v3218_v17 = vmul.f32 0.6931472, %v4212_v21 }
0x1e1f   :  { %v4216_v45 = vpop.eup %4215  ;;  %v3220_v27 = vmul.f32 0.6931472, %v4214_v43 }
0x1e20   :  { %v4218_v2 = vpop.eup %4217  ;;  %3245 = vst [vmem:[%s6317_s11 + $0x20] sm:$0xff] %v3218_v17  ;;  %v3238_v37 = vmul.f32 0.6931472, %v4216_v45 }
0x1e21   :  { %3246 = vst [vmem:[%s6317_s11 + $0x28] sm:$0xff] %v3220_v27  ;;  %v3240_v57 = vmul.f32 0.6931472, %v4218_v2 }
0x1e22   :  { %3255 = vst [vmem:[%s6317_s11 + $0x70] sm:$0xff] %v3238_v37 }
0x1e23   :  { %3256 = vst [vmem:[%s6317_s11 + $0x78] sm:$0xff] %v3240_v57 }
0x1e48   :  { %v2839_v9 = vpop.xlane.xlu1 %2838 }
0x1e49   :  { %4219 = vrcp.f32 %v2839_v9 }
0x1e4f   :  { %v2845_v8 = vpop.xlane.xlu1 %2844 }
0x1e50   :  { %4221 = vrcp.f32 %v2845_v8 }
0x1e53   :  { %v3155_v28 = vpop.permute.xlu1 %3154 }
0x1e56   :  { %v4220_v46 = vpop.eup %4219 }
0x1e57   :  { %v2937_v41 = vmul.f32 %v4220_v46, %v6157_v20  ;;  %v2938_v18 = vmul.f32 %v4220_v46, %v6161_v63 }
0x1e59   :  { %v3169_v10 = vmul.f32 %v6186_v55, %v2937_v41  ;;  %v3170_v61 = vmul.f32 %v6186_v55, %v2938_v18 }
0x1e5b   :  { %v3185_v44 = vadd.f32 %v3169_v10, %v6212_v14  ;;  %v3186_v50 = vadd.f32 %v3170_v61, %v6215_v3 }
0x1e5d   :  { %v4222_v15 = vpop.eup %4221  ;;  %v3201_v6 = vadd.f32 1e-08, %v3185_v44  ;;  %v3202_v36 = vadd.f32 1e-08, %v3186_v50 }
0x1e5e   :  { %v2941_v51 = vmul.f32 %v4222_v15, %v6173_v24  ;;  %v2942_v7 = vmul.f32 %v4222_v15, %v6175_v47 }
0x1e5f   :  { %4223 = vlog2.f32 %v3201_v6 }
0x1e60   :  { %4225 = vlog2.f32 %v3202_v36  ;;  %v3173_v20 = vmul.f32 %v3155_v28, %v2941_v51  ;;  %v3174_v63 = vmul.f32 %v3155_v28, %v2942_v7 }
0x1e62   :  { %v3189_v19 = vadd.f32 %v3173_v20, %v6231_v59  ;;  %v3190_v55 = vadd.f32 %v3174_v63, %v6234_v39 }
0x1e64   :  { %v3205_v60 = vadd.f32 1e-08, %v3189_v19  ;;  %v3206_v14 = vadd.f32 1e-08, %v3190_v55 }
0x1e66   :  { %4227 = vlog2.f32 %v3205_v60 }
0x1e67   :  { %4229 = vlog2.f32 %v3206_v14 }
0x1e6c   :  { %v4224_v3 = vpop.eup %4223 }
0x1e6d   :  { %v4226_v53 = vpop.eup %4225  ;;  %v3226_v23 = vmul.f32 0.6931472, %v4224_v3 }
0x1e6e   :  { %v3228_v22 = vmul.f32 0.6931472, %v4226_v53 }
0x1e6f   :  { %3249 = vst [vmem:[%s6317_s11 + $0x40] sm:$0xff] %v3226_v23 }
0x1e70   :  { %3250 = vst [vmem:[%s6317_s11 + $0x48] sm:$0xff] %v3228_v22 }
0x1e73   :  { %v4228_v24 = vpop.eup %4227 }
0x1e74   :  { %v4230_v47 = vpop.eup %4229  ;;  %v3234_v59 = vmul.f32 0.6931472, %v4228_v24 }
0x1e75   :  { %v3236_v39 = vmul.f32 0.6931472, %v4230_v47 }
0x1e76   :  { %3253 = vst [vmem:[%s6317_s11 + $0x60] sm:$0xff] %v3234_v59 }
0x1e77   :  { %3254 = vst [vmem:[%s6317_s11 + $0x68] sm:$0xff] %v3236_v39 }

</bundles_post_ra>
